<compile_context>
chip_gen: v7x
topology: tpu7x:2x2x1
jax: 0.10.0
libtpu: 0.0.40
codegen_flags: <defaults>
</compile_context>

<pallas_src>
import functools

import jax
import jax.numpy as jnp
from jax import lax
from jax.experimental import pallas as pl
from jax.experimental.pallas import tpu as pltpu


def _round_up(x, m):
    return (x + m - 1) // m * m


def _pick_vmem_limit():
    """Per-generation VMEM budget: headroom on v7x's 64 MiB/TC, raised scoped
    limit on the 128 MiB v5e/v6e parts.  Falls back to compiler default."""
    try:
        cap = pltpu.get_tpu_info().vmem_capacity_bytes
        return int(min(cap * 3 // 4, 96 * 1024 * 1024))
    except Exception:
        return None


def _doc_cls_kernel(x_ref, w_conv_ref, b_conv_ref, w_fc_ref, b_fc_ref, out_ref,
                    *, H, W, inv_hw):
    """Grid: (B,).  One zero-padded image per step (fused im2col conv + GAP + fc).

    x_ref      : (1, R_pad, Cin)  bf16  padded NHWC image, spatial positions
                                        flattened as rows of (H+2)*(W+2).
    w_conv_ref : (9, Cin, Fp)     bf16  3x3 conv taps, k = di*3 + dj.
    b_conv_ref : (1, Fp)          f32
    w_fc_ref   : (Fp, Cp)         f32   replaced classifier head (kept f32).
    b_fc_ref   : (1, Cp)          f32
    out_ref    : (1, 1, Cp)       f32   logits.
    """
    Wp2 = W + 2
    M = H * Wp2                       # conv output rows (incl. 2 wrap cols/row)
    Fp = w_conv_ref.shape[-1]

    x = x_ref[0]                      # (R_pad, Cin) bf16, one aligned load

    # 3x3 conv as 9 shifted matmuls.  x @ w_k evaluated on the full padded row
    # stream; tap k's contribution to output position p is row (p + off_k) of
    # that product, so we shift the f32 result (cheap, unpacked) and accumulate.
    acc = jnp.zeros((M, Fp), jnp.float32)
    for k in range(9):
        di, dj = divmod(k, 3)
        off = di * Wp2 + dj
        y = jnp.dot(x, w_conv_ref[k], preferred_element_type=jnp.float32)
        acc = acc + y[off:off + M, :]

    act = jnp.maximum(acc + b_conv_ref[...], 0.0)        # (M, Fp) f32

    # Mask the 2 wrap-around columns per spatial row (j in {W, W+1}) before GAP.
    col = lax.broadcasted_iota(jnp.int32, (M, 1), 0) % Wp2
    act = jnp.where(col < W, act, 0.0)

    # GAP: cross-vreg VPU adds down to (8, Fp), then a single sublane reduce.
    if M % 8 == 0:
        pooled = act.reshape(M // 8, 8, Fp).sum(axis=0).sum(axis=0, keepdims=True)
    else:
        pooled = act.sum(axis=0, keepdims=True)
    pooled = pooled * inv_hw                              # (1, Fp) f32

    # Replaced fc head: Linear(num_features, num_classes), kept in f32 (tiny).
    logits = jnp.dot(pooled, w_fc_ref[...], preferred_element_type=jnp.float32)
    out_ref[0] = logits + b_fc_ref[...]


def doc_classification_forward(x_nchw, w_conv, b_conv, w_fc, b_fc):
    B, Cin, H, W = x_nchw.shape
    K, F = w_conv.shape            # K = 9*Cin, F = num_features
    assert K == 9 * Cin
    C = w_fc.shape[1]              # num_classes
    Hp2, Wp2 = H + 2, W + 2

    # +2 rows so the (di=2, dj=2) shifted window stays in-bounds; round to a
    # multiple of 16 for bf16 sublane packing.
    R = Hp2 * Wp2 + 2
    R_pad = _round_up(R, 16)
    Fp = _round_up(F, 128)         # resident weights only: lane-dense padding
    Cp = _round_up(C, 128)

    # Fused im2col: only the (zero-padded) activation is streamed, once, bf16,
    # at its true channel width (no K padding in HBM).
    x_nhwc = jnp.transpose(x_nchw, (0, 2, 3, 1)).astype(jnp.float32)
    xp = jnp.pad(x_nhwc, ((0, 0), (1, 1), (1, 1), (0, 0)))        # (B,H+2,W+2,Cin)
    x_flat = xp.reshape(B, Hp2 * Wp2, Cin)
    x_flat = jnp.pad(x_flat, ((0, 0), (0, R_pad - Hp2 * Wp2), (0, 0)))
    x_flat = x_flat.astype(jnp.bfloat16)                          # (B, R_pad, Cin)

    # Resident weights / biases (padding them is free; they are not streamed).
    w9 = w_conv.reshape(3, 3, Cin, F).reshape(9, Cin, F)
    w9p = jnp.pad(w9, ((0, 0), (0, 0), (0, Fp - F))).astype(jnp.bfloat16)
    b_conv_p = jnp.pad(b_conv, ((0, Fp - F),)).reshape(1, Fp).astype(jnp.float32)
    w_fc_p = jnp.pad(w_fc, ((0, Fp - F), (0, Cp - C))).astype(jnp.float32)
    b_fc_p = jnp.pad(b_fc, ((0, Cp - C),)).reshape(1, Cp).astype(jnp.float32)

    kernel = functools.partial(_doc_cls_kernel, H=H, W=W, inv_hw=1.0 / (H * W))

    compiler_kwargs = dict(dimension_semantics=("parallel",))
    vmem_limit = _pick_vmem_limit()
    if vmem_limit is not None:
        compiler_kwargs["vmem_limit_bytes"] = vmem_limit

    out = pl.pallas_call(
        kernel,
        out_shape=jax.ShapeDtypeStruct((B, 1, Cp), jnp.float32),
        grid=(B,),
        in_specs=[
            # streamed: one whole padded image per step (largest tile that fits)
            pl.BlockSpec((1, R_pad, Cin), lambda b: (b, 0, 0)),
            # resident weights / biases
            pl.BlockSpec((9, Cin, Fp), lambda b: (0, 0, 0)),
            pl.BlockSpec((1, Fp), lambda b: (0, 0)),
            pl.BlockSpec((Fp, Cp), lambda b: (0, 0)),
            pl.BlockSpec((1, Cp), lambda b: (0, 0)),
        ],
        out_specs=pl.BlockSpec((1, 1, Cp), lambda b: (b, 0, 0)),
        compiler_params=pltpu.CompilerParams(**compiler_kwargs),
    )(x_flat, w9p, b_conv_p, w_fc_p, b_fc_p)

    return out[:, 0, :C]


def _im2col_3x3(x_nhwc):
    """3x3, stride 1, padding 1 patches.  (B,H,W,Cin) -> (B, H*W, 9*Cin)."""
    B, H, W, Cin = x_nhwc.shape
    xp = jnp.pad(x_nhwc, ((0, 0), (1, 1), (1, 1), (0, 0)))
    cols = []
    for di in range(3):
        for dj in range(3):
            cols.append(xp[:, di:di + H, dj:dj + W, :])
    patches = jnp.concatenate(cols, axis=-1)                # (B,H,W,9*Cin)
    return patches.reshape(B, H * W, 9 * Cin)


def _reference_forward(x_nchw, w_conv, b_conv, w_fc, b_fc):
    x_nhwc = jnp.transpose(x_nchw, (0, 2, 3, 1)).astype(jnp.float32)
    patches = _im2col_3x3(x_nhwc)                                # (B, HW, K)
    conv = jnp.maximum(patches @ w_conv + b_conv[None, None, :], 0.0)
    pooled = conv.mean(axis=1)                                   # (B, F)
    return pooled @ w_fc + b_fc[None, :]


if __name__ == "__main__":
    # small shapes consistent with the module's forward
    B, Cin, H, W = 2, 4, 16, 16
    num_features = 32      # self.pretrained_model.fc.in_features (synthetic)
    num_classes = 8        # args.num_classes (synthetic)

    key = jax.random.PRNGKey(0)
    k_x, k_wc, k_bc, k_wf, k_bf = jax.random.split(key, 5)

    x = jax.random.normal(k_x, (B, Cin, H, W), dtype=jnp.float32)
    # conv stem weight as (9*Cin, num_features) im2col matrix
    w_conv = jax.random.normal(k_wc, (9 * Cin, num_features), jnp.float32) * 0.1
    b_conv = jax.random.normal(k_bc, (num_features,), jnp.float32) * 0.1
    # replaced fc: Linear(num_features, num_classes)
    w_fc = jax.random.normal(k_wf, (num_features, num_classes), jnp.float32) * 0.1
    b_fc = jax.random.normal(k_bf, (num_classes,), jnp.float32) * 0.1

    out = doc_classification_forward(x, w_conv, b_conv, w_fc, b_fc)
    out = jax.block_until_ready(out)

    ref = _reference_forward(x, w_conv, b_conv, w_fc, b_fc)
    assert out.shape == (B, num_classes)
    # bf16 conv operands / f32 accumulation + f32 fc -> relaxed tolerance
    assert jnp.allclose(out, ref, atol=2e-2, rtol=2e-2), float(jnp.max(jnp.abs(out - ref)))

    print("KERNEL_OK")
</pallas_src>

<mosaic_0001>
module attributes {stable_mosaic.version = 11 : i64} {
  func.func @_doc_cls_kernel(%arg0: i32, %arg1: memref<1x336x4xbf16, #tpu.memory_space<vmem>>, %arg2: memref<9x4x128xbf16, #tpu.memory_space<vmem>>, %arg3: memref<1x128xf32, #tpu.memory_space<vmem>>, %arg4: memref<128x128xf32, #tpu.memory_space<vmem>>, %arg5: memref<1x128xf32, #tpu.memory_space<vmem>>, %arg6: memref<1x1x128xf32, #tpu.memory_space<vmem>>) attributes {dimension_semantics = [#tpu.dimension_semantics<parallel>], iteration_bounds = array<i64: 2>, scalar_prefetch = 0 : i64, scratch_operands = 0 : i64, tpu.core_type = #tpu.core_type<tc>, window_params = [{transform_indices = @transform_0, window_bounds = array<i64: 1, 336, 4>}, {pipeline_mode = #tpu.pipeline_mode<synchronous>, transform_indices = @transform_1, window_bounds = array<i64: 9, 4, 128>}, {pipeline_mode = #tpu.pipeline_mode<synchronous>, transform_indices = @transform_2, window_bounds = array<i64: 1, 128>}, {pipeline_mode = #tpu.pipeline_mode<synchronous>, transform_indices = @transform_3, window_bounds = array<i64: 128, 128>}, {pipeline_mode = #tpu.pipeline_mode<synchronous>, transform_indices = @transform_4, window_bounds = array<i64: 1, 128>}, {transform_indices = @transform_5, window_bounds = array<i64: 1, 1, 128>}]} {
    %c0 = arith.constant 0 : index
    %c0_0 = arith.constant 0 : index
    %c0_1 = arith.constant 0 : index
    %0 = vector.load %arg1[%c0, %c0_0, %c0_1] : memref<1x336x4xbf16, #tpu.memory_space<vmem>>, vector<1x336x4xbf16>
    %1 = vector.shape_cast %0 : vector<1x336x4xbf16> to vector<336x4xbf16>
    %cst = arith.constant 0.000000e+00 : f32
    %2 = vector.broadcast %cst : f32 to vector<288x128xf32>
    %c0_2 = arith.constant 0 : index
    %c0_3 = arith.constant 0 : index
    %c0_4 = arith.constant 0 : index
    %3 = vector.load %arg2[%c0_2, %c0_3, %c0_4] : memref<9x4x128xbf16, #tpu.memory_space<vmem>>, vector<1x4x128xbf16>
    %4 = vector.shape_cast %3 : vector<1x4x128xbf16> to vector<4x128xbf16>
    %cst_5 = arith.constant dense<0.000000e+00> : vector<336x128xf32>
    %5 = tpu.matmul %1, %4, %cst_5 {dimension_numbers = #tpu.dot_dimension_numbers<[1], [0], [0], [1], [0, 0, 1, 1], [], []>} : vector<336x4xbf16>, vector<4x128xbf16>, vector<336x128xf32> -> vector<336x128xf32>
    %6 = vector.extract_strided_slice %5 {offsets = [0, 0], sizes = [288, 128], strides = [1, 1]} : vector<336x128xf32> to vector<288x128xf32>
    %7 = arith.addf %2, %6 : vector<288x128xf32>
    %c1 = arith.constant 1 : index
    %c0_6 = arith.constant 0 : index
    %c0_7 = arith.constant 0 : index
    %8 = vector.load %arg2[%c1, %c0_6, %c0_7] : memref<9x4x128xbf16, #tpu.memory_space<vmem>>, vector<1x4x128xbf16>
    %9 = vector.shape_cast %8 : vector<1x4x128xbf16> to vector<4x128xbf16>
    %cst_8 = arith.constant dense<0.000000e+00> : vector<336x128xf32>
    %10 = tpu.matmul %1, %9, %cst_8 {dimension_numbers = #tpu.dot_dimension_numbers<[1], [0], [0], [1], [0, 0, 1, 1], [], []>} : vector<336x4xbf16>, vector<4x128xbf16>, vector<336x128xf32> -> vector<336x128xf32>
    %11 = vector.extract_strided_slice %10 {offsets = [1, 0], sizes = [288, 128], strides = [1, 1]} : vector<336x128xf32> to vector<288x128xf32>
    %12 = arith.addf %7, %11 : vector<288x128xf32>
    %c2 = arith.constant 2 : index
    %c0_9 = arith.constant 0 : index
    %c0_10 = arith.constant 0 : index
    %13 = vector.load %arg2[%c2, %c0_9, %c0_10] : memref<9x4x128xbf16, #tpu.memory_space<vmem>>, vector<1x4x128xbf16>
    %14 = vector.shape_cast %13 : vector<1x4x128xbf16> to vector<4x128xbf16>
    %cst_11 = arith.constant dense<0.000000e+00> : vector<336x128xf32>
    %15 = tpu.matmul %1, %14, %cst_11 {dimension_numbers = #tpu.dot_dimension_numbers<[1], [0], [0], [1], [0, 0, 1, 1], [], []>} : vector<336x4xbf16>, vector<4x128xbf16>, vector<336x128xf32> -> vector<336x128xf32>
    %16 = vector.extract_strided_slice %15 {offsets = [2, 0], sizes = [288, 128], strides = [1, 1]} : vector<336x128xf32> to vector<288x128xf32>
    %17 = arith.addf %12, %16 : vector<288x128xf32>
    %c3 = arith.constant 3 : index
    %c0_12 = arith.constant 0 : index
    %c0_13 = arith.constant 0 : index
    %18 = vector.load %arg2[%c3, %c0_12, %c0_13] : memref<9x4x128xbf16, #tpu.memory_space<vmem>>, vector<1x4x128xbf16>
    %19 = vector.shape_cast %18 : vector<1x4x128xbf16> to vector<4x128xbf16>
    %cst_14 = arith.constant dense<0.000000e+00> : vector<336x128xf32>
    %20 = tpu.matmul %1, %19, %cst_14 {dimension_numbers = #tpu.dot_dimension_numbers<[1], [0], [0], [1], [0, 0, 1, 1], [], []>} : vector<336x4xbf16>, vector<4x128xbf16>, vector<336x128xf32> -> vector<336x128xf32>
    %21 = vector.extract_strided_slice %20 {offsets = [18, 0], sizes = [288, 128], strides = [1, 1]} : vector<336x128xf32> to vector<288x128xf32>
    %22 = arith.addf %17, %21 : vector<288x128xf32>
    %c4 = arith.constant 4 : index
    %c0_15 = arith.constant 0 : index
    %c0_16 = arith.constant 0 : index
    %23 = vector.load %arg2[%c4, %c0_15, %c0_16] : memref<9x4x128xbf16, #tpu.memory_space<vmem>>, vector<1x4x128xbf16>
    %24 = vector.shape_cast %23 : vector<1x4x128xbf16> to vector<4x128xbf16>
    %cst_17 = arith.constant dense<0.000000e+00> : vector<336x128xf32>
    %25 = tpu.matmul %1, %24, %cst_17 {dimension_numbers = #tpu.dot_dimension_numbers<[1], [0], [0], [1], [0, 0, 1, 1], [], []>} : vector<336x4xbf16>, vector<4x128xbf16>, vector<336x128xf32> -> vector<336x128xf32>
    %26 = vector.extract_strided_slice %25 {offsets = [19, 0], sizes = [288, 128], strides = [1, 1]} : vector<336x128xf32> to vector<288x128xf32>
    %27 = arith.addf %22, %26 : vector<288x128xf32>
    %c5 = arith.constant 5 : index
    %c0_18 = arith.constant 0 : index
    %c0_19 = arith.constant 0 : index
    %28 = vector.load %arg2[%c5, %c0_18, %c0_19] : memref<9x4x128xbf16, #tpu.memory_space<vmem>>, vector<1x4x128xbf16>
    %29 = vector.shape_cast %28 : vector<1x4x128xbf16> to vector<4x128xbf16>
    %cst_20 = arith.constant dense<0.000000e+00> : vector<336x128xf32>
    %30 = tpu.matmul %1, %29, %cst_20 {dimension_numbers = #tpu.dot_dimension_numbers<[1], [0], [0], [1], [0, 0, 1, 1], [], []>} : vector<336x4xbf16>, vector<4x128xbf16>, vector<336x128xf32> -> vector<336x128xf32>
    %31 = vector.extract_strided_slice %30 {offsets = [20, 0], sizes = [288, 128], strides = [1, 1]} : vector<336x128xf32> to vector<288x128xf32>
    %32 = arith.addf %27, %31 : vector<288x128xf32>
    %c6 = arith.constant 6 : index
    %c0_21 = arith.constant 0 : index
    %c0_22 = arith.constant 0 : index
    %33 = vector.load %arg2[%c6, %c0_21, %c0_22] : memref<9x4x128xbf16, #tpu.memory_space<vmem>>, vector<1x4x128xbf16>
    %34 = vector.shape_cast %33 : vector<1x4x128xbf16> to vector<4x128xbf16>
    %cst_23 = arith.constant dense<0.000000e+00> : vector<336x128xf32>
    %35 = tpu.matmul %1, %34, %cst_23 {dimension_numbers = #tpu.dot_dimension_numbers<[1], [0], [0], [1], [0, 0, 1, 1], [], []>} : vector<336x4xbf16>, vector<4x128xbf16>, vector<336x128xf32> -> vector<336x128xf32>
    %36 = vector.extract_strided_slice %35 {offsets = [36, 0], sizes = [288, 128], strides = [1, 1]} : vector<336x128xf32> to vector<288x128xf32>
    %37 = arith.addf %32, %36 : vector<288x128xf32>
    %c7 = arith.constant 7 : index
    %c0_24 = arith.constant 0 : index
    %c0_25 = arith.constant 0 : index
    %38 = vector.load %arg2[%c7, %c0_24, %c0_25] : memref<9x4x128xbf16, #tpu.memory_space<vmem>>, vector<1x4x128xbf16>
    %39 = vector.shape_cast %38 : vector<1x4x128xbf16> to vector<4x128xbf16>
    %cst_26 = arith.constant dense<0.000000e+00> : vector<336x128xf32>
    %40 = tpu.matmul %1, %39, %cst_26 {dimension_numbers = #tpu.dot_dimension_numbers<[1], [0], [0], [1], [0, 0, 1, 1], [], []>} : vector<336x4xbf16>, vector<4x128xbf16>, vector<336x128xf32> -> vector<336x128xf32>
    %41 = vector.extract_strided_slice %40 {offsets = [37, 0], sizes = [288, 128], strides = [1, 1]} : vector<336x128xf32> to vector<288x128xf32>
    %42 = arith.addf %37, %41 : vector<288x128xf32>
    %c8 = arith.constant 8 : index
    %c0_27 = arith.constant 0 : index
    %c0_28 = arith.constant 0 : index
    %43 = vector.load %arg2[%c8, %c0_27, %c0_28] : memref<9x4x128xbf16, #tpu.memory_space<vmem>>, vector<1x4x128xbf16>
    %44 = vector.shape_cast %43 : vector<1x4x128xbf16> to vector<4x128xbf16>
    %cst_29 = arith.constant dense<0.000000e+00> : vector<336x128xf32>
    %45 = tpu.matmul %1, %44, %cst_29 {dimension_numbers = #tpu.dot_dimension_numbers<[1], [0], [0], [1], [0, 0, 1, 1], [], []>} : vector<336x4xbf16>, vector<4x128xbf16>, vector<336x128xf32> -> vector<336x128xf32>
    %46 = vector.extract_strided_slice %45 {offsets = [38, 0], sizes = [288, 128], strides = [1, 1]} : vector<336x128xf32> to vector<288x128xf32>
    %47 = arith.addf %42, %46 : vector<288x128xf32>
    %c0_30 = arith.constant 0 : index
    %c0_31 = arith.constant 0 : index
    %48 = vector.load %arg3[%c0_30, %c0_31] : memref<1x128xf32, #tpu.memory_space<vmem>>, vector<1x128xf32>
    %49 = vector.broadcast %48 : vector<1x128xf32> to vector<288x128xf32>
    %50 = arith.addf %47, %49 : vector<288x128xf32>
    %cst_32 = arith.constant 0.000000e+00 : f32
    %51 = vector.broadcast %cst_32 : f32 to vector<288x128xf32>
    %52 = arith.maximumf %50, %51 : vector<288x128xf32>
    %53 = tpu.iota {dimensions = array<i32: 0>} : vector<288x1xi32>
    %c18_i32 = arith.constant 18 : i32
    %c0_i32 = arith.constant 0 : i32
    %54 = arith.cmpi eq, %c18_i32, %c0_i32 : i32
    %c1_i32 = arith.constant 1 : i32
    %55 = arith.select %54, %c1_i32, %c18_i32 : i32
    %56 = vector.broadcast %55 : i32 to vector<288x1xi32>
    %57 = arith.remsi %53, %56 : vector<288x1xi32>
    %c0_i32_33 = arith.constant 0 : i32
    %58 = vector.broadcast %c0_i32_33 : i32 to vector<288x1xi32>
    %59 = arith.cmpi ne, %57, %58 : vector<288x1xi32>
    %c0_i32_34 = arith.constant 0 : i32
    %60 = vector.broadcast %c0_i32_34 : i32 to vector<288x1xi32>
    %61 = arith.cmpi slt, %57, %60 : vector<288x1xi32>
    %c0_i32_35 = arith.constant 0 : i32
    %62 = arith.cmpi slt, %55, %c0_i32_35 : i32
    %63 = vector.broadcast %62 : i1 to vector<288x1xi1>
    %64 = vector.broadcast %63 : vector<288x1xi1> to vector<288x1xi1>
    %65 = arith.xori %61, %64 : vector<288x1xi1>
    %66 = arith.andi %65, %59 : vector<288x1xi1>
    %67 = vector.broadcast %55 : i32 to vector<288x1xi32>
    %68 = arith.addi %57, %67 : vector<288x1xi32>
    %69 = arith.select %66, %68, %57 : vector<288x1xi1>, vector<288x1xi32>
    %c16_i32 = arith.constant 16 : i32
    %70 = vector.broadcast %c16_i32 : i32 to vector<288x1xi32>
    %71 = arith.cmpi slt, %69, %70 : vector<288x1xi32>
    %cst_36 = arith.constant 0.000000e+00 : f32
    %72 = vector.shape_cast %71 : vector<288x1xi1> to vector<288x1xi1>
    %73 = vector.broadcast %72 : vector<288x1xi1> to vector<288x128xi1>
    %74 = vector.broadcast %cst_36 : f32 to vector<288x128xf32>
    %75 = arith.select %73, %52, %74 : vector<288x128xi1>, vector<288x128xf32>
    %76 = vector.shape_cast %75 : vector<288x128xf32> to vector<36x8x128xf32>
    %cst_37 = arith.constant dense<0.000000e+00> : vector<8x128xf32>
    %77 = vector.multi_reduction <add>, %76, %cst_37 [0] : vector<36x8x128xf32> to vector<8x128xf32>
    %cst_38 = arith.constant dense<0.000000e+00> : vector<128xf32>
    %78 = vector.multi_reduction <add>, %77, %cst_38 [0] : vector<8x128xf32> to vector<128xf32>
    %79 = vector.shape_cast %78 : vector<128xf32> to vector<1x128xf32>
    %cst_39 = arith.constant 3.906250e-03 : f32
    %80 = vector.broadcast %cst_39 : f32 to vector<1x128xf32>
    %81 = arith.mulf %79, %80 : vector<1x128xf32>
    %c0_40 = arith.constant 0 : index
    %c0_41 = arith.constant 0 : index
    %82 = vector.load %arg4[%c0_40, %c0_41] : memref<128x128xf32, #tpu.memory_space<vmem>>, vector<128x128xf32>
    %cst_42 = arith.constant dense<0.000000e+00> : vector<1x128xf32>
    %83 = tpu.matmul %81, %82, %cst_42 {dimension_numbers = #tpu.dot_dimension_numbers<[1], [0], [0], [1], [0, 0, 1, 1], [], []>} : vector<1x128xf32>, vector<128x128xf32>, vector<1x128xf32> -> vector<1x128xf32>
    %c0_43 = arith.constant 0 : index
    %c0_44 = arith.constant 0 : index
    %84 = vector.load %arg5[%c0_43, %c0_44] : memref<1x128xf32, #tpu.memory_space<vmem>>, vector<1x128xf32>
    %85 = arith.addf %83, %84 : vector<1x128xf32>
    %c0_45 = arith.constant 0 : index
    %c0_46 = arith.constant 0 : index
    %c0_47 = arith.constant 0 : index
    %86 = vector.load %arg6[%c0_45, %c0_46, %c0_47] : memref<1x1x128xf32, #tpu.memory_space<vmem>>, vector<1x1x128xf32>
    %87 = vector.shape_cast %86 : vector<1x1x128xf32> to vector<1x128xf32>
    %88 = vector.shape_cast %85 : vector<1x128xf32> to vector<1x1x128xf32>
    tpu.vector_store %arg6[%c0_45, %c0_46, %c0_47], %88 {strides = array<i32>} : memref<1x1x128xf32, #tpu.memory_space<vmem>>, vector<1x1x128xf32>,
    return
  }
  func.func @transform_0(%arg0: i32) -> (i32, i32, i32) {
    %c0_i32 = arith.constant 0 : i32
    %c0_i32_0 = arith.constant 0 : i32
    %c0_i32_1 = arith.constant 0 : i32
    return %arg0, %c0_i32, %c0_i32_0 : i32, i32, i32
  }
  func.func @transform_1(%arg0: i32) -> (i32, i32, i32) {
    %c0_i32 = arith.constant 0 : i32
    %c0_i32_0 = arith.constant 0 : i32
    %c0_i32_1 = arith.constant 0 : i32
    %c0_i32_2 = arith.constant 0 : i32
    return %c0_i32, %c0_i32_0, %c0_i32_1 : i32, i32, i32
  }
  func.func @transform_2(%arg0: i32) -> (i32, i32) {
    %c0_i32 = arith.constant 0 : i32
    %c0_i32_0 = arith.constant 0 : i32
    %c0_i32_1 = arith.constant 0 : i32
    return %c0_i32, %c0_i32_0 : i32, i32
  }
  func.func @transform_3(%arg0: i32) -> (i32, i32) {
    %c0_i32 = arith.constant 0 : i32
    %c0_i32_0 = arith.constant 0 : i32
    %c0_i32_1 = arith.constant 0 : i32
    return %c0_i32, %c0_i32_0 : i32, i32
  }
  func.func @transform_4(%arg0: i32) -> (i32, i32) {
    %c0_i32 = arith.constant 0 : i32
    %c0_i32_0 = arith.constant 0 : i32
    %c0_i32_1 = arith.constant 0 : i32
    return %c0_i32, %c0_i32_0 : i32, i32
  }
  func.func @transform_5(%arg0: i32) -> (i32, i32, i32) {
    %c0_i32 = arith.constant 0 : i32
    %c0_i32_0 = arith.constant 0 : i32
    %c0_i32_1 = arith.constant 0 : i32
    return %arg0, %c0_i32, %c0_i32_0 : i32, i32, i32
  }
}

</mosaic_0001>

<bundles_post_ra>
// kernel: tpu_custom_call.1
= control target key start
LH: loop header
LB: loop body
LE: loop exit
PB: predicated region body
PF: predicated region fallthrough
CT: control target
= control target key end

     0   :  { %10 = vsyncpa [#allocation3], 0  ;;  %s9449_s0 = inlined_call_operand.vmem [shape: bf16[2,336,4], index: 0, kind: input, shape index: {}]   ;;  %s9450_s1 = inlined_call_operand.vmem [shape: bf16[9,4,128], index: 1, kind: input, shape index: {}]   ;;  %s9451_s2 = inlined_call_operand.vmem [shape: f32[1,128], index: 2, kind: input, shape index: {}]   ;;  %s9452_s3 = inlined_call_operand.vmem [shape: f32[128,128], index: 3, kind: input, shape index: {}]   ;;  %s9453_s4 = inlined_call_operand.vmem [shape: f32[1,128], index: 4, kind: input, shape index: {}]   ;;  %s9454_s5 = inlined_call_operand.hbm [shape: f32[2,1,128], index: 5, kind: output, shape index: {}]  }
   0x1   :  { %12 = vsyncpa [#allocation3 + $0x1], 0  ;;  %s6310_s18 = smov 0   ;;  %s6312_s19 = smov 0  }
   0x2   :  { %s6314_s20 = smov 0   ;;  %s6316_s21 = smov 0  }
   0x3 LB: > { %s6331_s22 = sadd.s32 4294967295, %s6274_s21   ;;  %s4773_s23 = sadd.s32 4294967294, %s6274_s21   ;;  %s6274_s21 = sphi %s6316_s21, %s9824_s21   ;;  %s6270_s20 = sphi %s6314_s20, %s9823_s20   ;;  %s6266_s19 = sphi %s6312_s19, %s9822_s19   ;;  %s6262_s18 = sphi %s6310_s18, %s9821_s18  }
   0x4   : > { %s6335_s24 = sadd.s32 1, %s6274_s21   ;;  %s135_s25 = sadd.s32 1, %s6270_s20 }
   0x5   : > { %s132_s26 = ssub.s32 %s6274_s21, %s6335_s24  ;;  %p145_p0 = scmp.ne.s32.totalorder %s6270_s20, %s6266_s19 }
   0x6   : > { %p133_p1 = scmp.eq.s32.totalorder %s132_s26, 0  ;;  %p146_p2 = scmp.eq.s32.totalorder %s6331_s22, 1 }
   0x7   : > { %p151_p3 = scmp.ne.s32.totalorder %s6266_s19, %s6262_s18  ;;  %p152_p4 = scmp.eq.s32.totalorder %s4773_s23, 1 }
   0x8   : > { %s6346_s27 = scalar_select %p133_p1, %s6270_s20, %s135_s25  }
   0x9   : > { %p6348_p5 = por %p146_p2, %p145_p0  ;;  %p6352_p6 = por %p152_p4, %p151_p3 }
   0xa   : > { %p4776_p7 = scmp.ge.s32.totalorder %s6274_s21, 1  ;;  %p190_p8 = scmp.lt.s32.totalorder %s6274_s21, 3 }
   0xc   : > { %p191_p9 = pnand %p4776_p7, %p190_p8 }
   0xe   : > { %194 = sbr.rel (%p191_p9) target bundleno = 1258 (0x4ea), region = 40 }
  0x15   : > { %v265_v0 = vld [vmem:[%s9450_s1] sm:$0x3]  ;;  %vm9467_vm0 = vcmask 1041408   ;;  %p217_p10 = scmp.lt.s32.totalorder %s6331_s22, 1  ;;  %v9455_v1 = vmov 0.0   ;;  %vm6277_vm1 = vmmov 0  }
  0x16   : > { %5215 = vmatprep.subr.bf16.mxu0 %v9455_v1  ;;  %6048 = vmatprep.subr.bf16.mxu1 %v9455_v1  ;;  %v437_v2 = vsel %vm9467_vm0, %v265_v0, 0  ;;  %v4842_v3 = vld [vmem:[%s9450_s1 + $0x4] sm:$0x3]  ;;  %v4820_v4 = vld [vmem:[%s9450_s1 + $0x2] sm:$0x3]  ;;  %vm371_vm2 = vcmask 31744  }
  0x17   : > { %5216 = vmatpush3.bf16.msra.mxu0 %v437_v2  ;;  %6049 = vmatpush3.bf16.msra.mxu1 %v437_v2  ;;  %s218_s7 = scalar_select %p217_p10, %s6331_s22, 1  ;;  %v1057_v6 = vsel %vm9467_vm0, %v4842_v3, 0  ;;  %v673_v8 = vsel %vm9467_vm0, %v4820_v4, 0  ;;  %v4864_v28 = vld [vmem:[%s9450_s1 + $0x6] sm:$0x3]  ;;  %vm908_vm3 = vcmask 1046528  }
  0x18   : > { %5217 = vmatprep.mubr.msk.bf16.mxu0 %vm6277_vm1, %v9455_v1  ;;  %5261 = vmatprep.mubr.msk.bf16.mxu1 %vm6277_vm1, %v9455_v1  ;;  %v1441_v29 = vsel %vm9467_vm0, %v4864_v28, 0  ;;  %v4886_v30 = vld [vmem:[%s9450_s1 + $0x8] sm:$0x3]  ;;  %v4908_v4 = vld [vmem:[%s9450_s1 + $0xa] sm:$0x3]  ;;  %vm1292_vm4 = vcmask 1045504  }
  0x19   : > { %5387 = vmatprep.subr.bf16.mxu0 %v9455_v1  ;;  %s6050_s8 = smul.u32 168, %s218_s7  ;;  %5301 = vmatprep.subr.bf16.mxu1 %v9455_v1  ;;  %v1824_v31 = vsel %vm9467_vm0, %v4886_v30, 0  ;;  %vm2059_vm5 = vcmask 1044480   ;;  %vm2443_vm6 = vcmask 1043456   ;;  %s215_s17 = sand.u32 1, %s6266_s19  }
  0x1a   : > { %s4997_s26 = sshll.u32 %s6331_s22, 4  ;;  %s216_s30 = scalar_lea.vmem [#allocation2], %s215_s17 }
  0x1b   : > { %s6381_s15 = scalar_lea.vmem %s9449_s0, %s6050_s8  ;;  %s4718_s6 = sshll.u32 %s216_s30, 4  ;;  %s9409_s6 = int_to_ptr.vmem [resolvable:$true] %s4718_s6 }
  0x1c   : > { %v6384_v5 = vld [vmem:[%s6381_s15] sm:$0xff]   ;;  %v6388_v7 = vld [vmem:[%s6381_s15 + $0x58] sm:$0xff]   ;;  %v6401_v9 = vld [vmem:[%s6381_s15 + $0x8] sm:$0xff]   ;;  %s4706_s9 = scalar_lea.sflag [#allocation3], %s215_s17  ;;  %s6212_s10 = scalar_lea.vmem %s9409_s6, 16 }
  0x1d   : > { %5218 = vmatmul.mubr.msk.bf16.vlgmr.msra.gmra.mrb[0].mxu0 %vm371_vm2, %v6384_v5  ;;  %5262 = vmatmul.mubr.msk.bf16.vlgmr.msra.gmra.mrb[0].mxu1 %vm371_vm2, %v6388_v7  ;;  %v6405_v10 = vld [vmem:[%s6381_s15 + $0x60] sm:$0xff]   ;;  %v6416_v11 = vld [vmem:[%s6381_s15 + $0x10] sm:$0xff]   ;;  %v6419_v12 = vld [vmem:[%s6381_s15 + $0x68] sm:$0xff]   ;;  %p6213_p11 = scmp.ne.s32.totalorder %s9409_s6, %s6212_s10  ;;  %s6279_s22 = smov [#allocation2]  }
  0x1e   : > { %5388 = vmatpush3.bf16.msra.mxu0 %v1057_v6  ;;  %5302 = vmatpush3.bf16.msra.mxu1 %v673_v8  ;;  %v6430_v13 = vld [vmem:[%s6381_s15 + $0x18] sm:$0xff]   ;;  %v6433_v14 = vld [vmem:[%s6381_s15 + $0x70] sm:$0xff]   ;;  %v6444_v15 = vld [vmem:[%s6381_s15 + $0x20] sm:$0xff]   ;;  %s6216_s11 = sshll.u32 %s6279_s22, 4  ;;  %s6217_s11 = int_to_ptr.vmem [resolvable:$false] %s6216_s11 }
  0x1f   : > { %5221 = vmatprep.mubr.msk.bf16.mxu0 %vm6277_vm1, %v9455_v1  ;;  %5265 = vmatprep.mubr.msk.bf16.mxu1 %vm6277_vm1, %v9455_v1  ;;  %v6447_v16 = vld [vmem:[%s6381_s15 + $0x78] sm:$0xff]   ;;  %v6458_v17 = vld [vmem:[%s6381_s15 + $0x28] sm:$0xff]   ;;  %v6461_v18 = vld [vmem:[%s6381_s15 + $0x80] sm:$0xff]   ;;  %p6214_p12 = pnand %p6213_p11, %p6348_p5  ;;  %s6218_s12 = scalar_lea.vmem %s6217_s11, 32 }
  0x20   : > { %5473 = vmatprep.subr.bf16.mxu1 %v9455_v1  ;;  %5559 = vmatprep.subr.bf16.mxu0 %v9455_v1  ;;  %v6472_v19 = vld [vmem:[%s6381_s15 + $0x30] sm:$0xff]   ;;  %v6475_v20 = vld [vmem:[%s6381_s15 + $0x88] sm:$0xff]   ;;  %v6486_v21 = vld [vmem:[%s6381_s15 + $0x38] sm:$0xff]   ;;  %p6219_p0 = scmp.lt.s32.totalorder %s9409_s6, %s6217_s11  ;;  %p6220_p1 = scmp.lt.s32.totalorder %s6218_s12, %s6212_s10 }
  0x21   : > { %v6489_v22 = vld [vmem:[%s6381_s15 + $0x90] sm:$0xff]   ;;  %v6500_v23 = vld [vmem:[%s6381_s15 + $0x40] sm:$0xff]   ;;  %v6503_v24 = vld [vmem:[%s6381_s15 + $0x98] sm:$0xff]   ;;  %p6215_p13 = pneg %p6214_p12 }
  0x22   : > { %v6514_v25 = vld [vmem:[%s6381_s15 + $0x48] sm:$0xff]   ;;  %v6517_v26 = vld [vmem:[%s6381_s15 + $0xa0] sm:$0xff]   ;;  %v6528_v27 = vld [vmem:[%s6381_s15 + $0x50] sm:$0xff]   ;;  %p6221_p2 = por %p6220_p1, %p6219_p0 }
  0x24   : > { %p6222_p3 = pnand %p6221_p2, %p6215_p13 }
  0x25   : > { %5222 = vmatmul.mubr.msk.bf16.gmra.mrb[4].mxu0 %vm371_vm2, %v6401_v9  ;;  %5266 = vmatmul.mubr.msk.bf16.gmra.mrb[4].mxu1 %vm371_vm2, %v6405_v10 }
  0x26   : > { %5225 = vmatprep.mubr.msk.bf16.mxu0 %vm6277_vm1, %v9455_v1  ;;  %5269 = vmatprep.mubr.msk.bf16.mxu1 %vm6277_vm1, %v9455_v1 }
  0x2d   : > { %5226 = vmatmul.mubr.msk.bf16.gmra.mrb[8].mxu0 %vm371_vm2, %v6416_v11  ;;  %5270 = vmatmul.mubr.msk.bf16.gmra.mrb[8].mxu1 %vm371_vm2, %v6419_v12 }
  0x2e   : > { %5229 = vmatprep.mubr.msk.bf16.mxu0 %vm6277_vm1, %v9455_v1  ;;  %5273 = vmatprep.mubr.msk.bf16.mxu1 %vm6277_vm1, %v9455_v1 }
  0x35   : > { %5230 = vmatmul.mubr.msk.bf16.gmra.mrb[12].mxu0 %vm371_vm2, %v6430_v13  ;;  %5274 = vmatmul.mubr.msk.bf16.gmra.mrb[12].mxu1 %vm371_vm2, %v6433_v14 }
  0x36   : > { %5233 = vmatprep.mubr.msk.bf16.mxu0 %vm6277_vm1, %v9455_v1  ;;  %5277 = vmatprep.mubr.msk.bf16.mxu1 %vm6277_vm1, %v9455_v1 }
  0x3d   : > { %5234 = vmatmul.mubr.msk.bf16.gmra.mrb[16].mxu0 %vm371_vm2, %v6444_v15  ;;  %5278 = vmatmul.mubr.msk.bf16.gmra.mrb[16].mxu1 %vm371_vm2, %v6447_v16 }
  0x3e   : > { %5237 = vmatprep.mubr.msk.bf16.mxu0 %vm6277_vm1, %v9455_v1  ;;  %5281 = vmatprep.mubr.msk.bf16.mxu1 %vm6277_vm1, %v9455_v1 }
  0x45   : > { %5238 = vmatmul.mubr.msk.bf16.gmra.mrb[20].mxu0 %vm371_vm2, %v6458_v17  ;;  %5282 = vmatmul.mubr.msk.bf16.gmra.mrb[20].mxu1 %vm371_vm2, %v6461_v18 }
  0x46   : > { %5241 = vmatprep.mubr.msk.bf16.mxu0 %vm6277_vm1, %v9455_v1  ;;  %5285 = vmatprep.mubr.msk.bf16.mxu1 %vm6277_vm1, %v9455_v1 }
  0x4d   : > { %5242 = vmatmul.mubr.msk.bf16.gmra.mrb[24].mxu0 %vm371_vm2, %v6472_v19  ;;  %5286 = vmatmul.mubr.msk.bf16.gmra.mrb[24].mxu1 %vm371_vm2, %v6475_v20 }
  0x4e   : > { %5245 = vmatprep.mubr.msk.bf16.mxu0 %vm6277_vm1, %v9455_v1  ;;  %5289 = vmatprep.mubr.msk.bf16.mxu1 %vm6277_vm1, %v9455_v1 }
  0x55   : > { %5246 = vmatmul.mubr.msk.bf16.gmra.mrb[28].mxu0 %vm371_vm2, %v6486_v21  ;;  %5290 = vmatmul.mubr.msk.bf16.gmra.mrb[28].mxu1 %vm371_vm2, %v6489_v22 }
  0x56   : > { %5249 = vmatprep.mubr.msk.bf16.mxu0 %vm6277_vm1, %v9455_v1  ;;  %5293 = vmatprep.mubr.msk.bf16.mxu1 %vm6277_vm1, %v9455_v1 }
  0x5d   : > { %5250 = vmatmul.mubr.msk.bf16.gmra.mrb[32].mxu0 %vm371_vm2, %v6500_v23  ;;  %5294 = vmatmul.mubr.msk.bf16.gmra.mrb[32].mxu1 %vm371_vm2, %v6503_v24 }
  0x5e   : > { %5253 = vmatprep.mubr.msk.bf16.mxu0 %vm6277_vm1, %v9455_v1  ;;  %5297 = vmatprep.mubr.msk.bf16.mxu1 %vm6277_vm1, %v9455_v1 }
  0x65   : > { %5254 = vmatmul.mubr.msk.bf16.gmra.mrb[36].mxu0 %vm371_vm2, %v6514_v25  ;;  %5298 = vmatmul.mubr.msk.bf16.gmra.mrb[36].mxu1 %vm371_vm2, %v6517_v26 }
  0x66   : > { %5257 = vmatprep.mubr.msk.bf16.mxu0 %vm6277_vm1, %v9455_v1  ;;  %5303 = vmatprep.mubr.msk.bf16.mxu1 %vm6277_vm1, %v9455_v1 }
  0x6d   : > { %5258 = vmatmul.mubr.msk.bf16.gmra.mrb[40].mxu0 %vm371_vm2, %v6528_v27  ;;  %5304 = vmatmul.mubr.msk.bf16.vlgmr.msra.gmra.mrb[40].mxu1 %vm371_vm2, %v6384_v5 }
  0x6e   : > { %5389 = vmatprep.mubr.msk.bf16.mxu0 %vm6277_vm1, %v9455_v1  ;;  %5474 = vmatpush3.bf16.msra.mxu1 %v1441_v29  ;;  %v2208_v29 = vsel %vm9467_vm0, %v4908_v4, 0 }
  0x6f   : > { %5307 = vmatprep.mubr.msk.bf16.mxu1 %vm6277_vm1, %v9455_v1  ;;  %5645 = vmatprep.subr.bf16.mxu1 %v9455_v1 }
  0x75   : > { %5390 = vmatmul.mubr.msk.bf16.vlgmr.msra.gmra.mrb[44].mxu0 %vm371_vm2, %v6384_v5  ;;  %5308 = vmatmul.mubr.msk.bf16.gmra.mrb[44].mxu1 %vm371_vm2, %v6401_v9 }
  0x76   : > { %5560 = vmatpush3.bf16.msra.mxu0 %v1824_v31  ;;  %5311 = vmatprep.mubr.msk.bf16.mxu1 %vm6277_vm1, %v9455_v1  ;;  %v4930_v31 = vld [vmem:[%s9450_s1 + $0xc] sm:$0x3] }
  0x77   : > { %5393 = vmatprep.mubr.msk.bf16.mxu0 %vm6277_vm1, %v9455_v1  ;;  %5731 = vmatprep.subr.bf16.mxu0 %v9455_v1 }
  0x7d   : > { %5394 = vmatmul.mubr.msk.bf16.gmra.mrb[48].mxu0 %vm371_vm2, %v6401_v9  ;;  %5312 = vmatmul.mubr.msk.bf16.gmra.mrb[48].mxu1 %vm371_vm2, %v6416_v11 }
  0x7e   : > { %5397 = vmatprep.mubr.msk.bf16.mxu0 %vm6277_vm1, %v9455_v1  ;;  %5315 = vmatprep.mubr.msk.bf16.mxu1 %vm6277_vm1, %v9455_v1 }
  0x85   : > { %5398 = vmatmul.mubr.msk.bf16.gmra.mrb[52].mxu0 %vm371_vm2, %v6416_v11  ;;  %5316 = vmatmul.mubr.msk.bf16.gmra.mrb[52].mxu1 %vm371_vm2, %v6430_v13 }
  0x86   : > { %5401 = vmatprep.mubr.msk.bf16.mxu0 %vm6277_vm1, %v9455_v1  ;;  %5319 = vmatprep.mubr.msk.bf16.mxu1 %vm6277_vm1, %v9455_v1 }
  0x8d   : > { %5402 = vmatmul.mubr.msk.bf16.gmra.mrb[56].mxu0 %vm371_vm2, %v6430_v13  ;;  %5320 = vmatmul.mubr.msk.bf16.gmra.mrb[56].mxu1 %vm371_vm2, %v6444_v15 }
  0x8e   : > { %5405 = vmatprep.mubr.msk.bf16.mxu0 %vm6277_vm1, %v9455_v1  ;;  %5323 = vmatprep.mubr.msk.bf16.mxu1 %vm6277_vm1, %v9455_v1 }
  0x95   : > { %5406 = vmatmul.mubr.msk.bf16.gmra.mrb[60].mxu0 %vm371_vm2, %v6444_v15  ;;  %5324 = vmatmul.mubr.msk.bf16.gmra.mrb[60].mxu1 %vm371_vm2, %v6458_v17 }
  0x96   : > { %5409 = vmatprep.mubr.msk.bf16.mxu0 %vm6277_vm1, %v9455_v1  ;;  %5327 = vmatprep.mubr.msk.bf16.mxu1 %vm6277_vm1, %v9455_v1 }
  0x9d   : > { %5410 = vmatmul.mubr.msk.bf16.gmra.mrb[64].mxu0 %vm371_vm2, %v6458_v17  ;;  %5328 = vmatmul.mubr.msk.bf16.gmra.mrb[64].mxu1 %vm371_vm2, %v6472_v19 }
  0x9e   : > { %5413 = vmatprep.mubr.msk.bf16.mxu0 %vm6277_vm1, %v9455_v1  ;;  %5331 = vmatprep.mubr.msk.bf16.mxu1 %vm6277_vm1, %v9455_v1 }
  0xa5   : > { %5414 = vmatmul.mubr.msk.bf16.gmra.mrb[68].mxu0 %vm371_vm2, %v6472_v19  ;;  %5332 = vmatmul.mubr.msk.bf16.gmra.mrb[68].mxu1 %vm371_vm2, %v6486_v21 }
  0xa6   : > { %5417 = vmatprep.mubr.msk.bf16.mxu0 %vm6277_vm1, %v9455_v1  ;;  %5335 = vmatprep.mubr.msk.bf16.mxu1 %vm6277_vm1, %v9455_v1 }
  0xad   : > { %5418 = vmatmul.mubr.msk.bf16.gmra.mrb[72].mxu0 %vm371_vm2, %v6486_v21  ;;  %5336 = vmatmul.mubr.msk.bf16.gmra.mrb[72].mxu1 %vm371_vm2, %v6500_v23 }
  0xae   : > { %5421 = vmatprep.mubr.msk.bf16.mxu0 %vm6277_vm1, %v9455_v1  ;;  %5339 = vmatprep.mubr.msk.bf16.mxu1 %vm6277_vm1, %v9455_v1 }
  0xb5   : > { %5422 = vmatmul.mubr.msk.bf16.gmra.mrb[76].mxu0 %vm371_vm2, %v6500_v23  ;;  %5340 = vmatmul.mubr.msk.bf16.gmra.mrb[76].mxu1 %vm371_vm2, %v6514_v25 }
  0xb6   : > { %5425 = vmatprep.mubr.msk.bf16.mxu0 %vm6277_vm1, %v9455_v1  ;;  %5343 = vmatprep.mubr.msk.bf16.mxu1 %vm6277_vm1, %v9455_v1 }
  0xbd   : > { %5426 = vmatmul.mubr.msk.bf16.gmra.mrb[80].mxu0 %vm371_vm2, %v6514_v25  ;;  %5344 = vmatmul.mubr.msk.bf16.gmra.mrb[80].mxu1 %vm371_vm2, %v6528_v27 }
  0xbe   : > { %5429 = vmatprep.mubr.msk.bf16.mxu0 %vm6277_vm1, %v9455_v1  ;;  %5347 = vmatprep.mubr.msk.bf16.mxu1 %vm6277_vm1, %v9455_v1 }
  0xc5   : > { %5430 = vmatmul.mubr.msk.bf16.gmra.mrb[84].mxu0 %vm371_vm2, %v6528_v27  ;;  %5348 = vmatmul.mubr.msk.bf16.gmra.mrb[84].mxu1 %vm371_vm2, %v6388_v7 }
  0xc6   : > { %5433 = vmatprep.mubr.msk.bf16.mxu0 %vm6277_vm1, %v9455_v1  ;;  %5351 = vmatprep.mubr.msk.bf16.mxu1 %vm6277_vm1, %v9455_v1 }
  0xcd   : > { %5434 = vmatmul.mubr.msk.bf16.gmra.mrb[88].mxu0 %vm371_vm2, %v6388_v7  ;;  %5352 = vmatmul.mubr.msk.bf16.gmra.mrb[88].mxu1 %vm371_vm2, %v6405_v10 }
  0xce   : > { %5437 = vmatprep.mubr.msk.bf16.mxu0 %vm6277_vm1, %v9455_v1  ;;  %5355 = vmatprep.mubr.msk.bf16.mxu1 %vm6277_vm1, %v9455_v1 }
  0xd5   : > { %5438 = vmatmul.mubr.msk.bf16.gmra.mrb[92].mxu0 %vm371_vm2, %v6405_v10  ;;  %5356 = vmatmul.mubr.msk.bf16.gmra.mrb[92].mxu1 %vm371_vm2, %v6419_v12 }
  0xd6   : > { %5441 = vmatprep.mubr.msk.bf16.mxu0 %vm6277_vm1, %v9455_v1  ;;  %5359 = vmatprep.mubr.msk.bf16.mxu1 %vm6277_vm1, %v9455_v1 }
  0xdd   : > { %5442 = vmatmul.mubr.msk.bf16.gmra.mrb[96].mxu0 %vm371_vm2, %v6419_v12  ;;  %5360 = vmatmul.mubr.msk.bf16.gmra.mrb[96].mxu1 %vm371_vm2, %v6433_v14 }
  0xde   : > { %5445 = vmatprep.mubr.msk.bf16.mxu0 %vm6277_vm1, %v9455_v1  ;;  %5363 = vmatprep.mubr.msk.bf16.mxu1 %vm6277_vm1, %v9455_v1 }
  0xe5   : > { %5446 = vmatmul.mubr.msk.bf16.gmra.mrb[100].mxu0 %vm371_vm2, %v6433_v14  ;;  %5364 = vmatmul.mubr.msk.bf16.gmra.mrb[100].mxu1 %vm371_vm2, %v6447_v16 }
  0xe6   : > { %5449 = vmatprep.mubr.msk.bf16.mxu0 %vm6277_vm1, %v9455_v1  ;;  %5367 = vmatprep.mubr.msk.bf16.mxu1 %vm6277_vm1, %v9455_v1 }
  0xed   : > { %5450 = vmatmul.mubr.msk.bf16.gmra.mrb[104].mxu0 %vm371_vm2, %v6447_v16  ;;  %5368 = vmatmul.mubr.msk.bf16.gmra.mrb[104].mxu1 %vm371_vm2, %v6461_v18 }
  0xee   : > { %5453 = vmatprep.mubr.msk.bf16.mxu0 %vm6277_vm1, %v9455_v1  ;;  %5371 = vmatprep.mubr.msk.bf16.mxu1 %vm6277_vm1, %v9455_v1 }
  0xf0   : > { %v6676_v32 = vpop.f32.mrb[0].mxu0  ;;  %v6678_v34 = vpop.f32.mrb[0].mxu1 }
  0xf1   : > { %v5219_v33 = vpop.f32.mrb[1].mxu0  ;;  %v5263_v36 = vpop.f32.mrb[1].mxu1 }
  0xf2   : > { %v6680_v35 = vpop.f32.mrb[2].mxu0  ;;  %v6682_v38 = vpop.f32.mrb[2].mxu1 }
  0xf3   : > { %v5220_v37 = vpop.f32.mrb[3].mxu0  ;;  %v5264_v39 = vpop.f32.mrb[3].mxu1 }
  0xf5   : > { %5454 = vmatmul.mubr.msk.bf16.gmra.mrb[108].mxu0 %vm371_vm2, %v6461_v18  ;;  %5372 = vmatmul.mubr.msk.bf16.gmra.mrb[108].mxu1 %vm371_vm2, %v6475_v20 }
  0xf6   : > { %5457 = vmatprep.mubr.msk.bf16.mxu0 %vm6277_vm1, %v9455_v1  ;;  %5375 = vmatprep.mubr.msk.bf16.mxu1 %vm6277_vm1, %v9455_v1 }
  0xf8   : > { %v6692_v40 = vpop.f32.mrb[4].mxu0  ;;  %v6694_v42 = vpop.f32.mrb[4].mxu1 }
  0xf9   : > { %v5223_v41 = vpop.f32.mrb[5].mxu0  ;;  %v5267_v44 = vpop.f32.mrb[5].mxu1 }
  0xfa   : > { %v6696_v43 = vpop.f32.mrb[6].mxu0  ;;  %v6698_v46 = vpop.f32.mrb[6].mxu1  ;;  %v2592_v44 = vsel %vm9467_vm0, %v4930_v31, 0 }
  0xfb   : > { %v5224_v45 = vpop.f32.mrb[7].mxu0  ;;  %v5268_v47 = vpop.f32.mrb[7].mxu1 }
  0xfd   : > { %5458 = vmatmul.mubr.msk.bf16.gmra.mrb[112].mxu0 %vm371_vm2, %v6475_v20  ;;  %5376 = vmatmul.mubr.msk.bf16.gmra.mrb[112].mxu1 %vm371_vm2, %v6489_v22 }
  0xfe   : > { %5461 = vmatprep.mubr.msk.bf16.mxu0 %vm6277_vm1, %v9455_v1  ;;  %5379 = vmatprep.mubr.msk.bf16.mxu1 %vm6277_vm1, %v9455_v1 }
 0x100   : > { %v6708_v48 = vpop.f32.mrb[8].mxu0  ;;  %v6710_v50 = vpop.f32.mrb[8].mxu1 }
 0x101   : > { %v5227_v49 = vpop.f32.mrb[9].mxu0  ;;  %v5271_v52 = vpop.f32.mrb[9].mxu1 }
 0x102   : > { %v6712_v51 = vpop.f32.mrb[10].mxu0  ;;  %v6714_v54 = vpop.f32.mrb[10].mxu1 }
 0x103   : > { %v5228_v53 = vpop.f32.mrb[11].mxu0  ;;  %v5272_v55 = vpop.f32.mrb[11].mxu1 }
 0x105   : > { %5462 = vmatmul.mubr.msk.bf16.gmra.mrb[116].mxu0 %vm371_vm2, %v6489_v22  ;;  %5380 = vmatmul.mubr.msk.bf16.gmra.mrb[116].mxu1 %vm371_vm2, %v6503_v24 }
 0x106   : > { %5465 = vmatprep.mubr.msk.bf16.mxu0 %vm6277_vm1, %v9455_v1  ;;  %5383 = vmatprep.mubr.msk.bf16.mxu1 %vm6277_vm1, %v9455_v1 }
 0x108   : > { %v6724_v56 = vpop.f32.mrb[12].mxu0  ;;  %v6726_v58 = vpop.f32.mrb[12].mxu1 }
 0x109   : > { %v5231_v57 = vpop.f32.mrb[13].mxu0  ;;  %v5275_v60 = vpop.f32.mrb[13].mxu1 }
 0x10a   : > { %v6728_v59 = vpop.f32.mrb[14].mxu0  ;;  %v6730_v62 = vpop.f32.mrb[14].mxu1 }
 0x10b   : > { %v5232_v61 = vpop.f32.mrb[15].mxu0  ;;  %v5276_v63 = vpop.f32.mrb[15].mxu1 }
 0x10d   : > { %5466 = vmatmul.mubr.msk.bf16.gmra.mrb[120].mxu0 %vm371_vm2, %v6503_v24  ;;  %5384 = vmatmul.mubr.msk.bf16.gmra.mrb[120].mxu1 %vm371_vm2, %v6517_v26 }
 0x10e   : > { %5469 = vmatprep.mubr.msk.bf16.mxu0 %vm6277_vm1, %v9455_v1  ;;  %5475 = vmatprep.mubr.msk.bf16.mxu1 %vm6277_vm1, %v9455_v1 }
 0x110   : > { %v6740_v0 = vpop.f32.mrb[16].mxu0  ;;  %v6742_v3 = vpop.f32.mrb[16].mxu1 }
 0x111   : > { %v5235_v2 = vpop.f32.mrb[17].mxu0  ;;  %v5279_v8 = vpop.f32.mrb[17].mxu1 }
 0x112   : > { %v6747_v6 = vpop.f32.mrb[18].mxu0  ;;  %v6749_v24 = vpop.f32.mrb[18].mxu1 }
 0x113   : > { %v5236_v22 = vpop.f32.mrb[19].mxu0  ;;  %v5280_v28 = vpop.f32.mrb[19].mxu1 }
 0x115   : > { %5470 = vmatmul.mubr.msk.bf16.gmra.mrb[124].mxu0 %vm371_vm2, %v6517_v26  ;;  %5476 = vmatmul.mubr.msk.bf16.vlgmr.msra.gmra.mrb[124].mxu1 %vm371_vm2, %v6384_v5 }
 0x116   : > { %5561 = vmatprep.mubr.msk.bf16.mxu0 %vm6277_vm1, %v9455_v1  ;;  %5646 = vmatpush3.bf16.msra.mxu1 %v2208_v29 }
 0x117   : > { %5479 = vmatprep.mubr.msk.bf16.mxu1 %vm6277_vm1, %v9455_v1  ;;  %5817 = vmatprep.subr.bf16.mxu1 %v9455_v1 }
 0x118   : > { %v6760_v30 = vpop.f32.mrb[20].mxu0  ;;  %v6766_v26 = vpop.f32.mrb[20].mxu1 }
 0x119   : > { %v5239_v33 = vpop.f32.mrb[21].mxu0  ;;  %v5283_v37 = vpop.f32.mrb[21].mxu1 }
 0x11a   : > { %v6768_v36 = vpop.f32.mrb[22].mxu0  ;;  %v6770_v41 = vpop.f32.mrb[22].mxu1 }
 0x11b   : > { %v5240_v39 = vpop.f32.mrb[23].mxu0  ;;  %v5284_v45 = vpop.f32.mrb[23].mxu1 }
 0x11d   : > { %5562 = vmatmul.mubr.msk.bf16.vlgmr.msra.gmra.mrb[128].mxu0 %vm371_vm2, %v6384_v5  ;;  %5480 = vmatmul.mubr.msk.bf16.gmra.mrb[128].mxu1 %vm371_vm2, %v6401_v9 }
 0x11e   : > { %5732 = vmatpush3.bf16.msra.mxu0 %v2592_v44  ;;  %5483 = vmatprep.mubr.msk.bf16.mxu1 %vm6277_vm1, %v9455_v1 }
 0x11f   : > { %5565 = vmatprep.mubr.msk.bf16.mxu0 %vm6277_vm1, %v9455_v1  ;;  %5903 = vmatprep.subr.bf16.mxu0 %v9455_v1 }
 0x120   : > { %v6781_v47 = vpop.f32.mrb[24].mxu0  ;;  %v6784_v52 = vpop.f32.mrb[24].mxu1 }
 0x121   : > { %v5243_v49 = vpop.f32.mrb[25].mxu0  ;;  %v5287_v5 = vpop.f32.mrb[25].mxu1 }
 0x122   : > { %v6786_v53 = vpop.f32.mrb[26].mxu0  ;;  %v6788_v57 = vpop.f32.mrb[26].mxu1 }
 0x123   : > { %v5244_v55 = vpop.f32.mrb[27].mxu0  ;;  %9482 = vst [vmem:[#allocation5_spill] sm:$0xff] %v6788_v57  ;;  %v5288_v60 = vpop.f32.mrb[27].mxu1 }
 0x125   : > { %5566 = vmatmul.mubr.msk.bf16.gmra.mrb[132].mxu0 %vm371_vm2, %v6401_v9  ;;  %5484 = vmatmul.mubr.msk.bf16.gmra.mrb[132].mxu1 %vm371_vm2, %v6416_v11 }
 0x126   : > { %5569 = vmatprep.mubr.msk.bf16.mxu0 %vm6277_vm1, %v9455_v1  ;;  %5487 = vmatprep.mubr.msk.bf16.mxu1 %vm6277_vm1, %v9455_v1 }
 0x128   : > { %v6798_v61 = vpop.f32.mrb[28].mxu0  ;;  %v617_v2 = vpop.f32.mrb[28].mxu1 }
 0x129   : > { %v5247_v63 = vpop.f32.mrb[29].mxu0  ;;  %v5291_v8 = vpop.f32.mrb[29].mxu1 }
 0x12a   : > { %v6800_v4 = vpop.f32.mrb[30].mxu0  ;;  %v619_v28 = vpop.f32.mrb[30].mxu1 }
 0x12b   : > { %v5248_v22 = vpop.f32.mrb[31].mxu0  ;;  %v5292_v29 = vpop.f32.mrb[31].mxu1 }
 0x12d   : > { %5570 = vmatmul.mubr.msk.bf16.gmra.mrb[136].mxu0 %vm371_vm2, %v6416_v11  ;;  %5488 = vmatmul.mubr.msk.bf16.gmra.mrb[136].mxu1 %vm371_vm2, %v6430_v13 }
 0x12e   : > { %5573 = vmatprep.mubr.msk.bf16.mxu0 %vm6277_vm1, %v9455_v1  ;;  %5491 = vmatprep.mubr.msk.bf16.mxu1 %vm6277_vm1, %v9455_v1 }
 0x130   : > { %v6810_v9 = vpop.f32.mrb[32].mxu0  ;;  %v623_v33 = vpop.f32.mrb[32].mxu1 }
 0x131   : > { %v5251_v31 = vpop.f32.mrb[33].mxu0  ;;  %v5295_v39 = vpop.f32.mrb[33].mxu1 }
 0x132   : > { %v6812_v37 = vpop.f32.mrb[34].mxu0  ;;  %v625_v45 = vpop.f32.mrb[34].mxu1 }
 0x133   : > { %v5252_v44 = vpop.f32.mrb[35].mxu0  ;;  %v5296_v49 = vpop.f32.mrb[35].mxu1 }
 0x135   : > { %5574 = vmatmul.mubr.msk.bf16.gmra.mrb[140].mxu0 %vm371_vm2, %v6430_v13  ;;  %5492 = vmatmul.mubr.msk.bf16.gmra.mrb[140].mxu1 %vm371_vm2, %v6444_v15 }
 0x136   : > { %5577 = vmatprep.mubr.msk.bf16.mxu0 %vm6277_vm1, %v9455_v1  ;;  %5495 = vmatprep.mubr.msk.bf16.mxu1 %vm6277_vm1, %v9455_v1 }
 0x138   : > { %v6822_v11 = vpop.f32.mrb[36].mxu0  ;;  %v629_v55 = vpop.f32.mrb[36].mxu1 }
 0x139   : > { %v5255_v5 = vpop.f32.mrb[37].mxu0  ;;  %v5299_v63 = vpop.f32.mrb[37].mxu1 }
 0x13a   : > { %v6824_v60 = vpop.f32.mrb[38].mxu0  ;;  %v631_v8 = vpop.f32.mrb[38].mxu1 }
 0x13b   : > { %v5256_v2 = vpop.f32.mrb[39].mxu0  ;;  %v5300_v22 = vpop.f32.mrb[39].mxu1 }
 0x13d   : > { %5578 = vmatmul.mubr.msk.bf16.gmra.mrb[144].mxu0 %vm371_vm2, %v6444_v15  ;;  %5496 = vmatmul.mubr.msk.bf16.gmra.mrb[144].mxu1 %vm371_vm2, %v6458_v17 }
 0x13e   : > { %5581 = vmatprep.mubr.msk.bf16.mxu0 %vm6277_vm1, %v9455_v1  ;;  %5499 = vmatprep.mubr.msk.bf16.mxu1 %vm6277_vm1, %v9455_v1 }
 0x140   : > { %v6834_v13 = vpop.f32.mrb[40].mxu0  ;;  %v709_v28 = vpop.f32.mrb[40].mxu1 }
 0x141   : > { %v5259_v29 = vpop.f32.mrb[41].mxu0  ;;  %v909_v31 = vrot.slane %v709_v28, 1  ;;  %v5305_v33 = vpop.f32.mrb[41].mxu1 }
 0x142   : > { %v6836_v39 = vpop.f32.mrb[42].mxu0  ;;  %v712_v44 = vpop.f32.mrb[42].mxu1 }
 0x143   : > { %v5260_v15 = vpop.f32.mrb[43].mxu0  ;;  %v910_v45 = vrot.slane %v712_v44, 1  ;;  %v5306_v49 = vpop.f32.mrb[43].mxu1 }
 0x145   : > { %5582 = vmatmul.mubr.msk.bf16.gmra.mrb[148].mxu0 %vm371_vm2, %v6458_v17  ;;  %v911_v5 = vsel %vm908_vm3, %v909_v31, %v910_v45  ;;  %5500 = vmatmul.mubr.msk.bf16.gmra.mrb[148].mxu1 %vm371_vm2, %v6472_v19 }
 0x146   : > { %5585 = vmatprep.mubr.msk.bf16.mxu0 %vm6277_vm1, %v9455_v1  ;;  %v1018_v55 = vadd.f32 %v911_v5, %v6676_v32  ;;  %5503 = vmatprep.mubr.msk.bf16.mxu1 %vm6277_vm1, %v9455_v1 }
 0x148   : > { %v1093_v63 = vpop.f32.mrb[44].mxu0  ;;  %v717_v2 = vpop.f32.mrb[44].mxu1 }
 0x149   : > { %v5391_v8 = vpop.f32.mrb[45].mxu0  ;;  %v912_v22 = vrot.slane %v717_v2, 1  ;;  %v5309_v28 = vpop.f32.mrb[45].mxu1  ;;  %v1293_v17 = vrot.slane %v1093_v63, 2 }
 0x14a   : > { %v1096_v29 = vpop.f32.mrb[46].mxu0  ;;  %v720_v31 = vpop.f32.mrb[46].mxu1 }
 0x14b   : > { %v1294_v33 = vrot.slane %v1096_v29, 2  ;;  %v5392_v44 = vpop.f32.mrb[47].mxu0  ;;  %v913_v15 = vsel %vm908_vm3, %v910_v45, %v912_v22  ;;  %v914_v49 = vrot.slane %v720_v31, 1  ;;  %v5310_v57 = vpop.f32.mrb[47].mxu1 }
 0x14c   : > { %v1019_v32 = vadd.f32 %v913_v15, %v6680_v35 }
 0x14d   : > { %v1295_v5 = vsel %vm1292_vm4, %v1293_v17, %v1294_v33  ;;  %5586 = vmatmul.mubr.msk.bf16.gmra.mrb[152].mxu0 %vm371_vm2, %v6472_v19  ;;  %v915_v2 = vsel %vm908_vm3, %v912_v22, %v914_v49  ;;  %5504 = vmatmul.mubr.msk.bf16.gmra.mrb[152].mxu1 %vm371_vm2, %v6486_v21 }
 0x14e   : > { %5589 = vmatprep.mubr.msk.bf16.mxu0 %vm6277_vm1, %v9455_v1  ;;  %v6858_v63 = vadd.f32 %v1295_v5, %v1018_v55  ;;  %v1020_v45 = vadd.f32 %v915_v2, %v6692_v40  ;;  %5507 = vmatprep.mubr.msk.bf16.mxu1 %vm6277_vm1, %v9455_v1 }
 0x150   : > { %9483 = vst [vmem:[#allocation6_spill] sm:$0xff] %v6858_v63  ;;  %v1101_v35 = vpop.f32.mrb[48].mxu0  ;;  %v725_v57 = vpop.f32.mrb[48].mxu1 }
 0x151   : > { %v1296_v8 = vrot.slane %v1101_v35, 2  ;;  %v5395_v28 = vpop.f32.mrb[49].mxu0  ;;  %v916_v19 = vrot.slane %v725_v57, 1  ;;  %v5313_v29 = vpop.f32.mrb[49].mxu1 }
 0x152   : > { %v1104_v22 = vpop.f32.mrb[50].mxu0  ;;  %v728_v31 = vpop.f32.mrb[50].mxu1 }
 0x153   : > { %v1297_v17 = vsel %vm1292_vm4, %v1294_v33, %v1296_v8  ;;  %v1298_v44 = vrot.slane %v1104_v22, 2  ;;  %v5396_v15 = vpop.f32.mrb[51].mxu0  ;;  %v917_v55 = vsel %vm908_vm3, %v914_v49, %v916_v19  ;;  %v918_v5 = vrot.slane %v728_v31, 1  ;;  %v5314_v63 = vpop.f32.mrb[51].mxu1 }
 0x154   : > { %v6865_v40 = vadd.f32 %v1297_v17, %v1019_v32  ;;  %v1021_v2 = vadd.f32 %v917_v55, %v6696_v43  ;;  %v9484_v33 = vmov 0.0  }
 0x155   : > { %v1299_v1 = vsel %vm1292_vm4, %v1296_v8, %v1298_v44  ;;  %5590 = vmatmul.mubr.msk.bf16.gmra.mrb[156].mxu0 %vm371_vm2, %v6486_v21  ;;  %v919_v35 = vsel %vm908_vm3, %v916_v19, %v918_v5  ;;  %5508 = vmatmul.mubr.msk.bf16.gmra.mrb[156].mxu1 %vm371_vm2, %v6500_v23 }
 0x156   : > { %5593 = vmatprep.mubr.msk.bf16.mxu0 %vm6277_vm1, %v9484_v33  ;;  %v6876_v49 = vadd.f32 %v1299_v1, %v1020_v45  ;;  %v1022_v32 = vadd.f32 %v919_v35, %v6708_v48  ;;  %5511 = vmatprep.mubr.msk.bf16.mxu1 %vm6277_vm1, %v9484_v33 }
 0x158   : > { %v1109_v43 = vpop.f32.mrb[52].mxu0  ;;  %v733_v63 = vpop.f32.mrb[52].mxu1 }
 0x159   : > { %v1300_v57 = vrot.slane %v1109_v43, 2  ;;  %v5399_v8 = vpop.f32.mrb[53].mxu0  ;;  %v920_v21 = vrot.slane %v733_v63, 1  ;;  %v5317_v28 = vpop.f32.mrb[53].mxu1 }
 0x15a   : > { %v1112_v19 = vpop.f32.mrb[54].mxu0  ;;  %v736_v22 = vpop.f32.mrb[54].mxu1 }
 0x15b   : > { %v1301_v29 = vsel %vm1292_vm4, %v1298_v44, %v1300_v57  ;;  %v1302_v17 = vrot.slane %v1112_v19, 2  ;;  %v5400_v31 = vpop.f32.mrb[55].mxu0  ;;  %v921_v1 = vsel %vm908_vm3, %v918_v5, %v920_v21  ;;  %v922_v45 = vrot.slane %v736_v22, 1  ;;  %v5318_v15 = vpop.f32.mrb[55].mxu1 }
 0x15c   : > { %v6883_v48 = vadd.f32 %v1301_v29, %v1021_v2  ;;  %v1023_v55 = vadd.f32 %v921_v1, %v6712_v51 }
 0x15d   : > { %v1303_v35 = vsel %vm1292_vm4, %v1300_v57, %v1302_v17  ;;  %5594 = vmatmul.mubr.msk.bf16.gmra.mrb[160].mxu0 %vm371_vm2, %v6500_v23  ;;  %v923_v43 = vsel %vm908_vm3, %v920_v21, %v922_v45  ;;  %5512 = vmatmul.mubr.msk.bf16.gmra.mrb[160].mxu1 %vm371_vm2, %v6514_v25 }
 0x15e   : > { %5597 = vmatprep.mubr.msk.bf16.mxu0 %vm6277_vm1, %v9484_v33  ;;  %v6894_v44 = vadd.f32 %v1303_v35, %v1022_v32  ;;  %v1024_v5 = vadd.f32 %v923_v43, %v6724_v56  ;;  %5515 = vmatprep.mubr.msk.bf16.mxu1 %vm6277_vm1, %v9484_v33 }
 0x160   : > { %v1117_v51 = vpop.f32.mrb[56].mxu0  ;;  %v741_v2 = vpop.f32.mrb[56].mxu1 }
 0x161   : > { %v1304_v63 = vrot.slane %v1117_v51, 2  ;;  %v5403_v57 = vpop.f32.mrb[57].mxu0  ;;  %v924_v23 = vrot.slane %v741_v2, 1  ;;  %v5321_v8 = vpop.f32.mrb[57].mxu1 }
 0x162   : > { %v1120_v21 = vpop.f32.mrb[58].mxu0  ;;  %v744_v19 = vpop.f32.mrb[58].mxu1 }
 0x163   : > { %v1305_v28 = vsel %vm1292_vm4, %v1302_v17, %v1304_v63  ;;  %v1306_v29 = vrot.slane %v1120_v21, 2  ;;  %v5404_v22 = vpop.f32.mrb[59].mxu0  ;;  %v925_v32 = vsel %vm908_vm3, %v922_v45, %v924_v23  ;;  %v926_v31 = vrot.slane %v744_v19, 1  ;;  %v5322_v1 = vpop.f32.mrb[59].mxu1 }
 0x164   : > { %v6901_v56 = vadd.f32 %v1305_v28, %v1023_v55  ;;  %v1025_v15 = vadd.f32 %v925_v32, %v6728_v59 }
 0x165   : > { %v1307_v35 = vsel %vm1292_vm4, %v1304_v63, %v1306_v29  ;;  %5598 = vmatmul.mubr.msk.bf16.gmra.mrb[164].mxu0 %vm371_vm2, %v6514_v25  ;;  %v927_v43 = vsel %vm908_vm3, %v924_v23, %v926_v31  ;;  %5516 = vmatmul.mubr.msk.bf16.gmra.mrb[164].mxu1 %vm371_vm2, %v6528_v27 }
 0x166   : > { %5601 = vmatprep.mubr.msk.bf16.mxu0 %vm6277_vm1, %v9484_v33  ;;  %v6912_v17 = vadd.f32 %v1307_v35, %v1024_v5  ;;  %v1026_v45 = vadd.f32 %v927_v43, %v6740_v0  ;;  %5519 = vmatprep.mubr.msk.bf16.mxu1 %vm6277_vm1, %v9484_v33 }
 0x168   : > { %v1125_v59 = vpop.f32.mrb[60].mxu0  ;;  %v749_v55 = vpop.f32.mrb[60].mxu1 }
 0x169   : > { %v1308_v51 = vrot.slane %v1125_v59, 2  ;;  %v5407_v2 = vpop.f32.mrb[61].mxu0  ;;  %v928_v25 = vrot.slane %v749_v55, 1  ;;  %v5325_v63 = vpop.f32.mrb[61].mxu1 }
 0x16a   : > { %v1128_v57 = vpop.f32.mrb[62].mxu0  ;;  %v752_v8 = vpop.f32.mrb[62].mxu1 }
 0x16b   : > { %v1309_v23 = vsel %vm1292_vm4, %v1306_v29, %v1308_v51  ;;  %v1310_v21 = vrot.slane %v1128_v57, 2  ;;  %v5408_v28 = vpop.f32.mrb[63].mxu0  ;;  %v929_v5 = vsel %vm908_vm3, %v926_v31, %v928_v25  ;;  %v930_v19 = vrot.slane %v752_v8, 1  ;;  %v5326_v22 = vpop.f32.mrb[63].mxu1 }
 0x16c   : > { %v6919_v0 = vadd.f32 %v1309_v23, %v1025_v15  ;;  %v1027_v32 = vadd.f32 %v929_v5, %v6747_v6 }
 0x16d   : > { %v1311_v1 = vsel %vm1292_vm4, %v1308_v51, %v1310_v21  ;;  %5602 = vmatmul.mubr.msk.bf16.gmra.mrb[168].mxu0 %vm371_vm2, %v6528_v27  ;;  %v931_v35 = vsel %vm908_vm3, %v928_v25, %v930_v19  ;;  %5520 = vmatmul.mubr.msk.bf16.gmra.mrb[168].mxu1 %vm371_vm2, %v6388_v7 }
 0x16e   : > { %5605 = vmatprep.mubr.msk.bf16.mxu0 %vm6277_vm1, %v9484_v33  ;;  %v6930_v29 = vadd.f32 %v1311_v1, %v1026_v45  ;;  %v1028_v31 = vadd.f32 %v931_v35, %v6760_v30  ;;  %5523 = vmatprep.mubr.msk.bf16.mxu1 %vm6277_vm1, %v9484_v33 }
 0x170   : > { %v1133_v6 = vpop.f32.mrb[64].mxu0  ;;  %v757_v15 = vpop.f32.mrb[64].mxu1 }
 0x171   : > { %v1312_v43 = vrot.slane %v1133_v6, 2  ;;  %v5411_v59 = vpop.f32.mrb[65].mxu0  ;;  %v932_v27 = vrot.slane %v757_v15, 1  ;;  %v5329_v55 = vpop.f32.mrb[65].mxu1 }
 0x172   : > { %v1136_v51 = vpop.f32.mrb[66].mxu0  ;;  %v760_v25 = vpop.f32.mrb[66].mxu1 }
 0x173   : > { %v1313_v2 = vsel %vm1292_vm4, %v1310_v21, %v1312_v43  ;;  %v1314_v63 = vrot.slane %v1136_v51, 2  ;;  %v5412_v57 = vpop.f32.mrb[67].mxu0  ;;  %v933_v45 = vsel %vm908_vm3, %v930_v19, %v932_v27  ;;  %v934_v23 = vrot.slane %v760_v25, 1  ;;  %v5330_v8 = vpop.f32.mrb[67].mxu1 }
 0x174   : > { %v6937_v30 = vadd.f32 %v1313_v2, %v1027_v32  ;;  %v1029_v28 = vadd.f32 %v933_v45, %v6768_v36 }
 0x175   : > { %v1315_v5 = vsel %vm1292_vm4, %v1312_v43, %v1314_v63  ;;  %5606 = vmatmul.mubr.msk.bf16.gmra.mrb[172].mxu0 %vm371_vm2, %v6388_v7  ;;  %v935_v22 = vsel %vm908_vm3, %v932_v27, %v934_v23  ;;  %5524 = vmatmul.mubr.msk.bf16.gmra.mrb[172].mxu1 %vm371_vm2, %v6405_v10 }
 0x176   : > { %5609 = vmatprep.mubr.msk.bf16.mxu0 %vm6277_vm1, %v9484_v33  ;;  %v6948_v21 = vadd.f32 %v1315_v5, %v1028_v31  ;;  %v1030_v19 = vadd.f32 %v935_v22, %v6781_v47  ;;  %5527 = vmatprep.mubr.msk.bf16.mxu1 %vm6277_vm1, %v9484_v33 }
 0x178   : > { %v1141_v36 = vpop.f32.mrb[68].mxu0  ;;  %v765_v32 = vpop.f32.mrb[68].mxu1 }
 0x179   : > { %v1316_v1 = vrot.slane %v1141_v36, 2  ;;  %v5415_v35 = vpop.f32.mrb[69].mxu0  ;;  %v936_v7 = vrot.slane %v765_v32, 1  ;;  %v5333_v6 = vpop.f32.mrb[69].mxu1 }
 0x17a   : > { %v1144_v15 = vpop.f32.mrb[70].mxu0  ;;  %v768_v59 = vpop.f32.mrb[70].mxu1 }
 0x17b   : > { %v1317_v43 = vsel %vm1292_vm4, %v1314_v63, %v1316_v1  ;;  %v1318_v27 = vrot.slane %v1144_v15, 2  ;;  %v5416_v55 = vpop.f32.mrb[71].mxu0  ;;  %v937_v31 = vsel %vm908_vm3, %v934_v23, %v936_v7  ;;  %v938_v51 = vrot.slane %v768_v59, 1  ;;  %v5334_v2 = vpop.f32.mrb[71].mxu1 }
 0x17c   : > { %v6955_v47 = vadd.f32 %v1317_v43, %v1029_v28  ;;  %v1031_v25 = vadd.f32 %v937_v31, %v6786_v53 }
 0x17d   : > { %v1319_v57 = vsel %vm1292_vm4, %v1316_v1, %v1318_v27  ;;  %5610 = vmatmul.mubr.msk.bf16.gmra.mrb[176].mxu0 %vm371_vm2, %v6405_v10  ;;  %v939_v45 = vsel %vm908_vm3, %v936_v7, %v938_v51  ;;  %5528 = vmatmul.mubr.msk.bf16.gmra.mrb[176].mxu1 %vm371_vm2, %v6419_v12 }
 0x17e   : > { %5613 = vmatprep.mubr.msk.bf16.mxu0 %vm6277_vm1, %v9484_v33  ;;  %v6966_v63 = vadd.f32 %v1319_v57, %v1030_v19  ;;  %v1032_v23 = vadd.f32 %v939_v45, %v6798_v61  ;;  %5531 = vmatprep.mubr.msk.bf16.mxu1 %vm6277_vm1, %v9484_v33 }
 0x180   : > { %v1149_v53 = vpop.f32.mrb[72].mxu0  ;;  %v773_v8 = vpop.f32.mrb[72].mxu1 }
 0x181   : > { %v1320_v28 = vrot.slane %v1149_v53, 2  ;;  %v5419_v5 = vpop.f32.mrb[73].mxu0  ;;  %v940_v10 = vrot.slane %v773_v8, 1  ;;  %v5337_v22 = vpop.f32.mrb[73].mxu1 }
 0x182   : > { %v1152_v36 = vpop.f32.mrb[74].mxu0  ;;  %v776_v1 = vpop.f32.mrb[74].mxu1 }
 0x183   : > { %v1321_v32 = vsel %vm1292_vm4, %v1318_v27, %v1320_v28  ;;  %v1322_v35 = vrot.slane %v1152_v36, 2  ;;  %v5420_v7 = vpop.f32.mrb[75].mxu0  ;;  %v941_v19 = vsel %vm908_vm3, %v938_v51, %v940_v10  ;;  %v942_v6 = vrot.slane %v776_v1, 1  ;;  %v5338_v15 = vpop.f32.mrb[75].mxu1 }
 0x184   : > { %v6973_v61 = vadd.f32 %v1321_v32, %v1031_v25  ;;  %v1033_v43 = vadd.f32 %v941_v19, %v6800_v4 }
 0x185   : > { %v1323_v59 = vsel %vm1292_vm4, %v1320_v28, %v1322_v35  ;;  %5614 = vmatmul.mubr.msk.bf16.gmra.mrb[180].mxu0 %vm371_vm2, %v6419_v12  ;;  %v943_v55 = vsel %vm908_vm3, %v940_v10, %v942_v6  ;;  %5532 = vmatmul.mubr.msk.bf16.gmra.mrb[180].mxu1 %vm371_vm2, %v6433_v14 }
 0x186   : > { %5617 = vmatprep.mubr.msk.bf16.mxu0 %vm6277_vm1, %v9484_v33  ;;  %v6984_v27 = vadd.f32 %v1323_v59, %v1032_v23  ;;  %v1034_v31 = vadd.f32 %v943_v55, %v6810_v9  ;;  %5535 = vmatprep.mubr.msk.bf16.mxu1 %vm6277_vm1, %v9484_v33 }
 0x188   : > { %v1157_v4 = vpop.f32.mrb[76].mxu0  ;;  %v781_v51 = vpop.f32.mrb[76].mxu1 }
 0x189   : > { %v1324_v2 = vrot.slane %v1157_v4, 2  ;;  %v5423_v25 = vpop.f32.mrb[77].mxu0  ;;  %v944_v12 = vrot.slane %v781_v51, 1  ;;  %v5341_v57 = vpop.f32.mrb[77].mxu1 }
 0x18a   : > { %v1160_v45 = vpop.f32.mrb[78].mxu0  ;;  %v784_v8 = vpop.f32.mrb[78].mxu1 }
 0x18b   : > { %v1325_v53 = vsel %vm1292_vm4, %v1322_v35, %v1324_v2  ;;  %v1326_v28 = vrot.slane %v1160_v45, 2  ;;  %v5424_v5 = vpop.f32.mrb[79].mxu0  ;;  %v945_v23 = vsel %vm908_vm3, %v942_v6, %v944_v12  ;;  %v946_v10 = vrot.slane %v784_v8, 1  ;;  %v5342_v22 = vpop.f32.mrb[79].mxu1 }
 0x18c   : > { %v6991_v9 = vadd.f32 %v1325_v53, %v1033_v43  ;;  %v1035_v36 = vadd.f32 %v945_v23, %v6812_v37 }
 0x18d   : > { %v1327_v32 = vsel %vm1292_vm4, %v1324_v2, %v1326_v28  ;;  %5618 = vmatmul.mubr.msk.bf16.gmra.mrb[184].mxu0 %vm371_vm2, %v6433_v14  ;;  %v947_v1 = vsel %vm908_vm3, %v944_v12, %v946_v10  ;;  %5536 = vmatmul.mubr.msk.bf16.gmra.mrb[184].mxu1 %vm371_vm2, %v6447_v16 }
 0x18e   : > { %5621 = vmatprep.mubr.msk.bf16.mxu0 %vm6277_vm1, %v9484_v33  ;;  %v7002_v35 = vadd.f32 %v1327_v32, %v1034_v31  ;;  %v1036_v7 = vadd.f32 %v947_v1, %v6822_v11  ;;  %5539 = vmatprep.mubr.msk.bf16.mxu1 %vm6277_vm1, %v9484_v33 }
 0x190   : > { %v1165_v37 = vpop.f32.mrb[80].mxu0  ;;  %v789_v19 = vpop.f32.mrb[80].mxu1 }
 0x191   : > { %v1328_v6 = vrot.slane %v1165_v37, 2  ;;  %v5427_v15 = vpop.f32.mrb[81].mxu0  ;;  %v948_v14 = vrot.slane %v789_v19, 1  ;;  %v5345_v43 = vpop.f32.mrb[81].mxu1 }
 0x192   : > { %v1168_v59 = vpop.f32.mrb[82].mxu0  ;;  %v792_v4 = vpop.f32.mrb[82].mxu1 }
 0x193   : > { %v1329_v55 = vsel %vm1292_vm4, %v1326_v28, %v1328_v6  ;;  %v1330_v51 = vrot.slane %v1168_v59, 2  ;;  %v5428_v2 = vpop.f32.mrb[83].mxu0  ;;  %v949_v31 = vsel %vm908_vm3, %v946_v10, %v948_v14  ;;  %v950_v25 = vrot.slane %v792_v4, 1  ;;  %v5346_v12 = vpop.f32.mrb[83].mxu1 }
 0x194   : > { %v7009_v11 = vadd.f32 %v1329_v55, %v1035_v36  ;;  %v1037_v57 = vadd.f32 %v949_v31, %v6824_v60 }
 0x195   : > { %v1331_v45 = vsel %vm1292_vm4, %v1328_v6, %v1330_v51  ;;  %5622 = vmatmul.mubr.msk.bf16.gmra.mrb[188].mxu0 %vm371_vm2, %v6447_v16  ;;  %v951_v53 = vsel %vm908_vm3, %v948_v14, %v950_v25  ;;  %5540 = vmatmul.mubr.msk.bf16.gmra.mrb[188].mxu1 %vm371_vm2, %v6461_v18 }
 0x196   : > { %5625 = vmatprep.mubr.msk.bf16.mxu0 %vm6277_vm1, %v9484_v33  ;;  %v7020_v8 = vadd.f32 %v1331_v45, %v1036_v7  ;;  %v1038_v28 = vadd.f32 %v951_v53, %v6834_v13  ;;  %5543 = vmatprep.mubr.msk.bf16.mxu1 %vm6277_vm1, %v9484_v33 }
 0x198   : > { %v1173_v60 = vpop.f32.mrb[84].mxu0  ;;  %v797_v5 = vpop.f32.mrb[84].mxu1 }
 0x199   : > { %v1332_v23 = vrot.slane %v1173_v60, 2  ;;  %v5431_v10 = vpop.f32.mrb[85].mxu0  ;;  %v952_v16 = vrot.slane %v797_v5, 1  ;;  %v5349_v22 = vpop.f32.mrb[85].mxu1 }
 0x19a   : > { %v1176_v36 = vpop.f32.mrb[86].mxu0  ;;  %v800_v1 = vpop.f32.mrb[86].mxu1 }
 0x19b   : > { %v1333_v32 = vsel %vm1292_vm4, %v1330_v51, %v1332_v23  ;;  %v1334_v37 = vrot.slane %v1176_v36, 2  ;;  %v5432_v19 = vpop.f32.mrb[87].mxu0  ;;  %v953_v7 = vsel %vm908_vm3, %v950_v25, %v952_v16  ;;  %v954_v6 = vrot.slane %v800_v1, 1  ;;  %v5350_v15 = vpop.f32.mrb[87].mxu1  ;;  %v7056_v36 = vld [vmem:[%s6381_s15 + $0x90] sm:$0xff]  }
 0x19c   : > { %v7027_v13 = vadd.f32 %v1333_v32, %v1037_v57  ;;  %v1039_v14 = vadd.f32 %v953_v7, %v6836_v39 }
 0x19d   : > { %v1335_v43 = vsel %vm1292_vm4, %v1332_v23, %v1334_v37  ;;  %5626 = vmatmul.mubr.msk.bf16.gmra.mrb[192].mxu0 %vm371_vm2, %v6461_v18  ;;  %v955_v59 = vsel %vm908_vm3, %v952_v16, %v954_v6  ;;  %5544 = vmatmul.mubr.msk.bf16.gmra.mrb[192].mxu1 %vm371_vm2, %v6475_v20  ;;  %v7050_v16 = vld [vmem:[%s6381_s15 + $0x88] sm:$0xff]  }
 0x19e   : > { %5629 = vmatprep.mubr.msk.bf16.mxu0 %vm6277_vm1, %v9484_v33  ;;  %v7038_v55 = vadd.f32 %v1335_v43, %v1038_v28  ;;  %v1040_v4 = vadd.f32 %v955_v59, %v6678_v34  ;;  %5547 = vmatprep.mubr.msk.bf16.mxu1 %vm6277_vm1, %v9484_v33 }
 0x1a0   : > { %v1181_v39 = vpop.f32.mrb[88].mxu0  ;;  %v805_v51 = vpop.f32.mrb[88].mxu1 }
 0x1a1   : > { %v1336_v2 = vrot.slane %v1181_v39, 2  ;;  %v5435_v18 = vpop.f32.mrb[89].mxu0  ;;  %v956_v31 = vrot.slane %v805_v51, 1  ;;  %v5353_v25 = vpop.f32.mrb[89].mxu1 }
 0x1a2   : > { %v1184_v12 = vpop.f32.mrb[90].mxu0  ;;  %v808_v57 = vpop.f32.mrb[90].mxu1 }
 0x1a3   : > { %v1337_v20 = vsel %vm1292_vm4, %v1334_v37, %v1336_v2  ;;  %v1338_v45 = vrot.slane %v1184_v12, 2  ;;  %v5436_v53 = vpop.f32.mrb[91].mxu0  ;;  %v957_v28 = vsel %vm908_vm3, %v954_v6, %v956_v31  ;;  %v958_v34 = vrot.slane %v808_v57, 1  ;;  %v5354_v60 = vpop.f32.mrb[91].mxu1 }
 0x1a4   : > { %v7045_v5 = vadd.f32 %v1337_v20, %v1039_v14  ;;  %v1041_v23 = vadd.f32 %v957_v28, %v6682_v38  ;;  %v7077_v20 = vld [vmem:[%s6381_s15 + $0x98] sm:$0xff]  }
 0x1a5   : > { %v1339_v10 = vsel %vm1292_vm4, %v1336_v2, %v1338_v45  ;;  %5630 = vmatmul.mubr.msk.bf16.gmra.mrb[196].mxu0 %vm371_vm2, %v7050_v16  ;;  %v959_v22 = vsel %vm908_vm3, %v956_v31, %v958_v34  ;;  %5548 = vmatmul.mubr.msk.bf16.gmra.mrb[196].mxu1 %vm371_vm2, %v7056_v36 }
 0x1a6   : > { %5633 = vmatprep.mubr.msk.bf16.mxu0 %vm6277_vm1, %v9484_v33  ;;  %v7062_v32 = vadd.f32 %v1339_v10, %v1040_v4  ;;  %v1042_v38 = vadd.f32 %v959_v22, %v6694_v42  ;;  %5551 = vmatprep.mubr.msk.bf16.mxu1 %vm6277_vm1, %v9484_v33 }
 0x1a8   : > { %v1189_v1 = vpop.f32.mrb[92].mxu0  ;;  %v813_v37 = vpop.f32.mrb[92].mxu1 }
 0x1a9   : > { %v1340_v19 = vrot.slane %v1189_v1, 2  ;;  %v5439_v7 = vpop.f32.mrb[93].mxu0  ;;  %v960_v6 = vrot.slane %v813_v37, 1  ;;  %v5357_v15 = vpop.f32.mrb[93].mxu1 }
 0x1aa   : > { %v1192_v14 = vpop.f32.mrb[94].mxu0  ;;  %v816_v59 = vpop.f32.mrb[94].mxu1 }
 0x1ab   : > { %v1341_v43 = vsel %vm1292_vm4, %v1338_v45, %v1340_v19  ;;  %v1342_v39 = vrot.slane %v1192_v14, 2  ;;  %v5440_v51 = vpop.f32.mrb[95].mxu0  ;;  %v961_v4 = vsel %vm908_vm3, %v958_v34, %v960_v6  ;;  %v962_v2 = vrot.slane %v816_v59, 1  ;;  %v5358_v42 = vpop.f32.mrb[95].mxu1  ;;  %v7098_v59 = vld [vmem:[%s6381_s15 + $0xa0] sm:$0xff]  }
 0x1ac   : > { %v7069_v18 = vadd.f32 %v1341_v43, %v1041_v23  ;;  %v1043_v31 = vadd.f32 %v961_v4, %v6698_v46 }
 0x1ad   : > { %v1343_v25 = vsel %vm1292_vm4, %v1340_v19, %v1342_v39  ;;  %5634 = vmatmul.mubr.msk.bf16.gmra.mrb[200].mxu0 %vm371_vm2, %v7056_v36  ;;  %v963_v12 = vsel %vm908_vm3, %v960_v6, %v962_v2  ;;  %5552 = vmatmul.mubr.msk.bf16.gmra.mrb[200].mxu1 %vm371_vm2, %v7077_v20 }
 0x1ae   : > { %5637 = vmatprep.mubr.msk.bf16.mxu0 %vm6277_vm1, %v9484_v33  ;;  %v7083_v57 = vadd.f32 %v1343_v25, %v1042_v38  ;;  %v1044_v45 = vadd.f32 %v963_v12, %v6710_v50  ;;  %5555 = vmatprep.mubr.msk.bf16.mxu1 %vm6277_vm1, %v9484_v33 }
 0x1b0   : > { %v1197_v46 = vpop.f32.mrb[96].mxu0  ;;  %v821_v53 = vpop.f32.mrb[96].mxu1 }
 0x1b1   : > { %v1344_v28 = vrot.slane %v1197_v46, 2  ;;  %v5443_v34 = vpop.f32.mrb[97].mxu0  ;;  %v964_v60 = vrot.slane %v821_v53, 1  ;;  %v5361_v23 = vpop.f32.mrb[97].mxu1 }
 0x1b2   : > { %v1200_v10 = vpop.f32.mrb[98].mxu0  ;;  %v824_v1 = vpop.f32.mrb[98].mxu1 }
 0x1b3   : > { %v1345_v22 = vsel %vm1292_vm4, %v1342_v39, %v1344_v28  ;;  %v1346_v37 = vrot.slane %v1200_v10, 2  ;;  %v5444_v19 = vpop.f32.mrb[99].mxu0  ;;  %v965_v38 = vsel %vm908_vm3, %v962_v2, %v964_v60  ;;  %v966_v7 = vrot.slane %v824_v1, 1  ;;  %v5362_v50 = vpop.f32.mrb[99].mxu1 }
 0x1b4   : > { %v7090_v6 = vadd.f32 %v1345_v22, %v1043_v31  ;;  %v1045_v15 = vadd.f32 %v965_v38, %v6714_v54  ;;  %v4952_v31 = vld [vmem:[%s9450_s1 + $0xe] sm:$0x3]  ;;  %v7123_v38 = vld [vmem:[%s6381_s15] sm:$0xff]  }
 0x1b5   : > { %v1347_v14 = vsel %vm1292_vm4, %v1344_v28, %v1346_v37  ;;  %5638 = vmatmul.mubr.msk.bf16.gmra.mrb[204].mxu0 %vm371_vm2, %v7077_v20  ;;  %v967_v43 = vsel %vm908_vm3, %v964_v60, %v966_v7  ;;  %5556 = vmatmul.mubr.msk.bf16.gmra.mrb[204].mxu1 %vm371_vm2, %v7098_v59  ;;  %v2975_v10 = vsel %vm9467_vm0, %v4952_v31, 0 }
 0x1b6   : > { %5641 = vmatprep.mubr.msk.bf16.mxu0 %vm6277_vm1, %v9484_v33  ;;  %v7104_v39 = vadd.f32 %v1347_v14, %v1044_v45  ;;  %v1046_v51 = vadd.f32 %v967_v43, %v6726_v58  ;;  %5647 = vmatprep.mubr.msk.bf16.mxu1 %vm6277_vm1, %v9484_v33 }
 0x1b8   : > { %v1205_v54 = vpop.f32.mrb[100].mxu0  ;;  %v829_v4 = vpop.f32.mrb[100].mxu1 }
 0x1b9   : > { %v1348_v2 = vrot.slane %v1205_v54, 2  ;;  %v5447_v42 = vpop.f32.mrb[101].mxu0  ;;  %v968_v25 = vrot.slane %v829_v4, 1  ;;  %v5365_v12 = vpop.f32.mrb[101].mxu1 }
 0x1ba   : > { %v1208_v46 = vpop.f32.mrb[102].mxu0  ;;  %v832_v53 = vpop.f32.mrb[102].mxu1 }
 0x1bb   : > { %v1349_v45 = vsel %vm1292_vm4, %v1346_v37, %v1348_v2  ;;  %v1350_v28 = vrot.slane %v1208_v46, 2  ;;  %v5448_v58 = vpop.f32.mrb[103].mxu0  ;;  %v969_v34 = vsel %vm908_vm3, %v966_v7, %v968_v25  ;;  %v970_v60 = vrot.slane %v832_v53, 1  ;;  %v5366_v23 = vpop.f32.mrb[103].mxu1 }
 0x1bc   : > { %v7115_v22 = vadd.f32 %v1349_v45, %v1045_v15  ;;  %v1047_v1 = vadd.f32 %v969_v34, %v6730_v62  ;;  %v4974_v15 = vld [vmem:[%s9450_s1 + $0x10] sm:$0x3] }
 0x1bd   : > { %v1351_v19 = vsel %vm1292_vm4, %v1348_v2, %v1350_v28  ;;  %5642 = vmatmul.mubr.msk.bf16.gmra.mrb[208].mxu0 %vm371_vm2, %v7098_v59  ;;  %v971_v37 = vsel %vm908_vm3, %v968_v25, %v970_v60  ;;  %5648 = vmatmul.mubr.msk.bf16.vlgmr.msra.gmra.mrb[208].mxu1 %vm371_vm2, %v7123_v38  ;;  %v3359_v12 = vsel %vm9467_vm0, %v4974_v15, 0 }
 0x1be   : > { %5733 = vmatprep.mubr.msk.bf16.mxu0 %vm6277_vm1, %v9484_v33  ;;  %v7129_v7 = vadd.f32 %v1351_v19, %v1046_v51  ;;  %v1048_v50 = vadd.f32 %v971_v37, %v6742_v3  ;;  %5818 = vmatpush3.bf16.msra.mxu1 %v2975_v10  ;;  %v7148_v10 = vld [vmem:[%s6381_s15 + $0x8] sm:$0xff]  }
 0x1bf   : > { %5651 = vmatprep.mubr.msk.bf16.mxu1 %vm6277_vm1, %v9484_v33 }
 0x1c0   : > { %v1213_v62 = vpop.f32.mrb[104].mxu0  ;;  %v837_v14 = vpop.f32.mrb[104].mxu1 }
 0x1c1   : > { %v1352_v43 = vrot.slane %v1213_v62, 2  ;;  %v5451_v54 = vpop.f32.mrb[105].mxu0  ;;  %v972_v4 = vrot.slane %v837_v14, 1  ;;  %v5369_v2 = vpop.f32.mrb[105].mxu1 }
 0x1c2   : > { %v1216_v42 = vpop.f32.mrb[106].mxu0  ;;  %v840_v31 = vpop.f32.mrb[106].mxu1 }
 0x1c3   : > { %v1353_v51 = vsel %vm1292_vm4, %v1350_v28, %v1352_v43  ;;  %v1354_v3 = vrot.slane %v1216_v42, 2  ;;  %v5452_v25 = vpop.f32.mrb[107].mxu0  ;;  %v973_v46 = vsel %vm908_vm3, %v970_v60, %v972_v4  ;;  %v974_v45 = vrot.slane %v840_v31, 1  ;;  %v5370_v53 = vpop.f32.mrb[107].mxu1 }
 0x1c4   : > { %v7140_v58 = vadd.f32 %v1353_v51, %v1047_v1  ;;  %v1049_v34 = vadd.f32 %v973_v46, %v6749_v24  ;;  %v7169_v53 = vld [vmem:[%s6381_s15 + $0x10] sm:$0xff]  }
 0x1c5   : > { %v1355_v23 = vsel %vm1292_vm4, %v1352_v43, %v1354_v3  ;;  %5734 = vmatmul.mubr.msk.bf16.vlgmr.msra.gmra.mrb[212].mxu0 %vm371_vm2, %v7123_v38  ;;  %v975_v28 = vsel %vm908_vm3, %v972_v4, %v974_v45  ;;  %5652 = vmatmul.mubr.msk.bf16.gmra.mrb[212].mxu1 %vm371_vm2, %v7148_v10 }
 0x1c6   : > { %5904 = vmatpush3.bf16.msra.mxu0 %v3359_v12  ;;  %v7152_v60 = vadd.f32 %v1355_v23, %v1048_v50  ;;  %v1050_v1 = vadd.f32 %v975_v28, %v6766_v26  ;;  %5655 = vmatprep.mubr.msk.bf16.mxu1 %vm6277_vm1, %v9484_v33 }
 0x1c7   : > { %5737 = vmatprep.mubr.msk.bf16.mxu0 %vm6277_vm1, %v9484_v33 }
 0x1c8   : > { %v1221_v24 = vpop.f32.mrb[108].mxu0  ;;  %v845_v19 = vpop.f32.mrb[108].mxu1 }
 0x1c9   : > { %v1356_v37 = vrot.slane %v1221_v24, 2  ;;  %v5455_v62 = vpop.f32.mrb[109].mxu0  ;;  %v976_v15 = vrot.slane %v845_v19, 1  ;;  %v5373_v14 = vpop.f32.mrb[109].mxu1 }
 0x1ca   : > { %v1224_v43 = vpop.f32.mrb[110].mxu0  ;;  %v848_v50 = vpop.f32.mrb[110].mxu1 }
 0x1cb   : > { %v1357_v54 = vsel %vm1292_vm4, %v1354_v3, %v1356_v37  ;;  %v1358_v4 = vrot.slane %v1224_v43, 2  ;;  %v5456_v2 = vpop.f32.mrb[111].mxu0  ;;  %v977_v26 = vsel %vm908_vm3, %v974_v45, %v976_v15  ;;  %v978_v42 = vrot.slane %v848_v50, 1  ;;  %v5374_v51 = vpop.f32.mrb[111].mxu1  ;;  %v9485_v50 = vld [vmem:[#allocation5_spill] sm:$0xff] }
 0x1cc   : > { %v7161_v31 = vadd.f32 %v1357_v54, %v1049_v34  ;;  %v1051_v25 = vadd.f32 %v977_v26, %v6770_v41  ;;  %v7189_v51 = vld [vmem:[%s6381_s15 + $0x18] sm:$0xff]  }
 0x1cd   : > { %v1359_v12 = vsel %vm1292_vm4, %v1356_v37, %v1358_v4  ;;  %5738 = vmatmul.mubr.msk.bf16.gmra.mrb[216].mxu0 %vm371_vm2, %v7148_v10  ;;  %v979_v46 = vsel %vm908_vm3, %v976_v15, %v978_v42  ;;  %5656 = vmatmul.mubr.msk.bf16.gmra.mrb[216].mxu1 %vm371_vm2, %v7169_v53 }
 0x1ce   : > { %5741 = vmatprep.mubr.msk.bf16.mxu0 %vm6277_vm1, %v9484_v33  ;;  %v7175_v3 = vadd.f32 %v1359_v12, %v1050_v1  ;;  %v1052_v45 = vadd.f32 %v979_v46, %v6784_v52  ;;  %5659 = vmatprep.mubr.msk.bf16.mxu1 %vm6277_vm1, %v9484_v33 }
 0x1d0   : > { %v1229_v41 = vpop.f32.mrb[112].mxu0  ;;  %v853_v34 = vpop.f32.mrb[112].mxu1 }
 0x1d1   : > { %v1360_v23 = vrot.slane %v1229_v41, 2  ;;  %v5459_v28 = vpop.f32.mrb[113].mxu0  ;;  %v980_v24 = vrot.slane %v853_v34, 1  ;;  %v5377_v37 = vpop.f32.mrb[113].mxu1 }
 0x1d2   : > { %v1232_v19 = vpop.f32.mrb[114].mxu0  ;;  %v856_v43 = vpop.f32.mrb[114].mxu1 }
 0x1d3   : > { %v1361_v62 = vsel %vm1292_vm4, %v1358_v4, %v1360_v23  ;;  %v1362_v15 = vrot.slane %v1232_v19, 2  ;;  %v5460_v14 = vpop.f32.mrb[115].mxu0  ;;  %v981_v1 = vsel %vm908_vm3, %v978_v42, %v980_v24  ;;  %v5378_v54 = vpop.f32.mrb[115].mxu1 }
 0x1d4   : > { %v7182_v52 = vadd.f32 %v1361_v62, %v1051_v25  ;;  %v1053_v2 = vadd.f32 %v981_v1, %v9485_v50 }
 0x1d5   : > { %v1363_v26 = vsel %vm1292_vm4, %v1360_v23, %v1362_v15  ;;  %5742 = vmatmul.mubr.msk.bf16.gmra.mrb[220].mxu0 %vm371_vm2, %v7169_v53  ;;  %5660 = vmatmul.mubr.msk.bf16.gmra.mrb[220].mxu1 %vm371_vm2, %v7189_v51 }
 0x1d6   : > { %5745 = vmatprep.mubr.msk.bf16.mxu0 %vm6277_vm1, %v9484_v33  ;;  %v7195_v4 = vadd.f32 %v1363_v26, %v1052_v45  ;;  %5663 = vmatprep.mubr.msk.bf16.mxu1 %vm6277_vm1, %v9484_v33  ;;  %v7205_v45 = vld [vmem:[%s6381_s15 + $0x20] sm:$0xff]   ;;  %v7216_v26 = vld [vmem:[%s6381_s15 + $0x28] sm:$0xff]  }
 0x1d7   : > { %9486 = vst [vmem:[#allocation5_spill] sm:$0xff] %v7216_v26 }
 0x1d8   : > { %v1237_v42 = vpop.f32.mrb[116].mxu0  ;;  %v860_v46 = vpop.f32.mrb[116].mxu1 }
 0x1d9   : > { %v1364_v25 = vrot.slane %v1237_v42, 2  ;;  %v5463_v12 = vpop.f32.mrb[117].mxu0  ;;  %v5381_v34 = vpop.f32.mrb[117].mxu1 }
 0x1da   : > { %v1240_v41 = vpop.f32.mrb[118].mxu0  ;;  %v862_v24 = vpop.f32.mrb[118].mxu1 }
 0x1db   : > { %v1365_v23 = vsel %vm1292_vm4, %v1362_v15, %v1364_v25  ;;  %v5464_v28 = vpop.f32.mrb[119].mxu0  ;;  %v5382_v19 = vpop.f32.mrb[119].mxu1  ;;  %v7227_v24 = vld [vmem:[%s6381_s15 + $0x30] sm:$0xff]  }
 0x1dc   : > { %v7200_v37 = vadd.f32 %v1365_v23, %v1053_v2  ;;  %9487 = vst [vmem:[#allocation7_spill] sm:$0xff] %v7227_v24 }
 0x1dd   : > { %5746 = vmatmul.mubr.msk.bf16.gmra.mrb[224].mxu0 %vm371_vm2, %v7189_v51  ;;  %5664 = vmatmul.mubr.msk.bf16.gmra.mrb[224].mxu1 %vm371_vm2, %v7205_v45 }
 0x1de   : > { %5749 = vmatprep.mubr.msk.bf16.mxu0 %vm6277_vm1, %v9484_v33  ;;  %5667 = vmatprep.mubr.msk.bf16.mxu1 %vm6277_vm1, %v9484_v33 }
 0x1e0   : > { %v1244_v62 = vpop.f32.mrb[120].mxu0  ;;  %v866_v14 = vpop.f32.mrb[120].mxu1 }
 0x1e1   : > { %v5467_v15 = vpop.f32.mrb[121].mxu0  ;;  %v5385_v1 = vpop.f32.mrb[121].mxu1 }
 0x1e2   : > { %v1246_v43 = vpop.f32.mrb[122].mxu0  ;;  %v868_v50 = vpop.f32.mrb[122].mxu1 }
 0x1e3   : > { %v5468_v54 = vpop.f32.mrb[123].mxu0  ;;  %v5386_v2 = vpop.f32.mrb[123].mxu1 }
 0x1e5   : > { %5750 = vmatmul.mubr.msk.bf16.gmra.mrb[228].mxu0 %vm371_vm2, %v7205_v45  ;;  %5668 = vmatmul.mubr.msk.bf16.gmra.mrb[228].mxu1 %vm371_vm2, %v7216_v26 }
 0x1e6   : > { %5753 = vmatprep.mubr.msk.bf16.mxu0 %vm6277_vm1, %v9484_v33  ;;  %5671 = vmatprep.mubr.msk.bf16.mxu1 %vm6277_vm1, %v9484_v33 }
 0x1e8   : > { %v1250_v42 = vpop.f32.mrb[124].mxu0  ;;  %v1477_v12 = vpop.f32.mrb[124].mxu1 }
 0x1e9   : > { %v5471_v25 = vpop.f32.mrb[125].mxu0  ;;  %v5477_v41 = vpop.f32.mrb[125].mxu1  ;;  %v7239_v12 = vld [vmem:[%s6381_s15 + $0x38] sm:$0xff]  }
 0x1ea   : > { %v1252_v46 = vpop.f32.mrb[126].mxu0  ;;  %v1479_v23 = vpop.f32.mrb[126].mxu1  ;;  %9488 = vst [vmem:[#allocation8_spill] sm:$0xff] %v7239_v12 }
 0x1eb   : > { %v5472_v34 = vpop.f32.mrb[127].mxu0  ;;  %v5478_v28 = vpop.f32.mrb[127].mxu1  ;;  %v9489_v46 = vld [vmem:[#allocation6_spill] sm:$0xff] }
 0x1ed   : > { %5754 = vmatmul.mubr.msk.bf16.gmra.mrb[232].mxu0 %vm371_vm2, %v7216_v26  ;;  %5672 = vmatmul.mubr.msk.bf16.gmra.mrb[232].mxu1 %vm371_vm2, %v7227_v24 }
 0x1ee   : > { %5757 = vmatprep.mubr.msk.bf16.mxu0 %vm6277_vm1, %v9484_v33  ;;  %5675 = vmatprep.mubr.msk.bf16.mxu1 %vm6277_vm1, %v9484_v33 }
 0x1f0   : > { %v1860_v19 = vpop.f32.mrb[128].mxu0  ;;  %v1483_v62 = vpop.f32.mrb[128].mxu1 }
 0x1f1   : > { %v5563_v15 = vpop.f32.mrb[129].mxu0  ;;  %v1676_v14 = vrot.slane %v1483_v62, 2  ;;  %v5481_v43 = vpop.f32.mrb[129].mxu1 }
 0x1f2   : > { %v1862_v1 = vpop.f32.mrb[130].mxu0  ;;  %v1486_v54 = vpop.f32.mrb[130].mxu1 }
 0x1f3   : > { %v5564_v50 = vpop.f32.mrb[131].mxu0  ;;  %v1677_v2 = vrot.slane %v1486_v54, 2  ;;  %v5482_v42 = vpop.f32.mrb[131].mxu1 }
 0x1f5   : > { %5758 = vmatmul.mubr.msk.bf16.gmra.mrb[236].mxu0 %vm371_vm2, %v7227_v24  ;;  %v1678_v25 = vsel %vm1292_vm4, %v1676_v14, %v1677_v2  ;;  %5676 = vmatmul.mubr.msk.bf16.gmra.mrb[236].mxu1 %vm371_vm2, %v7239_v12 }
 0x1f6   : > { %5761 = vmatprep.mubr.msk.bf16.mxu0 %vm6277_vm1, %v9484_v33  ;;  %v1785_v41 = vadd.f32 %v1678_v25, %v9489_v46  ;;  %5679 = vmatprep.mubr.msk.bf16.mxu1 %vm6277_vm1, %v9484_v33 }
 0x1f8   : > { %v1866_v34 = vpop.f32.mrb[132].mxu0  ;;  %v1491_v23 = vpop.f32.mrb[132].mxu1 }
 0x1f9   : > { %v5567_v28 = vpop.f32.mrb[133].mxu0  ;;  %v1679_v19 = vrot.slane %v1491_v23, 2  ;;  %v5485_v62 = vpop.f32.mrb[133].mxu1  ;;  %v2060_v14 = vrot.slane %v1866_v34, 3 }
 0x1fa   : > { %v1869_v15 = vpop.f32.mrb[134].mxu0  ;;  %v1494_v43 = vpop.f32.mrb[134].mxu1  ;;  %v7257_v62 = vld [vmem:[%s6381_s15 + $0x40] sm:$0xff]  }
 0x1fb   : > { %v2061_v1 = vrot.slane %v1869_v15, 3  ;;  %v5568_v54 = vpop.f32.mrb[135].mxu0  ;;  %v1680_v50 = vsel %vm1292_vm4, %v1677_v2, %v1679_v19  ;;  %v1681_v42 = vrot.slane %v1494_v43, 2  ;;  %v5486_v24 = vpop.f32.mrb[135].mxu1 }
 0x1fc   : > { %v1786_v25 = vadd.f32 %v1680_v50, %v6865_v40 }
 0x1fd   : > { %v2062_v46 = vsel %vm2059_vm5, %v2060_v14, %v2061_v1  ;;  %5762 = vmatmul.mubr.msk.bf16.gmra.mrb[240].mxu0 %vm371_vm2, %v7239_v12  ;;  %v1682_v23 = vsel %vm1292_vm4, %v1679_v19, %v1681_v42  ;;  %5680 = vmatmul.mubr.msk.bf16.gmra.mrb[240].mxu1 %vm371_vm2, %v7257_v62 }
 0x1fe   : > { %v7254_v28 = vadd.f32 %v2062_v46, %v1785_v41  ;;  %5765 = vmatprep.mubr.msk.bf16.mxu0 %vm6277_vm1, %v9484_v33  ;;  %v1787_v24 = vadd.f32 %v1682_v23, %v6876_v49  ;;  %5683 = vmatprep.mubr.msk.bf16.mxu1 %vm6277_vm1, %v9484_v33 }
 0x200   : > { %9490 = vst [vmem:[#allocation6_spill] sm:$0xff] %v7254_v28  ;;  %v1874_v40 = vpop.f32.mrb[136].mxu0  ;;  %v1499_v2 = vpop.f32.mrb[136].mxu1 }
 0x201   : > { %v2063_v34 = vrot.slane %v1874_v40, 3  ;;  %v5571_v15 = vpop.f32.mrb[137].mxu0  ;;  %v1683_v19 = vrot.slane %v1499_v2, 2  ;;  %v5489_v41 = vpop.f32.mrb[137].mxu1 }
 0x202   : > { %v1877_v14 = vpop.f32.mrb[138].mxu0  ;;  %v1502_v54 = vpop.f32.mrb[138].mxu1 }
 0x203   : > { %v2064_v43 = vsel %vm2059_vm5, %v2061_v1, %v2063_v34  ;;  %v2065_v50 = vrot.slane %v1877_v14, 3  ;;  %v5572_v46 = vpop.f32.mrb[139].mxu0  ;;  %v1684_v28 = vsel %vm1292_vm4, %v1681_v42, %v1683_v19  ;;  %v1685_v49 = vrot.slane %v1502_v54, 2  ;;  %v5490_v23 = vpop.f32.mrb[139].mxu1  ;;  %v7278_v1 = vld [vmem:[%s6381_s15 + $0x48] sm:$0xff]  }
 0x204   : > { %v7268_v12 = vadd.f32 %v2064_v43, %v1786_v25  ;;  %v1788_v26 = vadd.f32 %v1684_v28, %v6883_v48 }
 0x205   : > { %v2066_v40 = vsel %vm2059_vm5, %v2063_v34, %v2065_v50  ;;  %5766 = vmatmul.mubr.msk.bf16.gmra.mrb[244].mxu0 %vm371_vm2, %v7257_v62  ;;  %v1686_v2 = vsel %vm1292_vm4, %v1683_v19, %v1685_v49  ;;  %5684 = vmatmul.mubr.msk.bf16.gmra.mrb[244].mxu1 %vm371_vm2, %v7278_v1 }
 0x206   : > { %v7275_v15 = vadd.f32 %v2066_v40, %v1787_v24  ;;  %5769 = vmatprep.mubr.msk.bf16.mxu0 %vm6277_vm1, %v9484_v33  ;;  %v1789_v42 = vadd.f32 %v1686_v2, %v6894_v44  ;;  %5687 = vmatprep.mubr.msk.bf16.mxu1 %vm6277_vm1, %v9484_v33 }
 0x208   : > { %9491 = vst [vmem:[#allocation9_spill] sm:$0xff] %v7275_v15  ;;  %v1882_v48 = vpop.f32.mrb[140].mxu0  ;;  %v1507_v25 = vpop.f32.mrb[140].mxu1 }
 0x209   : > { %v2067_v28 = vrot.slane %v1882_v48, 3  ;;  %v5575_v34 = vpop.f32.mrb[141].mxu0  ;;  %v1687_v19 = vrot.slane %v1507_v25, 2  ;;  %v5493_v24 = vpop.f32.mrb[141].mxu1 }
 0x20a   : > { %v1885_v41 = vpop.f32.mrb[142].mxu0  ;;  %v1510_v43 = vpop.f32.mrb[142].mxu1 }
 0x20b   : > { %v2068_v14 = vsel %vm2059_vm5, %v2065_v50, %v2067_v28  ;;  %v2069_v54 = vrot.slane %v1885_v41, 3  ;;  %v5576_v46 = vpop.f32.mrb[143].mxu0  ;;  %v1688_v23 = vsel %vm1292_vm4, %v1685_v49, %v1687_v19  ;;  %v1689_v44 = vrot.slane %v1510_v43, 2  ;;  %v5494_v2 = vpop.f32.mrb[143].mxu1  ;;  %v7299_v50 = vld [vmem:[%s6381_s15 + $0x50] sm:$0xff]  }
 0x20c   : > { %v7289_v40 = vadd.f32 %v2068_v14, %v1788_v26  ;;  %v1790_v15 = vadd.f32 %v1688_v23, %v6901_v56 }
 0x20d   : > { %v2070_v48 = vsel %vm2059_vm5, %v2067_v28, %v2069_v54  ;;  %5770 = vmatmul.mubr.msk.bf16.gmra.mrb[248].mxu0 %vm371_vm2, %v7278_v1  ;;  %v1690_v25 = vsel %vm1292_vm4, %v1687_v19, %v1689_v44  ;;  %5688 = vmatmul.mubr.msk.bf16.gmra.mrb[248].mxu1 %vm371_vm2, %v7299_v50 }
 0x20e   : > { %v7296_v34 = vadd.f32 %v2070_v48, %v1789_v42  ;;  %5773 = vmatprep.mubr.msk.bf16.mxu0 %vm6277_vm1, %v9484_v33  ;;  %v1791_v26 = vadd.f32 %v1690_v25, %v6912_v17  ;;  %5691 = vmatprep.mubr.msk.bf16.mxu1 %vm6277_vm1, %v9484_v33 }
 0x210   : > { %9492 = vst [vmem:[#allocation10_spill] sm:$0xff] %v7296_v34  ;;  %v1890_v56 = vpop.f32.mrb[144].mxu0  ;;  %v1515_v49 = vpop.f32.mrb[144].mxu1 }
 0x211   : > { %v2071_v28 = vrot.slane %v1890_v56, 3  ;;  %v5579_v24 = vpop.f32.mrb[145].mxu0  ;;  %v1691_v19 = vrot.slane %v1515_v49, 2  ;;  %v5497_v42 = vpop.f32.mrb[145].mxu1 }
 0x212   : > { %v1893_v41 = vpop.f32.mrb[146].mxu0  ;;  %v1518_v43 = vpop.f32.mrb[146].mxu1 }
 0x213   : > { %v2072_v14 = vsel %vm2059_vm5, %v2069_v54, %v2071_v28  ;;  %v2073_v46 = vrot.slane %v1893_v41, 3  ;;  %v5580_v23 = vpop.f32.mrb[147].mxu0  ;;  %v1692_v2 = vsel %vm1292_vm4, %v1689_v44, %v1691_v19  ;;  %v1693_v17 = vrot.slane %v1518_v43, 2  ;;  %v5498_v25 = vpop.f32.mrb[147].mxu1  ;;  %v7320_v54 = vld [vmem:[%s6381_s15 + $0x58] sm:$0xff]  }
 0x214   : > { %v7310_v48 = vadd.f32 %v2072_v14, %v1790_v15  ;;  %v1792_v34 = vadd.f32 %v1692_v2, %v6919_v0 }
 0x215   : > { %v2074_v56 = vsel %vm2059_vm5, %v2071_v28, %v2073_v46  ;;  %5774 = vmatmul.mubr.msk.bf16.gmra.mrb[252].mxu0 %vm371_vm2, %v7299_v50  ;;  %v1694_v49 = vsel %vm1292_vm4, %v1691_v19, %v1693_v17  ;;  %5692 = vmatmul.mubr.msk.bf16.gmra.mrb[252].mxu1 %vm371_vm2, %v7320_v54 }
 0x216   : > { %v7317_v24 = vadd.f32 %v2074_v56, %v1791_v26  ;;  %5777 = vmatprep.mubr.msk.bf16.mxu0 %vm6277_vm1, %v9484_v33  ;;  %v1793_v15 = vadd.f32 %v1694_v49, %v6930_v29  ;;  %5695 = vmatprep.mubr.msk.bf16.mxu1 %vm6277_vm1, %v9484_v33 }
 0x218   : > { %9493 = vst [vmem:[#allocation11_spill] sm:$0xff] %v7317_v24  ;;  %v1898_v0 = vpop.f32.mrb[148].mxu0  ;;  %v1523_v44 = vpop.f32.mrb[148].mxu1 }
 0x219   : > { %v2075_v28 = vrot.slane %v1898_v0, 3  ;;  %v5583_v42 = vpop.f32.mrb[149].mxu0  ;;  %v1695_v19 = vrot.slane %v1523_v44, 2  ;;  %v5501_v26 = vpop.f32.mrb[149].mxu1 }
 0x21a   : > { %v1901_v41 = vpop.f32.mrb[150].mxu0  ;;  %v1526_v43 = vpop.f32.mrb[150].mxu1 }
 0x21b   : > { %v2076_v14 = vsel %vm2059_vm5, %v2073_v46, %v2075_v28  ;;  %v2077_v23 = vrot.slane %v1901_v41, 3  ;;  %v5584_v2 = vpop.f32.mrb[151].mxu0  ;;  %v1696_v25 = vsel %vm1292_vm4, %v1693_v17, %v1695_v19  ;;  %v1697_v29 = vrot.slane %v1526_v43, 2  ;;  %v5502_v49 = vpop.f32.mrb[151].mxu1  ;;  %v7341_v46 = vld [vmem:[%s6381_s15 + $0x60] sm:$0xff]  }
 0x21c   : > { %v7331_v56 = vadd.f32 %v2076_v14, %v1792_v34  ;;  %v1794_v24 = vadd.f32 %v1696_v25, %v6937_v30 }
 0x21d   : > { %v2078_v0 = vsel %vm2059_vm5, %v2075_v28, %v2077_v23  ;;  %5778 = vmatmul.mubr.msk.bf16.gmra.mrb[0].mxu0 %vm371_vm2, %v7320_v54  ;;  %v1698_v44 = vsel %vm1292_vm4, %v1695_v19, %v1697_v29  ;;  %5696 = vmatmul.mubr.msk.bf16.gmra.mrb[0].mxu1 %vm371_vm2, %v7341_v46 }
 0x21e   : > { %v7338_v42 = vadd.f32 %v2078_v0, %v1793_v15  ;;  %5781 = vmatprep.mubr.msk.bf16.mxu0 %vm6277_vm1, %v9484_v33  ;;  %v1795_v34 = vadd.f32 %v1698_v44, %v6948_v21  ;;  %5699 = vmatprep.mubr.msk.bf16.mxu1 %vm6277_vm1, %v9484_v33 }
 0x220   : > { %9494 = vst [vmem:[#allocation12_spill] sm:$0xff] %v7338_v42  ;;  %v1906_v30 = vpop.f32.mrb[152].mxu0  ;;  %v1531_v17 = vpop.f32.mrb[152].mxu1 }
 0x221   : > { %v2079_v28 = vrot.slane %v1906_v30, 3  ;;  %v5587_v26 = vpop.f32.mrb[153].mxu0  ;;  %v1699_v19 = vrot.slane %v1531_v17, 2  ;;  %v5505_v15 = vpop.f32.mrb[153].mxu1 }
 0x222   : > { %v1909_v41 = vpop.f32.mrb[154].mxu0  ;;  %v1534_v43 = vpop.f32.mrb[154].mxu1 }
 0x223   : > { %v2080_v14 = vsel %vm2059_vm5, %v2077_v23, %v2079_v28  ;;  %v2081_v2 = vrot.slane %v1909_v41, 3  ;;  %v5588_v25 = vpop.f32.mrb[155].mxu0  ;;  %v1700_v49 = vsel %vm1292_vm4, %v1697_v29, %v1699_v19  ;;  %v1701_v21 = vrot.slane %v1534_v43, 2  ;;  %v5506_v44 = vpop.f32.mrb[155].mxu1  ;;  %v7362_v23 = vld [vmem:[%s6381_s15 + $0x68] sm:$0xff]  }
 0x224   : > { %v7352_v0 = vadd.f32 %v2080_v14, %v1794_v24  ;;  %v1796_v42 = vadd.f32 %v1700_v49, %v6955_v47 }
 0x225   : > { %v2082_v30 = vsel %vm2059_vm5, %v2079_v28, %v2081_v2  ;;  %5782 = vmatmul.mubr.msk.bf16.gmra.mrb[4].mxu0 %vm371_vm2, %v7341_v46  ;;  %v1702_v17 = vsel %vm1292_vm4, %v1699_v19, %v1701_v21  ;;  %5700 = vmatmul.mubr.msk.bf16.gmra.mrb[4].mxu1 %vm371_vm2, %v7362_v23 }
 0x226   : > { %v7359_v26 = vadd.f32 %v2082_v30, %v1795_v34  ;;  %5785 = vmatprep.mubr.msk.bf16.mxu0 %vm6277_vm1, %v9484_v33  ;;  %v1797_v24 = vadd.f32 %v1702_v17, %v6966_v63  ;;  %5703 = vmatprep.mubr.msk.bf16.mxu1 %vm6277_vm1, %v9484_v33 }
 0x228   : > { %9495 = vst [vmem:[#allocation13_spill] sm:$0xff] %v7359_v26  ;;  %v1914_v47 = vpop.f32.mrb[156].mxu0  ;;  %v1539_v29 = vpop.f32.mrb[156].mxu1 }
 0x229   : > { %v2083_v28 = vrot.slane %v1914_v47, 3  ;;  %v5591_v15 = vpop.f32.mrb[157].mxu0  ;;  %v1703_v19 = vrot.slane %v1539_v29, 2  ;;  %v5509_v34 = vpop.f32.mrb[157].mxu1 }
 0x22a   : > { %v1917_v41 = vpop.f32.mrb[158].mxu0  ;;  %v1542_v43 = vpop.f32.mrb[158].mxu1 }
 0x22b   : > { %v2084_v14 = vsel %vm2059_vm5, %v2081_v2, %v2083_v28  ;;  %v2085_v25 = vrot.slane %v1917_v41, 3  ;;  %v5592_v49 = vpop.f32.mrb[159].mxu0  ;;  %v1704_v44 = vsel %vm1292_vm4, %v1701_v21, %v1703_v19  ;;  %v1705_v63 = vrot.slane %v1542_v43, 2  ;;  %v5510_v17 = vpop.f32.mrb[159].mxu1  ;;  %v7383_v2 = vld [vmem:[%s6381_s15 + $0x70] sm:$0xff]  }
 0x22c   : > { %v7373_v30 = vadd.f32 %v2084_v14, %v1796_v42  ;;  %v1798_v26 = vadd.f32 %v1704_v44, %v6973_v61 }
 0x22d   : > { %v2086_v47 = vsel %vm2059_vm5, %v2083_v28, %v2085_v25  ;;  %5786 = vmatmul.mubr.msk.bf16.gmra.mrb[8].mxu0 %vm371_vm2, %v7362_v23  ;;  %v1706_v29 = vsel %vm1292_vm4, %v1703_v19, %v1705_v63  ;;  %5704 = vmatmul.mubr.msk.bf16.gmra.mrb[8].mxu1 %vm371_vm2, %v7383_v2 }
 0x22e   : > { %v7380_v15 = vadd.f32 %v2086_v47, %v1797_v24  ;;  %5789 = vmatprep.mubr.msk.bf16.mxu0 %vm6277_vm1, %v9484_v33  ;;  %v1799_v42 = vadd.f32 %v1706_v29, %v6984_v27  ;;  %5707 = vmatprep.mubr.msk.bf16.mxu1 %vm6277_vm1, %v9484_v33 }
 0x230   : > { %9496 = vst [vmem:[#allocation14_spill] sm:$0xff] %v7380_v15  ;;  %v1922_v61 = vpop.f32.mrb[160].mxu0  ;;  %v1547_v21 = vpop.f32.mrb[160].mxu1 }
 0x231   : > { %v2087_v28 = vrot.slane %v1922_v61, 3  ;;  %v5595_v34 = vpop.f32.mrb[161].mxu0  ;;  %v1707_v19 = vrot.slane %v1547_v21, 2  ;;  %v5513_v24 = vpop.f32.mrb[161].mxu1 }
 0x232   : > { %v1925_v41 = vpop.f32.mrb[162].mxu0  ;;  %v1550_v43 = vpop.f32.mrb[162].mxu1 }
 0x233   : > { %v2088_v14 = vsel %vm2059_vm5, %v2085_v25, %v2087_v28  ;;  %v2089_v49 = vrot.slane %v1925_v41, 3  ;;  %v5596_v44 = vpop.f32.mrb[163].mxu0  ;;  %v1708_v17 = vsel %vm1292_vm4, %v1705_v63, %v1707_v19  ;;  %v1709_v27 = vrot.slane %v1550_v43, 2  ;;  %v5514_v29 = vpop.f32.mrb[163].mxu1  ;;  %v7404_v25 = vld [vmem:[%s6381_s15 + $0x78] sm:$0xff]  }
 0x234   : > { %v7394_v47 = vadd.f32 %v2088_v14, %v1798_v26  ;;  %v1800_v15 = vadd.f32 %v1708_v17, %v6991_v9  ;;  %9498 = vst [vmem:[#allocation16_spill] sm:$0xff] %v7404_v25 }
 0x235   : > { %v2090_v61 = vsel %vm2059_vm5, %v2087_v28, %v2089_v49  ;;  %5790 = vmatmul.mubr.msk.bf16.gmra.mrb[12].mxu0 %vm371_vm2, %v7383_v2  ;;  %v1710_v21 = vsel %vm1292_vm4, %v1707_v19, %v1709_v27  ;;  %5708 = vmatmul.mubr.msk.bf16.gmra.mrb[12].mxu1 %vm371_vm2, %v7404_v25 }
 0x236   : > { %v7401_v34 = vadd.f32 %v2090_v61, %v1799_v42  ;;  %5793 = vmatprep.mubr.msk.bf16.mxu0 %vm6277_vm1, %v9484_v33  ;;  %v1801_v26 = vadd.f32 %v1710_v21, %v7002_v35  ;;  %5711 = vmatprep.mubr.msk.bf16.mxu1 %vm6277_vm1, %v9484_v33 }
 0x238   : > { %9497 = vst [vmem:[#allocation15_spill] sm:$0xff] %v7401_v34  ;;  %v1930_v9 = vpop.f32.mrb[164].mxu0  ;;  %v1555_v63 = vpop.f32.mrb[164].mxu1 }
 0x239   : > { %v2091_v28 = vrot.slane %v1930_v9, 3  ;;  %v5599_v24 = vpop.f32.mrb[165].mxu0  ;;  %v1711_v19 = vrot.slane %v1555_v63, 2  ;;  %v5517_v42 = vpop.f32.mrb[165].mxu1 }
 0x23a   : > { %v1933_v41 = vpop.f32.mrb[166].mxu0  ;;  %v1558_v43 = vpop.f32.mrb[166].mxu1 }
 0x23b   : > { %v2092_v14 = vsel %vm2059_vm5, %v2089_v49, %v2091_v28  ;;  %v2093_v44 = vrot.slane %v1933_v41, 3  ;;  %v5600_v17 = vpop.f32.mrb[167].mxu0  ;;  %v1712_v29 = vsel %vm1292_vm4, %v1709_v27, %v1711_v19  ;;  %v1713_v35 = vrot.slane %v1558_v43, 2  ;;  %v5518_v21 = vpop.f32.mrb[167].mxu1  ;;  %v7425_v49 = vld [vmem:[%s6381_s15 + $0x80] sm:$0xff]  }
 0x23c   : > { %v7415_v61 = vadd.f32 %v2092_v14, %v1800_v15  ;;  %v1802_v34 = vadd.f32 %v1712_v29, %v7009_v11 }
 0x23d   : > { %v2094_v9 = vsel %vm2059_vm5, %v2091_v28, %v2093_v44  ;;  %5794 = vmatmul.mubr.msk.bf16.gmra.mrb[16].mxu0 %vm371_vm2, %v7404_v25  ;;  %v1714_v63 = vsel %vm1292_vm4, %v1711_v19, %v1713_v35  ;;  %5712 = vmatmul.mubr.msk.bf16.gmra.mrb[16].mxu1 %vm371_vm2, %v7425_v49 }
 0x23e   : > { %v7422_v24 = vadd.f32 %v2094_v9, %v1801_v26  ;;  %5797 = vmatprep.mubr.msk.bf16.mxu0 %vm6277_vm1, %v9484_v33  ;;  %v1803_v15 = vadd.f32 %v1714_v63, %v7020_v8  ;;  %5715 = vmatprep.mubr.msk.bf16.mxu1 %vm6277_vm1, %v9484_v33 }
 0x240   : > { %9499 = vst [vmem:[#allocation17_spill] sm:$0xff] %v7422_v24  ;;  %v1938_v11 = vpop.f32.mrb[168].mxu0  ;;  %v1563_v27 = vpop.f32.mrb[168].mxu1 }
 0x241   : > { %v2095_v28 = vrot.slane %v1938_v11, 3  ;;  %v5603_v42 = vpop.f32.mrb[169].mxu0  ;;  %v1715_v19 = vrot.slane %v1563_v27, 2  ;;  %v5521_v26 = vpop.f32.mrb[169].mxu1 }
 0x242   : > { %v1941_v41 = vpop.f32.mrb[170].mxu0  ;;  %v1566_v43 = vpop.f32.mrb[170].mxu1 }
 0x243   : > { %v2096_v14 = vsel %vm2059_vm5, %v2093_v44, %v2095_v28  ;;  %v2097_v17 = vrot.slane %v1941_v41, 3  ;;  %v5604_v29 = vpop.f32.mrb[171].mxu0  ;;  %v1716_v21 = vsel %vm1292_vm4, %v1713_v35, %v1715_v19  ;;  %v1717_v8 = vrot.slane %v1566_v43, 2  ;;  %v5522_v63 = vpop.f32.mrb[171].mxu1 }
 0x244   : > { %v7436_v9 = vadd.f32 %v2096_v14, %v1802_v34  ;;  %v1804_v24 = vadd.f32 %v1716_v21, %v7027_v13 }
 0x245   : > { %v2098_v25 = vsel %vm2059_vm5, %v2095_v28, %v2097_v17  ;;  %5798 = vmatmul.mubr.msk.bf16.gmra.mrb[20].mxu0 %vm371_vm2, %v7425_v49  ;;  %v1718_v11 = vsel %vm1292_vm4, %v1715_v19, %v1717_v8  ;;  %5716 = vmatmul.mubr.msk.bf16.gmra.mrb[20].mxu1 %vm371_vm2, %v7050_v16 }
 0x246   : > { %v7443_v27 = vadd.f32 %v2098_v25, %v1803_v15  ;;  %5801 = vmatprep.mubr.msk.bf16.mxu0 %vm6277_vm1, %v9484_v33  ;;  %v1805_v34 = vadd.f32 %v1718_v11, %v7038_v55  ;;  %5719 = vmatprep.mubr.msk.bf16.mxu1 %vm6277_vm1, %v9484_v33 }
 0x248   : > { %v1946_v13 = vpop.f32.mrb[172].mxu0  ;;  %v1571_v44 = vpop.f32.mrb[172].mxu1 }
 0x249   : > { %v2099_v35 = vrot.slane %v1946_v13, 3  ;;  %v5607_v28 = vpop.f32.mrb[173].mxu0  ;;  %v1719_v42 = vrot.slane %v1571_v44, 2  ;;  %v5525_v26 = vpop.f32.mrb[173].mxu1 }
 0x24a   : > { %v1949_v19 = vpop.f32.mrb[174].mxu0  ;;  %v1574_v15 = vpop.f32.mrb[174].mxu1 }
 0x24b   : > { %v2100_v25 = vsel %vm2059_vm5, %v2097_v17, %v2099_v35  ;;  %v2101_v41 = vrot.slane %v1949_v19, 3  ;;  %v5608_v14 = vpop.f32.mrb[175].mxu0  ;;  %v1720_v43 = vsel %vm1292_vm4, %v1717_v8, %v1719_v42  ;;  %v1721_v55 = vrot.slane %v1574_v15, 2  ;;  %v5526_v21 = vpop.f32.mrb[175].mxu1 }
 0x24c   : > { %v7454_v29 = vadd.f32 %v2100_v25, %v1804_v24  ;;  %v1806_v63 = vadd.f32 %v1720_v43, %v7045_v5 }
 0x24d   : > { %v2102_v11 = vsel %vm2059_vm5, %v2099_v35, %v2101_v41  ;;  %5802 = vmatmul.mubr.msk.bf16.gmra.mrb[24].mxu0 %vm371_vm2, %v7050_v16  ;;  %v1722_v13 = vsel %vm1292_vm4, %v1719_v42, %v1721_v55  ;;  %5720 = vmatmul.mubr.msk.bf16.gmra.mrb[24].mxu1 %vm371_vm2, %v7056_v36 }
 0x24e   : > { %v7461_v44 = vadd.f32 %v2102_v11, %v1805_v34  ;;  %5805 = vmatprep.mubr.msk.bf16.mxu0 %vm6277_vm1, %v9484_v33  ;;  %v1807_v24 = vadd.f32 %v1722_v13, %v7062_v32  ;;  %5723 = vmatprep.mubr.msk.bf16.mxu1 %vm6277_vm1, %v9484_v33 }
 0x250   : > { %v1954_v5 = vpop.f32.mrb[176].mxu0  ;;  %v1579_v17 = vpop.f32.mrb[176].mxu1 }
 0x251   : > { %v2103_v8 = vrot.slane %v1954_v5, 3  ;;  %v5611_v35 = vpop.f32.mrb[177].mxu0  ;;  %v1723_v16 = vrot.slane %v1579_v17, 2  ;;  %v5529_v28 = vpop.f32.mrb[177].mxu1 }
 0x252   : > { %v1957_v42 = vpop.f32.mrb[178].mxu0  ;;  %v1582_v26 = vpop.f32.mrb[178].mxu1 }
 0x253   : > { %v2104_v34 = vsel %vm2059_vm5, %v2101_v41, %v2103_v8  ;;  %v2105_v19 = vrot.slane %v1957_v42, 3  ;;  %v5612_v25 = vpop.f32.mrb[179].mxu0  ;;  %v1724_v15 = vsel %vm1292_vm4, %v1721_v55, %v1723_v16  ;;  %v1725_v32 = vrot.slane %v1582_v26, 2  ;;  %v5530_v43 = vpop.f32.mrb[179].mxu1 }
 0x254   : > { %v7472_v14 = vadd.f32 %v2104_v34, %v1806_v63  ;;  %v1808_v21 = vadd.f32 %v1724_v15, %v7069_v18 }
 0x255   : > { %v2106_v11 = vsel %vm2059_vm5, %v2103_v8, %v2105_v19  ;;  %5806 = vmatmul.mubr.msk.bf16.gmra.mrb[28].mxu0 %vm371_vm2, %v7056_v36  ;;  %v1726_v13 = vsel %vm1292_vm4, %v1723_v16, %v1725_v32  ;;  %5724 = vmatmul.mubr.msk.bf16.gmra.mrb[28].mxu1 %vm371_vm2, %v7077_v20 }
 0x256   : > { %v7479_v5 = vadd.f32 %v2106_v11, %v1807_v24  ;;  %5809 = vmatprep.mubr.msk.bf16.mxu0 %vm6277_vm1, %v9484_v33  ;;  %v1809_v41 = vadd.f32 %v1726_v13, %v7083_v57  ;;  %5727 = vmatprep.mubr.msk.bf16.mxu1 %vm6277_vm1, %v9484_v33 }
 0x258   : > { %v1962_v18 = vpop.f32.mrb[180].mxu0  ;;  %v1587_v55 = vpop.f32.mrb[180].mxu1 }
 0x259   : > { %v2107_v63 = vrot.slane %v1962_v18, 3  ;;  %v5615_v17 = vpop.f32.mrb[181].mxu0  ;;  %v1727_v36 = vrot.slane %v1587_v55, 2  ;;  %v5533_v8 = vpop.f32.mrb[181].mxu1 }
 0x25a   : > { %v1965_v35 = vpop.f32.mrb[182].mxu0  ;;  %v1590_v16 = vpop.f32.mrb[182].mxu1 }
 0x25b   : > { %v2108_v24 = vsel %vm2059_vm5, %v2105_v19, %v2107_v63  ;;  %v2109_v28 = vrot.slane %v1965_v35, 3  ;;  %v5616_v42 = vpop.f32.mrb[183].mxu0  ;;  %v1728_v34 = vsel %vm1292_vm4, %v1725_v32, %v1727_v36  ;;  %v1729_v57 = vrot.slane %v1590_v16, 2  ;;  %v5534_v25 = vpop.f32.mrb[183].mxu1 }
 0x25c   : > { %v7490_v26 = vadd.f32 %v2108_v24, %v1808_v21  ;;  %v1810_v15 = vadd.f32 %v1728_v34, %v7090_v6 }
 0x25d   : > { %v2110_v43 = vsel %vm2059_vm5, %v2107_v63, %v2109_v28  ;;  %5810 = vmatmul.mubr.msk.bf16.gmra.mrb[32].mxu0 %vm371_vm2, %v7077_v20  ;;  %v1730_v11 = vsel %vm1292_vm4, %v1727_v36, %v1729_v57  ;;  %5728 = vmatmul.mubr.msk.bf16.gmra.mrb[32].mxu1 %vm371_vm2, %v7098_v59 }
 0x25e   : > { %v7497_v13 = vadd.f32 %v2110_v43, %v1809_v41  ;;  %5813 = vmatprep.mubr.msk.bf16.mxu0 %vm6277_vm1, %v9484_v33  ;;  %v1811_v19 = vadd.f32 %v1730_v11, %v7104_v39  ;;  %5819 = vmatprep.mubr.msk.bf16.mxu1 %vm6277_vm1, %v9484_v33 }
 0x260   : > { %v1970_v6 = vpop.f32.mrb[184].mxu0  ;;  %v1595_v32 = vpop.f32.mrb[184].mxu1 }
 0x261   : > { %v2111_v21 = vrot.slane %v1970_v6, 3  ;;  %v5619_v18 = vpop.f32.mrb[185].mxu0  ;;  %v1731_v20 = vrot.slane %v1595_v32, 2  ;;  %v5537_v55 = vpop.f32.mrb[185].mxu1 }
 0x262   : > { %v1973_v63 = vpop.f32.mrb[186].mxu0  ;;  %v1598_v17 = vpop.f32.mrb[186].mxu1 }
 0x263   : > { %v2112_v41 = vsel %vm2059_vm5, %v2109_v28, %v2111_v21  ;;  %v2113_v36 = vrot.slane %v1973_v63, 3  ;;  %v5620_v8 = vpop.f32.mrb[187].mxu0  ;;  %v1732_v35 = vsel %vm1292_vm4, %v1729_v57, %v1731_v20  ;;  %v1733_v39 = vrot.slane %v1598_v17, 2  ;;  %v5538_v16 = vpop.f32.mrb[187].mxu1 }
 0x264   : > { %v7508_v24 = vadd.f32 %v2112_v41, %v1810_v15  ;;  %v1812_v42 = vadd.f32 %v1732_v35, %v7115_v22 }
 0x265   : > { %v2114_v34 = vsel %vm2059_vm5, %v2111_v21, %v2113_v36  ;;  %5814 = vmatmul.mubr.msk.bf16.gmra.mrb[36].mxu0 %vm371_vm2, %v7098_v59  ;;  %v1734_v25 = vsel %vm1292_vm4, %v1731_v20, %v1733_v39  ;;  %5820 = vmatmul.mubr.msk.bf16.vlgmr.msra.gmra.mrb[36].mxu1 %vm371_vm2, %v7123_v38 }
 0x266   : > { %v7515_v43 = vadd.f32 %v2114_v34, %v1811_v19  ;;  %5905 = vmatprep.mubr.msk.bf16.mxu0 %vm6277_vm1, %v9484_v33  ;;  %v1813_v28 = vadd.f32 %v1734_v25, %v7129_v7  ;;  %5823 = vmatprep.mubr.msk.bf16.mxu1 %vm6277_vm1, %v9484_v33 }
 0x268   : > { %v1978_v22 = vpop.f32.mrb[188].mxu0  ;;  %v1603_v57 = vpop.f32.mrb[188].mxu1 }
 0x269   : > { %v2115_v15 = vrot.slane %v1978_v22, 3  ;;  %v5623_v11 = vpop.f32.mrb[189].mxu0  ;;  %v1735_v59 = vrot.slane %v1603_v57, 2  ;;  %v5541_v6 = vpop.f32.mrb[189].mxu1 }
 0x26a   : > { %v1981_v32 = vpop.f32.mrb[190].mxu0  ;;  %v1606_v21 = vpop.f32.mrb[190].mxu1 }
 0x26b   : > { %v2116_v19 = vsel %vm2059_vm5, %v2113_v36, %v2115_v15  ;;  %v2117_v18 = vrot.slane %v1981_v32, 3  ;;  %v5624_v20 = vpop.f32.mrb[191].mxu0  ;;  %v1736_v55 = vsel %vm1292_vm4, %v1733_v39, %v1735_v59  ;;  %v1737_v7 = vrot.slane %v1606_v21, 2  ;;  %v5542_v41 = vpop.f32.mrb[191].mxu1 }
 0x26c   : > { %v7526_v63 = vadd.f32 %v2116_v19, %v1812_v42  ;;  %v1814_v17 = vadd.f32 %v1736_v55, %v7140_v58 }
 0x26d   : > { %v2118_v8 = vsel %vm2059_vm5, %v2115_v15, %v2117_v18  ;;  %5906 = vmatmul.mubr.msk.bf16.vlgmr.msra.gmra.mrb[40].mxu0 %vm371_vm2, %v7123_v38  ;;  %v1738_v35 = vsel %vm1292_vm4, %v1735_v59, %v1737_v7  ;;  %5824 = vmatmul.mubr.msk.bf16.gmra.mrb[40].mxu1 %vm371_vm2, %v7148_v10 }
 0x26e   : > { %v7533_v16 = vadd.f32 %v2118_v8, %v1813_v28  ;;  %5909 = vmatprep.mubr.msk.bf16.mxu0 %vm6277_vm1, %v9484_v33  ;;  %v1815_v36 = vadd.f32 %v1738_v35, %v7152_v60  ;;  %5827 = vmatprep.mubr.msk.bf16.mxu1 %vm6277_vm1, %v9484_v33 }
 0x270   : > { %v1986_v58 = vpop.f32.mrb[192].mxu0  ;;  %v1611_v39 = vpop.f32.mrb[192].mxu1 }
 0x271   : > { %v2119_v42 = vrot.slane %v1986_v58, 3  ;;  %v5627_v34 = vpop.f32.mrb[193].mxu0  ;;  %v1739_v38 = vrot.slane %v1611_v39, 2  ;;  %v5545_v25 = vpop.f32.mrb[193].mxu1 }
 0x272   : > { %v1989_v22 = vpop.f32.mrb[194].mxu0  ;;  %v1614_v57 = vpop.f32.mrb[194].mxu1 }
 0x273   : > { %v2120_v28 = vsel %vm2059_vm5, %v2117_v18, %v2119_v42  ;;  %v2121_v15 = vrot.slane %v1989_v22, 3  ;;  %v5628_v11 = vpop.f32.mrb[195].mxu0  ;;  %v1740_v59 = vsel %vm1292_vm4, %v1737_v7, %v1739_v38  ;;  %v1741_v60 = vrot.slane %v1614_v57, 2  ;;  %v5546_v32 = vpop.f32.mrb[195].mxu1 }
 0x274   : > { %v7544_v6 = vadd.f32 %v2120_v28, %v1814_v17  ;;  %v1816_v19 = vadd.f32 %v1740_v59, %v7161_v31 }
 0x275   : > { %v2122_v21 = vsel %vm2059_vm5, %v2119_v42, %v2121_v15  ;;  %5910 = vmatmul.mubr.msk.bf16.gmra.mrb[44].mxu0 %vm371_vm2, %v7148_v10  ;;  %v1742_v20 = vsel %vm1292_vm4, %v1739_v38, %v1741_v60  ;;  %5828 = vmatmul.mubr.msk.bf16.gmra.mrb[44].mxu1 %vm371_vm2, %v7169_v53 }
 0x276   : > { %v7551_v55 = vadd.f32 %v2122_v21, %v1815_v36  ;;  %5913 = vmatprep.mubr.msk.bf16.mxu0 %vm6277_vm1, %v9484_v33  ;;  %v1817_v18 = vadd.f32 %v1742_v20, %v7175_v3  ;;  %5831 = vmatprep.mubr.msk.bf16.mxu1 %vm6277_vm1, %v9484_v33 }
 0x278   : > { %v1994_v31 = vpop.f32.mrb[196].mxu0  ;;  %v1619_v7 = vpop.f32.mrb[196].mxu1 }
 0x279   : > { %v2123_v41 = vrot.slane %v1994_v31, 3  ;;  %v5631_v17 = vpop.f32.mrb[197].mxu0  ;;  %v1743_v10 = vrot.slane %v1619_v7, 2  ;;  %v5549_v8 = vpop.f32.mrb[197].mxu1 }
 0x27a   : > { %v1997_v35 = vpop.f32.mrb[198].mxu0  ;;  %v1622_v58 = vpop.f32.mrb[198].mxu1 }
 0x27b   : > { %v2124_v36 = vsel %vm2059_vm5, %v2121_v15, %v2123_v41  ;;  %v2125_v39 = vrot.slane %v1997_v35, 3  ;;  %v5632_v42 = vpop.f32.mrb[199].mxu0  ;;  %v1744_v34 = vsel %vm1292_vm4, %v1741_v60, %v1743_v10  ;;  %v1745_v3 = vrot.slane %v1622_v58, 2  ;;  %v5550_v25 = vpop.f32.mrb[199].mxu1 }
 0x27c   : > { %v7562_v38 = vadd.f32 %v2124_v36, %v1816_v19  ;;  %v1818_v22 = vadd.f32 %v1744_v34, %v7182_v52 }
 0x27d   : > { %v2126_v28 = vsel %vm2059_vm5, %v2123_v41, %v2125_v39  ;;  %5914 = vmatmul.mubr.msk.bf16.gmra.mrb[48].mxu0 %vm371_vm2, %v7169_v53  ;;  %v1746_v57 = vsel %vm1292_vm4, %v1743_v10, %v1745_v3  ;;  %5832 = vmatmul.mubr.msk.bf16.gmra.mrb[48].mxu1 %vm371_vm2, %v7189_v51 }
 0x27e   : > { %v7569_v11 = vadd.f32 %v2126_v28, %v1817_v18  ;;  %5917 = vmatprep.mubr.msk.bf16.mxu0 %vm6277_vm1, %v9484_v33  ;;  %v1819_v15 = vadd.f32 %v1746_v57, %v7195_v4  ;;  %5835 = vmatprep.mubr.msk.bf16.mxu1 %vm6277_vm1, %v9484_v33  ;;  %v9500_v57 = vld [vmem:[#allocation5_spill] sm:$0xff] }
 0x280   : > { %v2002_v52 = vpop.f32.mrb[200].mxu0  ;;  %v1627_v59 = vpop.f32.mrb[200].mxu1 }
 0x281   : > { %v2127_v60 = vrot.slane %v2002_v52, 3  ;;  %v5635_v32 = vpop.f32.mrb[201].mxu0  ;;  %v1747_v53 = vrot.slane %v1627_v59, 2  ;;  %v5553_v21 = vpop.f32.mrb[201].mxu1 }
 0x282   : > { %v2005_v19 = vpop.f32.mrb[202].mxu0  ;;  %v1630_v7 = vpop.f32.mrb[202].mxu1 }
 0x283   : > { %v2128_v20 = vsel %vm2059_vm5, %v2125_v39, %v2127_v60  ;;  %v2129_v18 = vrot.slane %v2005_v19, 3  ;;  %v5636_v31 = vpop.f32.mrb[203].mxu0  ;;  %v1748_v41 = vsel %vm1292_vm4, %v1745_v3, %v1747_v53  ;;  %v5554_v4 = vpop.f32.mrb[203].mxu1 }
 0x284   : > { %v7580_v17 = vadd.f32 %v2128_v20, %v1818_v22  ;;  %v1820_v10 = vadd.f32 %v1748_v41, %v7200_v37 }
 0x285   : > { %v2130_v8 = vsel %vm2059_vm5, %v2127_v60, %v2129_v18  ;;  %5918 = vmatmul.mubr.msk.bf16.gmra.mrb[52].mxu0 %vm371_vm2, %v7189_v51  ;;  %5836 = vmatmul.mubr.msk.bf16.gmra.mrb[52].mxu1 %vm371_vm2, %v7205_v45 }
 0x286   : > { %v7586_v35 = vadd.f32 %v2130_v8, %v1819_v15  ;;  %5921 = vmatprep.mubr.msk.bf16.mxu0 %vm6277_vm1, %v9484_v33  ;;  %5839 = vmatprep.mubr.msk.bf16.mxu1 %vm6277_vm1, %v9484_v33 }
 0x288   : > { %v2010_v36 = vpop.f32.mrb[204].mxu0  ;;  %v1634_v37 = vpop.f32.mrb[204].mxu1 }
 0x289   : > { %v2131_v58 = vrot.slane %v2010_v36, 3  ;;  %v5639_v39 = vpop.f32.mrb[205].mxu0  ;;  %v5557_v34 = vpop.f32.mrb[205].mxu1  ;;  %v9502_v37 = vld [vmem:[#allocation8_spill] sm:$0xff] }
 0x28a   : > { %v2013_v42 = vpop.f32.mrb[206].mxu0  ;;  %v1636_v25 = vpop.f32.mrb[206].mxu1 }
 0x28b   : > { %v2132_v3 = vsel %vm2059_vm5, %v2129_v18, %v2131_v58  ;;  %v5640_v51 = vpop.f32.mrb[207].mxu0  ;;  %v5558_v28 = vpop.f32.mrb[207].mxu1  ;;  %v9503_v42 = vld [vmem:[#allocation6_spill] sm:$0xff] }
 0x28c   : > { %v7595_v22 = vadd.f32 %v2132_v3, %v1820_v10 }
 0x28d   : > { %5922 = vmatmul.mubr.msk.bf16.gmra.mrb[56].mxu0 %vm371_vm2, %v7205_v45  ;;  %5840 = vmatmul.mubr.msk.bf16.gmra.mrb[56].mxu1 %vm371_vm2, %v9500_v57  ;;  %v9501_v45 = vld [vmem:[#allocation7_spill] sm:$0xff] }
 0x28e   : > { %5925 = vmatprep.mubr.msk.bf16.mxu0 %vm6277_vm1, %v9484_v33  ;;  %5843 = vmatprep.mubr.msk.bf16.mxu1 %vm6277_vm1, %v9484_v33 }
 0x290   : > { %v2017_v15 = vpop.f32.mrb[208].mxu0  ;;  %v2244_v59 = vpop.f32.mrb[208].mxu1 }
 0x291   : > { %v5643_v52 = vpop.f32.mrb[209].mxu0  ;;  %v5649_v32 = vpop.f32.mrb[209].mxu1 }
 0x292   : > { %v2019_v60 = vpop.f32.mrb[210].mxu0  ;;  %v2246_v19 = vpop.f32.mrb[210].mxu1 }
 0x293   : > { %v5644_v53 = vpop.f32.mrb[211].mxu0  ;;  %v5650_v21 = vpop.f32.mrb[211].mxu1 }
 0x295   : > { %5926 = vmatmul.mubr.msk.bf16.gmra.mrb[60].mxu0 %vm371_vm2, %v9500_v57  ;;  %5844 = vmatmul.mubr.msk.bf16.gmra.mrb[60].mxu1 %vm371_vm2, %v9501_v45 }
 0x296   : > { %5929 = vmatprep.mubr.msk.bf16.mxu0 %vm6277_vm1, %v9484_v33  ;;  %5847 = vmatprep.mubr.msk.bf16.mxu1 %vm6277_vm1, %v9484_v33 }
 0x298   : > { %v2628_v20 = vpop.f32.mrb[212].mxu0  ;;  %v2250_v18 = vpop.f32.mrb[212].mxu1 }
 0x299   : > { %v5735_v31 = vpop.f32.mrb[213].mxu0  ;;  %v2444_v7 = vrot.slane %v2250_v18, 4  ;;  %v5653_v41 = vpop.f32.mrb[213].mxu1 }
 0x29a   : > { %v2630_v4 = vpop.f32.mrb[214].mxu0  ;;  %v2253_v10 = vpop.f32.mrb[214].mxu1 }
 0x29b   : > { %v5736_v8 = vpop.f32.mrb[215].mxu0  ;;  %v2445_v36 = vrot.slane %v2253_v10, 4  ;;  %v5654_v58 = vpop.f32.mrb[215].mxu1 }
 0x29d   : > { %5930 = vmatmul.mubr.msk.bf16.gmra.mrb[64].mxu0 %vm371_vm2, %v9501_v45  ;;  %v2446_v39 = vsel %vm2443_vm6, %v2444_v7, %v2445_v36  ;;  %5848 = vmatmul.mubr.msk.bf16.gmra.mrb[64].mxu1 %vm371_vm2, %v9502_v37  ;;  %v9504_v45 = vld [vmem:[#allocation9_spill] sm:$0xff] }
 0x29e   : > { %5933 = vmatprep.mubr.msk.bf16.mxu0 %vm6277_vm1, %v9484_v33  ;;  %v2553_v34 = vadd.f32 %v2446_v39, %v9503_v42  ;;  %5851 = vmatprep.mubr.msk.bf16.mxu1 %vm6277_vm1, %v9484_v33 }
 0x2a0   : > { %v2634_v3 = vpop.f32.mrb[216].mxu0  ;;  %v2258_v51 = vpop.f32.mrb[216].mxu1 }
 0x2a1   : > { %v5739_v25 = vpop.f32.mrb[217].mxu0  ;;  %v2447_v28 = vrot.slane %v2258_v51, 4  ;;  %v5657_v57 = vpop.f32.mrb[217].mxu1 }
 0x2a2   : > { %v2636_v15 = vpop.f32.mrb[218].mxu0  ;;  %v2261_v52 = vpop.f32.mrb[218].mxu1  ;;  %v9505_v57 = vld [vmem:[#allocation10_spill] sm:$0xff] }
 0x2a3   : > { %v5740_v59 = vpop.f32.mrb[219].mxu0  ;;  %v2448_v60 = vsel %vm2443_vm6, %v2445_v36, %v2447_v28  ;;  %v2449_v32 = vrot.slane %v2261_v52, 4  ;;  %v5658_v53 = vpop.f32.mrb[219].mxu1 }
 0x2a4   : > { %v2554_v19 = vadd.f32 %v2448_v60, %v7268_v12 }
 0x2a5   : > { %5934 = vmatmul.mubr.msk.bf16.gmra.mrb[68].mxu0 %vm371_vm2, %v9502_v37  ;;  %v2450_v21 = vsel %vm2443_vm6, %v2447_v28, %v2449_v32  ;;  %5852 = vmatmul.mubr.msk.bf16.gmra.mrb[68].mxu1 %vm371_vm2, %v7257_v62 }
 0x2a6   : > { %5937 = vmatprep.mubr.msk.bf16.mxu0 %vm6277_vm1, %v9484_v33  ;;  %v2555_v20 = vadd.f32 %v2450_v21, %v9504_v45  ;;  %5855 = vmatprep.mubr.msk.bf16.mxu1 %vm6277_vm1, %v9484_v33 }
 0x2a8   : > { %v2640_v18 = vpop.f32.mrb[220].mxu0  ;;  %v2266_v31 = vpop.f32.mrb[220].mxu1 }
 0x2a9   : > { %v5743_v7 = vpop.f32.mrb[221].mxu0  ;;  %v2451_v12 = vrot.slane %v2266_v31, 4  ;;  %v5661_v41 = vpop.f32.mrb[221].mxu1  ;;  %v2827_v10 = vrot.slane %v2640_v18, 4 }
 0x2aa   : > { %v2643_v4 = vpop.f32.mrb[222].mxu0  ;;  %v2269_v8 = vpop.f32.mrb[222].mxu1 }
 0x2ab   : > { %v2828_v36 = vrot.slane %v2643_v4, 4  ;;  %v5744_v58 = vpop.f32.mrb[223].mxu0  ;;  %v2452_v39 = vsel %vm2443_vm6, %v2449_v32, %v2451_v12  ;;  %v2453_v37 = vrot.slane %v2269_v8, 4  ;;  %v5662_v42 = vpop.f32.mrb[223].mxu1 }
 0x2ac   : > { %v2556_v3 = vadd.f32 %v2452_v39, %v7289_v40 }
 0x2ad   : > { %v2829_v51 = vsel %vm2443_vm6, %v2827_v10, %v2828_v36  ;;  %5938 = vmatmul.mubr.msk.bf16.gmra.mrb[72].mxu0 %vm371_vm2, %v7257_v62  ;;  %v2454_v25 = vsel %vm2443_vm6, %v2451_v12, %v2453_v37  ;;  %5856 = vmatmul.mubr.msk.bf16.gmra.mrb[72].mxu1 %vm371_vm2, %v7278_v1 }
 0x2ae   : > { %v7641_v28 = vadd.f32 %v2829_v51, %v2553_v34  ;;  %5941 = vmatprep.mubr.msk.bf16.mxu0 %vm6277_vm1, %v9484_v33  ;;  %v2557_v15 = vadd.f32 %v2454_v25, %v9505_v57  ;;  %5859 = vmatprep.mubr.msk.bf16.mxu1 %vm6277_vm1, %v9484_v33 }
 0x2b0   : > { %v2648_v40 = vpop.f32.mrb[224].mxu0  ;;  %v2274_v52 = vpop.f32.mrb[224].mxu1 }
 0x2b1   : > { %v2830_v59 = vrot.slane %v2648_v40, 4  ;;  %v5747_v60 = vpop.f32.mrb[225].mxu0  ;;  %v2455_v62 = vrot.slane %v2274_v52, 4  ;;  %v5665_v32 = vpop.f32.mrb[225].mxu1 }
 0x2b2   : > { %v2651_v53 = vpop.f32.mrb[226].mxu0  ;;  %v2277_v21 = vpop.f32.mrb[226].mxu1 }
 0x2b3   : > { %v2831_v34 = vsel %vm2443_vm6, %v2828_v36, %v2830_v59  ;;  %v2832_v45 = vrot.slane %v2651_v53, 4  ;;  %v5748_v18 = vpop.f32.mrb[227].mxu0  ;;  %v2456_v31 = vsel %vm2443_vm6, %v2453_v37, %v2455_v62  ;;  %v2457_v12 = vrot.slane %v2277_v21, 4  ;;  %v5666_v41 = vpop.f32.mrb[227].mxu1 }
 0x2b4   : > { %v7652_v7 = vadd.f32 %v2831_v34, %v2554_v19  ;;  %v2558_v4 = vadd.f32 %v2456_v31, %v7310_v48  ;;  %v9506_v19 = vld [vmem:[#allocation11_spill] sm:$0xff] }
 0x2b5   : > { %v2833_v10 = vsel %vm2443_vm6, %v2830_v59, %v2832_v45  ;;  %5942 = vmatmul.mubr.msk.bf16.gmra.mrb[76].mxu0 %vm371_vm2, %v7278_v1  ;;  %v2458_v8 = vsel %vm2443_vm6, %v2455_v62, %v2457_v12  ;;  %5860 = vmatmul.mubr.msk.bf16.gmra.mrb[76].mxu1 %vm371_vm2, %v7299_v50 }
 0x2b6   : > { %v7659_v58 = vadd.f32 %v2833_v10, %v2555_v20  ;;  %5945 = vmatprep.mubr.msk.bf16.mxu0 %vm6277_vm1, %v9484_v33  ;;  %v2559_v36 = vadd.f32 %v2458_v8, %v9506_v19  ;;  %5863 = vmatprep.mubr.msk.bf16.mxu1 %vm6277_vm1, %v9484_v33 }
 0x2b8   : > { %v2656_v48 = vpop.f32.mrb[228].mxu0  ;;  %v2282_v39 = vpop.f32.mrb[228].mxu1 }
 0x2b9   : > { %v2834_v37 = vrot.slane %v2656_v48, 4  ;;  %v5751_v42 = vpop.f32.mrb[229].mxu0  ;;  %v2459_v1 = vrot.slane %v2282_v39, 4  ;;  %v5669_v51 = vpop.f32.mrb[229].mxu1 }
 0x2ba   : > { %v2659_v25 = vpop.f32.mrb[230].mxu0  ;;  %v2285_v57 = vpop.f32.mrb[230].mxu1 }
 0x2bb   : > { %v2835_v20 = vsel %vm2443_vm6, %v2832_v45, %v2834_v37  ;;  %v2836_v40 = vrot.slane %v2659_v25, 4  ;;  %v5752_v52 = vpop.f32.mrb[231].mxu0  ;;  %v2460_v59 = vsel %vm2443_vm6, %v2457_v12, %v2459_v1  ;;  %v2461_v62 = vrot.slane %v2285_v57, 4  ;;  %v5670_v32 = vpop.f32.mrb[231].mxu1 }
 0x2bc   : > { %v7670_v60 = vadd.f32 %v2835_v20, %v2556_v3  ;;  %v2560_v53 = vadd.f32 %v2460_v59, %v7331_v56  ;;  %v9507_v3 = vld [vmem:[#allocation12_spill] sm:$0xff] }
 0x2bd   : > { %v2837_v34 = vsel %vm2443_vm6, %v2834_v37, %v2836_v40  ;;  %5946 = vmatmul.mubr.msk.bf16.gmra.mrb[80].mxu0 %vm371_vm2, %v7299_v50  ;;  %v2462_v21 = vsel %vm2443_vm6, %v2459_v1, %v2461_v62  ;;  %5864 = vmatmul.mubr.msk.bf16.gmra.mrb[80].mxu1 %vm371_vm2, %v7320_v54 }
 0x2be   : > { %v7677_v18 = vadd.f32 %v2837_v34, %v2557_v15  ;;  %5949 = vmatprep.mubr.msk.bf16.mxu0 %vm6277_vm1, %v9484_v33  ;;  %v2561_v45 = vadd.f32 %v2462_v21, %v9507_v3  ;;  %5867 = vmatprep.mubr.msk.bf16.mxu1 %vm6277_vm1, %v9484_v33 }
 0x2c0   : > { %v2664_v56 = vpop.f32.mrb[232].mxu0  ;;  %v2290_v31 = vpop.f32.mrb[232].mxu1 }
 0x2c1   : > { %v2838_v12 = vrot.slane %v2664_v56, 4  ;;  %v5755_v41 = vpop.f32.mrb[233].mxu0  ;;  %v2463_v50 = vrot.slane %v2290_v31, 4  ;;  %v5673_v10 = vpop.f32.mrb[233].mxu1 }
 0x2c2   : > { %v2667_v8 = vpop.f32.mrb[234].mxu0  ;;  %v2293_v19 = vpop.f32.mrb[234].mxu1 }
 0x2c3   : > { %v2839_v15 = vsel %vm2443_vm6, %v2836_v40, %v2838_v12  ;;  %v2840_v48 = vrot.slane %v2667_v8, 4  ;;  %v5756_v39 = vpop.f32.mrb[235].mxu0  ;;  %v2464_v37 = vsel %vm2443_vm6, %v2461_v62, %v2463_v50  ;;  %v2465_v1 = vrot.slane %v2293_v19, 4  ;;  %v5674_v51 = vpop.f32.mrb[235].mxu1 }
 0x2c4   : > { %v7688_v42 = vadd.f32 %v2839_v15, %v2558_v4  ;;  %v2562_v25 = vadd.f32 %v2464_v37, %v7352_v0  ;;  %v9508_v4 = vld [vmem:[#allocation13_spill] sm:$0xff] }
 0x2c5   : > { %v2841_v20 = vsel %vm2443_vm6, %v2838_v12, %v2840_v48  ;;  %5950 = vmatmul.mubr.msk.bf16.gmra.mrb[84].mxu0 %vm371_vm2, %v7320_v54  ;;  %v2466_v57 = vsel %vm2443_vm6, %v2463_v50, %v2465_v1  ;;  %5868 = vmatmul.mubr.msk.bf16.gmra.mrb[84].mxu1 %vm371_vm2, %v7341_v46 }
 0x2c6   : > { %v7695_v52 = vadd.f32 %v2841_v20, %v2559_v36  ;;  %5953 = vmatprep.mubr.msk.bf16.mxu0 %vm6277_vm1, %v9484_v33  ;;  %v2563_v40 = vadd.f32 %v2466_v57, %v9508_v4  ;;  %5871 = vmatprep.mubr.msk.bf16.mxu1 %vm6277_vm1, %v9484_v33 }
 0x2c8   : > { %v2672_v0 = vpop.f32.mrb[236].mxu0  ;;  %v2298_v59 = vpop.f32.mrb[236].mxu1 }
 0x2c9   : > { %v2842_v62 = vrot.slane %v2672_v0, 4  ;;  %v5759_v32 = vpop.f32.mrb[237].mxu0  ;;  %v2467_v54 = vrot.slane %v2298_v59, 4  ;;  %v5677_v34 = vpop.f32.mrb[237].mxu1 }
 0x2ca   : > { %v2675_v21 = vpop.f32.mrb[238].mxu0  ;;  %v2301_v3 = vpop.f32.mrb[238].mxu1 }
 0x2cb   : > { %v2843_v36 = vsel %vm2443_vm6, %v2840_v48, %v2842_v62  ;;  %v2844_v56 = vrot.slane %v2675_v21, 4  ;;  %v5760_v31 = vpop.f32.mrb[239].mxu0  ;;  %v2468_v12 = vsel %vm2443_vm6, %v2465_v1, %v2467_v54  ;;  %v2469_v50 = vrot.slane %v2301_v3, 4  ;;  %v5678_v10 = vpop.f32.mrb[239].mxu1 }
 0x2cc   : > { %v7706_v41 = vadd.f32 %v2843_v36, %v2560_v53  ;;  %v2564_v8 = vadd.f32 %v2468_v12, %v7373_v30  ;;  %v9510_v53 = vld [vmem:[#allocation14_spill] sm:$0xff] }
 0x2cd   : > { %v2845_v15 = vsel %vm2443_vm6, %v2842_v62, %v2844_v56  ;;  %5954 = vmatmul.mubr.msk.bf16.gmra.mrb[88].mxu0 %vm371_vm2, %v7341_v46  ;;  %v2470_v19 = vsel %vm2443_vm6, %v2467_v54, %v2469_v50  ;;  %5872 = vmatmul.mubr.msk.bf16.gmra.mrb[88].mxu1 %vm371_vm2, %v7362_v23 }
 0x2ce   : > { %v7713_v39 = vadd.f32 %v2845_v15, %v2561_v45  ;;  %5957 = vmatprep.mubr.msk.bf16.mxu0 %vm6277_vm1, %v9484_v33  ;;  %v2565_v48 = vadd.f32 %v2470_v19, %v9510_v53  ;;  %5875 = vmatprep.mubr.msk.bf16.mxu1 %vm6277_vm1, %v9484_v33 }
 0x2d0   : > { %9509 = vst [vmem:[#allocation5_spill] sm:$0xff] %v7713_v39  ;;  %v2680_v30 = vpop.f32.mrb[240].mxu0  ;;  %v2306_v37 = vpop.f32.mrb[240].mxu1 }
 0x2d1   : > { %v2846_v1 = vrot.slane %v2680_v30, 4  ;;  %v5763_v51 = vpop.f32.mrb[241].mxu0  ;;  %v2471_v46 = vrot.slane %v2306_v37, 4  ;;  %v5681_v20 = vpop.f32.mrb[241].mxu1 }
 0x2d2   : > { %v2683_v57 = vpop.f32.mrb[242].mxu0  ;;  %v2309_v4 = vpop.f32.mrb[242].mxu1 }
 0x2d3   : > { %v2847_v45 = vsel %vm2443_vm6, %v2844_v56, %v2846_v1  ;;  %v2848_v0 = vrot.slane %v2683_v57, 4  ;;  %v5764_v59 = vpop.f32.mrb[243].mxu0  ;;  %v2472_v62 = vsel %vm2443_vm6, %v2469_v50, %v2471_v46  ;;  %v2473_v54 = vrot.slane %v2309_v4, 4  ;;  %v5682_v34 = vpop.f32.mrb[243].mxu1  ;;  %v4617_v57 = vld [vmem:[%s9452_s3] sm:$0xff] }
 0x2d4   : > { %v7724_v32 = vadd.f32 %v2847_v45, %v2562_v25  ;;  %v2566_v21 = vadd.f32 %v2472_v62, %v7394_v47  ;;  %v9513_v25 = vld [vmem:[#allocation15_spill] sm:$0xff]  ;;  %v4618_v45 = vld [vmem:[%s9452_s3 + $0x8] sm:$0xff] }
 0x2d5   : > { %v2849_v36 = vsel %vm2443_vm6, %v2846_v1, %v2848_v0  ;;  %5958 = vmatmul.mubr.msk.bf16.gmra.mrb[92].mxu0 %vm371_vm2, %v7362_v23  ;;  %v2474_v3 = vsel %vm2443_vm6, %v2471_v46, %v2473_v54  ;;  %5876 = vmatmul.mubr.msk.bf16.gmra.mrb[92].mxu1 %vm371_vm2, %v7383_v2  ;;  %v6025_v59 = vpack.c.bf16 %v4618_v45, %v4617_v57  ;;  %v9517_v34 = vld [vmem:[#allocation17_spill] sm:$0xff] }
 0x2d6   : > { %9511 = vst [vmem:[#allocation7_spill] sm:$0xff] %v7724_v32  ;;  %v7731_v31 = vadd.f32 %v2849_v36, %v2563_v40  ;;  %5961 = vmatprep.mubr.msk.bf16.mxu0 %vm6277_vm1, %v9484_v33  ;;  %v2567_v56 = vadd.f32 %v2474_v3, %v9513_v25  ;;  %5879 = vmatprep.mubr.msk.bf16.mxu1 %vm6277_vm1, %v9484_v33 }
 0x2d8   : > { %9512 = vst [vmem:[#allocation8_spill] sm:$0xff] %v7731_v31  ;;  %v2688_v47 = vpop.f32.mrb[244].mxu0  ;;  %v2314_v12 = vpop.f32.mrb[244].mxu1 }
 0x2d9   : > { %v2850_v50 = vrot.slane %v2688_v47, 4  ;;  %v5767_v10 = vpop.f32.mrb[245].mxu0  ;;  %v2475_v23 = vrot.slane %v2314_v12, 4  ;;  %v5685_v15 = vpop.f32.mrb[245].mxu1 }
 0x2da   : > { %v2691_v19 = vpop.f32.mrb[246].mxu0  ;;  %v2317_v53 = vpop.f32.mrb[246].mxu1 }
 0x2db   : > { %v2851_v40 = vsel %vm2443_vm6, %v2848_v0, %v2850_v50  ;;  %v2852_v30 = vrot.slane %v2691_v19, 4  ;;  %v5768_v37 = vpop.f32.mrb[247].mxu0  ;;  %v2476_v1 = vsel %vm2443_vm6, %v2473_v54, %v2475_v23  ;;  %v2477_v46 = vrot.slane %v2317_v53, 4  ;;  %v5686_v20 = vpop.f32.mrb[247].mxu1  ;;  %v9516_v54 = vld [vmem:[#allocation16_spill] sm:$0xff] }
 0x2dc   : > { %v7742_v51 = vadd.f32 %v2851_v40, %v2564_v8  ;;  %v2568_v4 = vadd.f32 %v2476_v1, %v7415_v61  ;;  %v9465_v61 = vmov 0.0|0.0  }
 0x2dd   : > { %v2853_v0 = vsel %vm2443_vm6, %v2850_v50, %v2852_v30  ;;  %5962 = vmatmul.mubr.msk.bf16.gmra.mrb[96].mxu0 %vm371_vm2, %v7383_v2  ;;  %v2478_v8 = vsel %vm2443_vm6, %v2475_v23, %v2477_v46  ;;  %5880 = vmatmul.mubr.msk.bf16.gmra.mrb[96].mxu1 %vm371_vm2, %v9516_v54 }
 0x2de   : > { %9514 = vst [vmem:[#allocation6_spill] sm:$0xff] %v7742_v51  ;;  %v7755_v62 = vadd.f32 %v2853_v0, %v2565_v48  ;;  %5965 = vmatprep.mubr.msk.bf16.mxu0 %vm6277_vm1, %v9484_v33  ;;  %v2569_v36 = vadd.f32 %v2478_v8, %v9517_v34  ;;  %5883 = vmatprep.mubr.msk.bf16.mxu1 %vm6277_vm1, %v9484_v33 }
 0x2df   : > { %6024 = vmatprep.subr.bf16.mxu1 %v9465_v61 }
 0x2e0   : > { %9515 = vst [vmem:[#allocation9_spill] sm:$0xff] %v7755_v62  ;;  %v2696_v2 = vpop.f32.mrb[248].mxu0  ;;  %6026 = vmatpush3.bf16.msra.mxu1 %v6025_v59  ;;  %v2322_v3 = vpop.f32.mrb[248].mxu1 }
 0x2e1   : > { %v2854_v25 = vrot.slane %v2696_v2, 4  ;;  %v5771_v48 = vpop.f32.mrb[249].mxu0  ;;  %6027 = vmatprep.subr.bf16.mxu1 %v9465_v61  ;;  %v2479_v47 = vrot.slane %v2322_v3, 4  ;;  %v5689_v12 = vpop.f32.mrb[249].mxu1 }
 0x2e2   : > { %v2699_v50 = vpop.f32.mrb[250].mxu0  ;;  %v2325_v23 = vpop.f32.mrb[250].mxu1 }
 0x2e3   : > { %v2855_v10 = vsel %vm2443_vm6, %v2852_v30, %v2854_v25  ;;  %v2856_v15 = vrot.slane %v2699_v50, 4  ;;  %v5772_v19 = vpop.f32.mrb[251].mxu0  ;;  %v2480_v40 = vsel %vm2443_vm6, %v2477_v46, %v2479_v47  ;;  %v2481_v37 = vrot.slane %v2325_v23, 4  ;;  %v5690_v1 = vpop.f32.mrb[251].mxu1 }
 0x2e4   : > { %v7768_v53 = vadd.f32 %v2855_v10, %v2566_v21  ;;  %v2570_v20 = vadd.f32 %v2480_v40, %v7436_v9 }
 0x2e5   : > { %v2857_v57 = vsel %vm2443_vm6, %v2854_v25, %v2856_v15  ;;  %5966 = vmatmul.mubr.msk.bf16.gmra.mrb[100].mxu0 %vm371_vm2, %v9516_v54  ;;  %v2482_v45 = vsel %vm2443_vm6, %v2479_v47, %v2481_v37  ;;  %5884 = vmatmul.mubr.msk.bf16.gmra.mrb[100].mxu1 %vm371_vm2, %v7425_v49 }
 0x2e6   : > { %9518 = vst [vmem:[#allocation10_spill] sm:$0xff] %v7768_v53  ;;  %v7775_v0 = vadd.f32 %v2857_v57, %v2567_v56  ;;  %5969 = vmatprep.mubr.msk.bf16.mxu0 %vm6277_vm1, %v9484_v33  ;;  %v2571_v21 = vadd.f32 %v2482_v45, %v7443_v27  ;;  %5887 = vmatprep.mubr.msk.bf16.mxu1 %vm6277_vm1, %v9484_v33 }
 0x2e8   : > { %9519 = vst [vmem:[#allocation11_spill] sm:$0xff] %v7775_v0  ;;  %v2704_v9 = vpop.f32.mrb[252].mxu0  ;;  %v2330_v30 = vpop.f32.mrb[252].mxu1 }
 0x2e9   : > { %v2858_v46 = vrot.slane %v2704_v9, 4  ;;  %v5775_v59 = vpop.f32.mrb[253].mxu0  ;;  %v2483_v8 = vrot.slane %v2330_v30, 4  ;;  %v5693_v54 = vpop.f32.mrb[253].mxu1 }
 0x2ea   : > { %v2707_v56 = vpop.f32.mrb[254].mxu0  ;;  %v2333_v2 = vpop.f32.mrb[254].mxu1 }
 0x2eb   : > { %v2859_v34 = vsel %vm2443_vm6, %v2856_v15, %v2858_v46  ;;  %v2860_v3 = vrot.slane %v2707_v56, 4  ;;  %v5776_v25 = vpop.f32.mrb[255].mxu0  ;;  %v2484_v48 = vsel %vm2443_vm6, %v2481_v37, %v2483_v8  ;;  %v2485_v27 = vrot.slane %v2333_v2, 4  ;;  %v5694_v12 = vpop.f32.mrb[255].mxu1  ;;  %v6207_v15 = vld [vmem:[%s6381_s15 + $0x88] sm:$0xff]   ;;  %v4619_v56 = vld [vmem:[%s9452_s3 + $0x10] sm:$0xff] }
 0x2ec   : > { %v7786_v47 = vadd.f32 %v2859_v34, %v2568_v4  ;;  %v2572_v50 = vadd.f32 %v2484_v48, %v7454_v29  ;;  %v4620_v34 = vld [vmem:[%s9452_s3 + $0x18] sm:$0xff]  ;;  %v6208_v48 = vld [vmem:[%s6381_s15 + $0x90] sm:$0xff]  }
 0x2ed   : > { %v2861_v10 = vsel %vm2443_vm6, %v2858_v46, %v2860_v3  ;;  %5970 = vmatmul.mubr.msk.bf16.gmra.mrb[104].mxu0 %vm371_vm2, %v7425_v49  ;;  %v2486_v23 = vsel %vm2443_vm6, %v2483_v8, %v2485_v27  ;;  %5888 = vmatmul.mubr.msk.bf16.gmra.mrb[104].mxu1 %vm371_vm2, %v6207_v15 }
 0x2ee   : > { %9520 = vst [vmem:[#allocation12_spill] sm:$0xff] %v7786_v47  ;;  %v7793_v19 = vadd.f32 %v2861_v10, %v2569_v36  ;;  %5973 = vmatprep.mubr.msk.bf16.mxu0 %vm6277_vm1, %v9484_v33  ;;  %v2573_v4 = vadd.f32 %v2486_v23, %v7461_v44  ;;  %5891 = vmatprep.mubr.msk.bf16.mxu1 %vm6277_vm1, %v9484_v33 }
 0x2f0   : > { %9521 = vst [vmem:[#allocation13_spill] sm:$0xff] %v7793_v19  ;;  %v2712_v29 = vpop.f32.mrb[0].mxu0  ;;  %v2338_v40 = vpop.f32.mrb[0].mxu1 }
 0x2f1   : > { %v2862_v37 = vrot.slane %v2712_v29, 4  ;;  %v5779_v1 = vpop.f32.mrb[1].mxu0  ;;  %v2487_v49 = vrot.slane %v2338_v40, 4  ;;  %v5697_v57 = vpop.f32.mrb[1].mxu1 }
 0x2f2   : > { %v2715_v45 = vpop.f32.mrb[2].mxu0  ;;  %v2341_v9 = vpop.f32.mrb[2].mxu1 }
 0x2f3   : > { %v2863_v36 = vsel %vm2443_vm6, %v2860_v3, %v2862_v37  ;;  %v2864_v30 = vrot.slane %v2715_v45, 4  ;;  %v5780_v46 = vpop.f32.mrb[3].mxu0  ;;  %v2488_v59 = vsel %vm2443_vm6, %v2485_v27, %v2487_v49  ;;  %v2489_v44 = vrot.slane %v2341_v9, 4  ;;  %v5698_v54 = vpop.f32.mrb[3].mxu1 }
 0x2f4   : > { %v7804_v8 = vadd.f32 %v2863_v36, %v2570_v20  ;;  %v2574_v2 = vadd.f32 %v2488_v59, %v7472_v14  ;;  %v6028_v14 = vpack.c.bf16 %v4620_v34, %v4619_v56 }
 0x2f5   : > { %v2865_v3 = vsel %vm2443_vm6, %v2862_v37, %v2864_v30  ;;  %5974 = vmatmul.mubr.msk.bf16.gmra.mrb[108].mxu0 %vm371_vm2, %v6207_v15  ;;  %v2490_v25 = vsel %vm2443_vm6, %v2487_v49, %v2489_v44  ;;  %5892 = vmatmul.mubr.msk.bf16.gmra.mrb[108].mxu1 %vm371_vm2, %v6208_v48 }
 0x2f6   : > { %9522 = vst [vmem:[#allocation14_spill] sm:$0xff] %v7804_v8  ;;  %v7816_v20 = vadd.f32 %v2865_v3, %v2571_v21  ;;  %5977 = vmatprep.mubr.msk.bf16.mxu0 %vm6277_vm1, %v9484_v33  ;;  %v2575_v27 = vadd.f32 %v2490_v25, %v7479_v5  ;;  %5895 = vmatprep.mubr.msk.bf16.mxu1 %vm6277_vm1, %v9484_v33  ;;  %v9558_v8 = vmov 0 }
 0x2f7   : > { %6029 = vmatpush3.bf16.msra.mxu1 %v6028_v14 }
 0x2f8   : > { %9523 = vst [vmem:[#allocation15_spill] sm:$0xff] %v7816_v20  ;;  %v2720_v12 = vpop.f32.mrb[4].mxu0  ;;  %v2346_v10 = vpop.f32.mrb[4].mxu1  ;;  %6030 = vmatprep.subr.bf16.mxu1 %v9465_v61 }
 0x2f9   : > { %v2866_v23 = vrot.slane %v2720_v12, 4  ;;  %v5783_v15 = vpop.f32.mrb[5].mxu0  ;;  %v2491_v29 = vrot.slane %v2346_v10, 4  ;;  %v5701_v21 = vpop.f32.mrb[5].mxu1 }
 0x2fa   : > { %v2723_v40 = vpop.f32.mrb[6].mxu0  ;;  %v2349_v1 = vpop.f32.mrb[6].mxu1 }
 0x2fb   : > { %v2867_v37 = vsel %vm2443_vm6, %v2864_v30, %v2866_v23  ;;  %v2868_v49 = vrot.slane %v2723_v40, 4  ;;  %v5784_v5 = vpop.f32.mrb[7].mxu0  ;;  %v2492_v57 = vsel %vm2443_vm6, %v2489_v44, %v2491_v29  ;;  %v2493_v36 = vrot.slane %v2349_v1, 4  ;;  %v5702_v9 = vpop.f32.mrb[7].mxu1  ;;  %v6209_v30 = vld [vmem:[%s6381_s15 + $0x98] sm:$0xff]   ;;  %v4621_v1 = vld [vmem:[%s9452_s3 + $0x20] sm:$0xff] }
 0x2fc   : > { %v7828_v45 = vadd.f32 %v2867_v37, %v2572_v50  ;;  %v2576_v46 = vadd.f32 %v2492_v57, %v7490_v26  ;;  %v6210_v57 = vld [vmem:[%s6381_s15 + $0xa0] sm:$0xff]   ;;  %s9407_s15 = scalar_lea.hbm %s9454_s5, %s4997_s26 }
 0x2fd   : > { %v2869_v59 = vsel %vm2443_vm6, %v2866_v23, %v2868_v49  ;;  %5978 = vmatmul.mubr.msk.bf16.gmra.mrb[112].mxu0 %vm371_vm2, %v6208_v48  ;;  %v2494_v54 = vsel %vm2443_vm6, %v2491_v29, %v2493_v36  ;;  %5896 = vmatmul.mubr.msk.bf16.gmra.mrb[112].mxu1 %vm371_vm2, %v6209_v30 }
 0x2fe   : > { %9524 = vst [vmem:[#allocation16_spill] sm:$0xff] %v7828_v45  ;;  %v7834_v56 = vadd.f32 %v2869_v59, %v2573_v4  ;;  %5981 = vmatprep.mubr.msk.bf16.mxu0 %vm6277_vm1, %v9484_v33  ;;  %v2577_v50 = vadd.f32 %v2494_v54, %v7497_v13  ;;  %5899 = vmatprep.mubr.msk.bf16.mxu1 %vm6277_vm1, %v9484_v33 }
 0x300   : > { %9525 = vst [vmem:[#allocation17_spill] sm:$0xff] %v7834_v56  ;;  %v2728_v26 = vpop.f32.mrb[8].mxu0  ;;  %v2354_v44 = vpop.f32.mrb[8].mxu1 }
 0x301   : > { %v2870_v34 = vrot.slane %v2728_v26, 4  ;;  %v5787_v3 = vpop.f32.mrb[9].mxu0  ;;  %v2495_v25 = vrot.slane %v2354_v44, 4  ;;  %v5705_v48 = vpop.f32.mrb[9].mxu1 }
 0x302   : > { %v2731_v14 = vpop.f32.mrb[10].mxu0  ;;  %v2357_v12 = vpop.f32.mrb[10].mxu1 }
 0x303   : > { %v2871_v4 = vsel %vm2443_vm6, %v2868_v49, %v2870_v34  ;;  %v2872_v10 = vrot.slane %v2731_v14, 4  ;;  %v5788_v23 = vpop.f32.mrb[11].mxu0  ;;  %v2496_v15 = vsel %vm2443_vm6, %v2493_v36, %v2495_v25  ;;  %v2497_v13 = vrot.slane %v2357_v12, 4  ;;  %v5706_v21 = vpop.f32.mrb[11].mxu1  ;;  %v4622_v49 = vld [vmem:[%s9452_s3 + $0x28] sm:$0xff] }
 0x304   : > { %v7845_v29 = vadd.f32 %v2871_v4, %v2574_v2  ;;  %v2578_v40 = vadd.f32 %v2496_v15, %v7508_v24  ;;  %v6031_v9 = vpack.c.bf16 %v4622_v49, %v4621_v1 }
 0x305   : > { %v2873_v37 = vsel %vm2443_vm6, %v2870_v34, %v2872_v10  ;;  %5982 = vmatmul.mubr.msk.bf16.gmra.mrb[116].mxu0 %vm371_vm2, %v6209_v30  ;;  %v2498_v5 = vsel %vm2443_vm6, %v2495_v25, %v2497_v13  ;;  %5900 = vmatmul.mubr.msk.bf16.gmra.mrb[116].mxu1 %vm371_vm2, %v6210_v57 }
 0x306   : > { %9526 = vst [vmem:[#allocation18_spill] sm:$0xff] %v7845_v29  ;;  %v7857_v2 = vadd.f32 %v2873_v37, %v2575_v27  ;;  %5985 = vmatprep.mubr.msk.bf16.mxu0 %vm6277_vm1, %v9484_v33  ;;  %v2579_v24 = vadd.f32 %v2498_v5, %v7515_v43  ;;  %6021 = vmatprep.mubr.msk.f32.mxu1 %vm6277_vm1, %v9484_v33 }
 0x307   : > { %6032 = vmatpush3.bf16.msra.mxu1 %v6031_v9 }
 0x308   : > { %9527 = vst [vmem:[#allocation19_spill] sm:$0xff] %v7857_v2  ;;  %v2736_v36 = vpop.f32.mrb[12].mxu0  ;;  %v2362_v59 = vpop.f32.mrb[12].mxu1  ;;  %6033 = vmatprep.subr.bf16.mxu1 %v9465_v61  ;;  %v9555_v2 = vmov 0 }
 0x309   : > { %v2874_v54 = vrot.slane %v2736_v36, 4  ;;  %v5791_v30 = vpop.f32.mrb[13].mxu0  ;;  %v2499_v26 = vrot.slane %v2362_v59, 4  ;;  %v5709_v44 = vpop.f32.mrb[13].mxu1 }
 0x30a   : > { %v2739_v27 = vpop.f32.mrb[14].mxu0  ;;  %v2365_v3 = vpop.f32.mrb[14].mxu1 }
 0x30b   : > { %v2875_v34 = vsel %vm2443_vm6, %v2872_v10, %v2874_v54  ;;  %v2876_v25 = vrot.slane %v2739_v27, 4  ;;  %v5792_v48 = vpop.f32.mrb[15].mxu0  ;;  %v2500_v43 = vsel %vm2443_vm6, %v2497_v13, %v2499_v26  ;;  %v2501_v33 = vrot.slane %v2365_v3, 4  ;;  %v5710_v4 = vpop.f32.mrb[15].mxu1 }
 0x30c   : > { %v7869_v14 = vadd.f32 %v2875_v34, %v2576_v46  ;;  %v2580_v12 = vadd.f32 %v2500_v43, %v7526_v63 }
 0x30d   : > { %v2877_v23 = vsel %vm2443_vm6, %v2874_v54, %v2876_v25  ;;  %5986 = vmatmul.mubr.msk.bf16.gmra.mrb[120].mxu0 %vm371_vm2, %v6210_v57  ;;  %v2502_v15 = vsel %vm2443_vm6, %v2499_v26, %v2501_v33 }
 0x30e   : > { %9528 = vst [vmem:[#allocation20_spill] sm:$0xff] %v7869_v14  ;;  %v7875_v10 = vadd.f32 %v2877_v23, %v2577_v50  ;;  %v2581_v21 = vadd.f32 %v2502_v15, %v7533_v16  ;;  %v3818_v23 = vlaneseq }
 0x310   : > { %9529 = vst [vmem:[#allocation21_spill] sm:$0xff] %v7875_v10  ;;  %v2744_v37 = vpop.f32.mrb[16].mxu0  ;;  %v2370_v1 = vpop.f32.mrb[16].mxu1 }
 0x311   : > { %v2878_v49 = vrot.slane %v2744_v37, 4  ;;  %v5795_v13 = vpop.f32.mrb[17].mxu0  ;;  %v2503_v46 = vrot.slane %v2370_v1, 4  ;;  %v5713_v5 = vpop.f32.mrb[17].mxu1 }
 0x312   : > { %v2747_v36 = vpop.f32.mrb[18].mxu0  ;;  %v2373_v63 = vpop.f32.mrb[18].mxu1 }
 0x313   : > { %v2879_v9 = vsel %vm2443_vm6, %v2876_v25, %v2878_v49  ;;  %v2880_v59 = vrot.slane %v2747_v36, 4  ;;  %v5796_v54 = vpop.f32.mrb[19].mxu0  ;;  %v2504_v57 = vsel %vm2443_vm6, %v2501_v33, %v2503_v46  ;;  %v2505_v50 = vrot.slane %v2373_v63, 4  ;;  %v5714_v26 = vpop.f32.mrb[19].mxu1  ;;  %v4623_v63 = vld [vmem:[%s9452_s3 + $0x30] sm:$0xff] }
 0x314   : > { %v7880_v30 = vadd.f32 %v2879_v9, %v2578_v40  ;;  %v2582_v16 = vadd.f32 %v2504_v57, %v7544_v6  ;;  %v7894_v9 = vshrl.u32 %v3818_v23, 7 }
 0x315   : > { %v2881_v44 = vsel %vm2443_vm6, %v2878_v49, %v2880_v59  ;;  %v2506_v27 = vsel %vm2443_vm6, %v2503_v46, %v2505_v50 }
 0x316   : > { %9530 = vst [vmem:[#allocation22_spill] sm:$0xff] %v7880_v30  ;;  %v7885_v34 = vadd.f32 %v2881_v44, %v2579_v24  ;;  %v2583_v3 = vadd.f32 %v2506_v27, %v7551_v55 }
 0x318   : > { %9531 = vst [vmem:[#allocation23_spill] sm:$0xff] %v7885_v34  ;;  %v2752_v25 = vpop.f32.mrb[20].mxu0  ;;  %v2378_v48 = vpop.f32.mrb[20].mxu1 }
 0x319   : > { %v2882_v43 = vrot.slane %v2752_v25, 4  ;;  %v5799_v4 = vpop.f32.mrb[21].mxu0  ;;  %v2507_v33 = vrot.slane %v2378_v48, 4  ;;  %v5717_v40 = vpop.f32.mrb[21].mxu1 }
 0x31a   : > { %v2755_v15 = vpop.f32.mrb[22].mxu0  ;;  %v2381_v1 = vpop.f32.mrb[22].mxu1 }
 0x31b   : > { %v2883_v37 = vsel %vm2443_vm6, %v2880_v59, %v2882_v43  ;;  %v2884_v6 = vrot.slane %v2755_v15, 4  ;;  %v5800_v13 = vpop.f32.mrb[23].mxu0  ;;  %v2508_v49 = vsel %vm2443_vm6, %v2505_v50, %v2507_v33  ;;  %v2509_v24 = vrot.slane %v2381_v1, 4  ;;  %v5718_v5 = vpop.f32.mrb[23].mxu1  ;;  %v4624_v59 = vld [vmem:[%s9452_s3 + $0x38] sm:$0xff] }
 0x31c   : > { %v7890_v46 = vadd.f32 %v2883_v37, %v2580_v12  ;;  %v2584_v55 = vadd.f32 %v2508_v49, %v7562_v38  ;;  %v7907_v38 = vadd.s32 8, %v7894_v9  ;;  %v6034_v26 = vpack.c.bf16 %v4624_v59, %v4623_v63 }
 0x31d   : > { %v2885_v36 = vsel %vm2443_vm6, %v2882_v43, %v2884_v6  ;;  %v2510_v54 = vsel %vm2443_vm6, %v2507_v33, %v2509_v24  ;;  %v7910_v48 = vmul.u32.u64.low 3817748708, %v7894_v9  ;;  %v7911_v43 = vmul.u32.u64.high 3817748708, %v7894_v9, %v7910_v48 }
 0x31e   : > { %9532 = vst [vmem:[#allocation24_spill] sm:$0xff] %v7890_v46  ;;  %v7903_v12 = vadd.f32 %v2885_v36, %v2581_v21  ;;  %v2585_v57 = vadd.f32 %v2510_v54, %v7569_v11  ;;  %v7914_v21 = vadd.s32 16, %v7894_v9  ;;  %6035 = vmatpush3.bf16.msra.mxu1 %v6034_v26 }
 0x31f   : > { %v7918_v1 = vmul.u32.u64.low 3817748708, %v7907_v38  ;;  %v7919_v13 = vmul.u32.u64.high 3817748708, %v7907_v38, %v7918_v1  ;;  %6036 = vmatprep.subr.bf16.mxu1 %v9465_v61 }
 0x320   : > { %9533 = vst [vmem:[#allocation25_spill] sm:$0xff] %v7903_v12  ;;  %v2760_v50 = vpop.f32.mrb[24].mxu0  ;;  %v2386_v44 = vpop.f32.mrb[24].mxu1 }
 0x321   : > { %v2886_v27 = vrot.slane %v2760_v50, 4  ;;  %v5803_v25 = vpop.f32.mrb[25].mxu0  ;;  %v2511_v4 = vrot.slane %v2386_v44, 4  ;;  %v5721_v23 = vpop.f32.mrb[25].mxu1  ;;  %v7934_v44 = vadd.s32 32, %v7894_v9 }
 0x322   : > { %v2763_v40 = vpop.f32.mrb[26].mxu0  ;;  %v2389_v33 = vpop.f32.mrb[26].mxu1 }
 0x323   : > { %v2887_v11 = vsel %vm2443_vm6, %v2884_v6, %v2886_v27  ;;  %v2888_v15 = vrot.slane %v2763_v40, 4  ;;  %v5804_v37 = vpop.f32.mrb[27].mxu0  ;;  %v2512_v49 = vsel %vm2443_vm6, %v2509_v24, %v2511_v4  ;;  %v2513_v36 = vrot.slane %v2389_v33, 4  ;;  %v5722_v63 = vpop.f32.mrb[27].mxu1 }
 0x324   : > { %v7923_v5 = vadd.f32 %v2887_v11, %v2582_v16  ;;  %v2586_v59 = vadd.f32 %v2512_v49, %v7580_v17  ;;  %v7928_v6 = vadd.s32 24, %v7894_v9  ;;  %v3861_v40 = vshrl.u32 %v7911_v43, 4 }
 0x325   : > { %v2889_v54 = vsel %vm2443_vm6, %v2886_v27, %v2888_v15  ;;  %v2514_v50 = vsel %vm2443_vm6, %v2511_v4, %v2513_v36  ;;  %v7938_v16 = vmul.u32.u64.low 3817748708, %v7914_v21  ;;  %v7939_v25 = vmul.u32.u64.high 3817748708, %v7914_v21, %v7938_v16 }
 0x326   : > { %9534 = vst [vmem:[#allocation26_spill] sm:$0xff] %v7923_v5  ;;  %v7931_v26 = vadd.f32 %v2889_v54, %v2583_v3  ;;  %v2587_v24 = vadd.f32 %v2514_v50, %v7586_v35  ;;  %v7943_v11 = vmul.u32.u64.low 3817748708, %v7928_v6  ;;  %v7944_v4 = vmul.u32.u64.high 3817748708, %v7928_v6, %v7943_v11 }
 0x327   : > { %v7947_v1 = vmul.u32.u64.low 3817748708, %v7934_v44  ;;  %v7948_v35 = vmul.u32.u64.high 3817748708, %v7934_v44, %v7947_v1  ;;  %v7951_v49 = vadd.s32 40, %v7894_v9  ;;  %v7955_v43 = vadd.s32 48, %v7894_v9 }
 0x328   : > { %9535 = vst [vmem:[#allocation27_spill] sm:$0xff] %v7931_v26  ;;  %v2768_v48 = vpop.f32.mrb[28].mxu0  ;;  %v2394_v17 = vpop.f32.mrb[28].mxu1  ;;  %v7961_v11 = vadd.s32 56, %v7894_v9 }
 0x329   : > { %v2890_v23 = vrot.slane %v2768_v48, 4  ;;  %v5807_v27 = vpop.f32.mrb[29].mxu0  ;;  %v2515_v3 = vrot.slane %v2394_v17, 4  ;;  %v5725_v37 = vpop.f32.mrb[29].mxu1 }
 0x32a   : > { %v2771_v33 = vpop.f32.mrb[30].mxu0  ;;  %v2397_v16 = vpop.f32.mrb[30].mxu1 }
 0x32b   : > { %v2891_v63 = vsel %vm2443_vm6, %v2888_v15, %v2890_v23  ;;  %v2892_v54 = vrot.slane %v2771_v33, 4  ;;  %v5808_v50 = vpop.f32.mrb[31].mxu0  ;;  %v2516_v48 = vsel %vm2443_vm6, %v2513_v36, %v2515_v3  ;;  %v5726_v27 = vpop.f32.mrb[31].mxu1  ;;  %v3862_v15 = vmul.u32 18, %v3861_v40  ;;  %v4625_v33 = vld [vmem:[%s9452_s3 + $0x40] sm:$0xff]  ;;  %v4626_v36 = vld [vmem:[%s9452_s3 + $0x48] sm:$0xff] }
 0x32c   : > { %v7958_v17 = vadd.f32 %v2891_v63, %v2584_v55  ;;  %v7964_v37 = vadd.f32 %v2516_v48, %v7595_v22  ;;  %v3872_v3 = vshrl.u32 %v7919_v13, 4  ;;  %v3883_v22 = vshrl.u32 %v7939_v25, 4 }
 0x32d   : > { %v2893_v1 = vsel %vm2443_vm6, %v2890_v23, %v2892_v54  ;;  %v7977_v63 = vmul.u32.u64.low 3817748708, %v7951_v49  ;;  %v7978_v50 = vmul.u32.u64.high 3817748708, %v7951_v49, %v7977_v63  ;;  %v6037_v16 = vpack.c.bf16 %v4626_v36, %v4625_v33 }
 0x32e   : > { %9536 = vst [vmem:[#allocation28_spill] sm:$0xff] %v7958_v17  ;;  %v7973_v55 = vadd.f32 %v2893_v1, %v2585_v57  ;;  %v7982_v23 = vmul.u32.u64.low 3817748708, %v7955_v43  ;;  %v7983_v40 = vmul.u32.u64.high 3817748708, %v7955_v43, %v7982_v23  ;;  %v7990_v63 = vsub.s32 %v7894_v9, %v3862_v15 }
 0x32f   : > { %v7986_v27 = vmul.u32.u64.low 3817748708, %v7961_v11  ;;  %v7987_v61 = vmul.u32.u64.high 3817748708, %v7961_v11, %v7986_v27  ;;  %6038 = vmatpush3.bf16.msra.mxu1 %v6037_v16  ;;  %v9538_v25 = vmov 0.0|0.0   ;;  %v3873_v5 = vmul.u32 18, %v3872_v3 }
 0x330   : > { %9537 = vst [vmem:[#allocation29_spill] sm:$0xff] %v7973_v55  ;;  %v2776_v48 = vpop.f32.mrb[32].mxu0  ;;  %v2401_v55 = vpop.f32.mrb[32].mxu1  ;;  %6039 = vmatprep.subr.bf16.mxu1 %v9538_v25  ;;  %v3884_v12 = vmul.u32 18, %v3883_v22  ;;  %v3905_v16 = vshrl.u32 %v7948_v35, 4  ;;  %v8000_v15 = vadd.s32 64, %v7894_v9 }
 0x331   : > { %v2894_v57 = vrot.slane %v2776_v48, 4  ;;  %v5811_v1 = vpop.f32.mrb[33].mxu0  ;;  %v5729_v17 = vpop.f32.mrb[33].mxu1  ;;  %v3894_v55 = vshrl.u32 %v7944_v4, 4  ;;  %v8008_v3 = vadd.s32 72, %v7894_v9  ;;  %vm4251_vm7 = vcmp.ne.s32.totalorder %v7990_v63, 0 }
 0x332   : > { %v2779_v13 = vpop.f32.mrb[34].mxu0  ;;  %v2403_v36 = vpop.f32.mrb[34].mxu1  ;;  %vm4287_vm8 = vcmp.lt.s32.totalorder %v7990_v63, 0  ;;  %v3916_v4 = vshrl.u32 %v7978_v50, 4  ;;  %v3938_v1 = vshrl.u32 %v7987_v61, 4  ;;  %v8036_v61 = vadd.s32 96, %v7894_v9 }
 0x333   : > { %v2895_v26 = vsel %vm2443_vm6, %v2892_v54, %v2894_v57  ;;  %v2896_v23 = vrot.slane %v2779_v13, 4  ;;  %v5812_v33 = vpop.f32.mrb[35].mxu0  ;;  %v5730_v48 = vpop.f32.mrb[35].mxu1  ;;  %v8005_v54 = vadd.s32 18, %v7990_v63  ;;  %v3895_v22 = vmul.u32 18, %v3894_v55  ;;  %vm8096_vm15 = vmand %vm4287_vm8, %vm4251_vm7 }
 0x334   : > { %v7994_v46 = vadd.f32 %v2895_v26, %v2586_v59  ;;  %v8013_v59 = vsub.s32 %v7907_v38, %v3873_v5  ;;  %v8016_v26 = vsub.s32 %v7914_v21, %v3884_v12  ;;  %v8022_v13 = vadd.s32 80, %v7894_v9 }
 0x335   : > { %v2897_v17 = vsel %vm2443_vm6, %v2894_v57, %v2896_v23  ;;  %v3906_v57 = vmul.u32 18, %v3905_v16  ;;  %v8025_v38 = vmul.u32.u64.low 3817748708, %v8000_v15  ;;  %v8026_v5 = vmul.u32.u64.high 3817748708, %v8000_v15, %v8025_v38 }
 0x336   : > { %9539 = vst [vmem:[#allocation30_spill] sm:$0xff] %v7994_v46  ;;  %v8002_v27 = vadd.f32 %v2897_v17, %v2587_v24  ;;  %v3927_v24 = vshrl.u32 %v7983_v40, 4  ;;  %v8029_v12 = vadd.s32 88, %v7894_v9  ;;  %v8039_v16 = vadd.s32 104, %v7894_v9 }
 0x337   : > { %v8032_v40 = vmul.u32.u64.low 3817748708, %v8008_v3  ;;  %v8033_v55 = vmul.u32.u64.high 3817748708, %v8008_v3, %v8032_v40  ;;  %vm4252_vm9 = vcmp.ne.s32.totalorder %v8013_v59, 0  ;;  %v8051_v34 = vsub.s32 %v7928_v6, %v3895_v22 }
 0x338   : > { %9540 = vst [vmem:[#allocation31_spill] sm:$0xff] %v8002_v27  ;;  %v2784_v35 = vpop.f32.mrb[36].mxu0  ;;  %v3011_v48 = vpop.f32.mrb[36].mxu1  ;;  %v3928_v38 = vmul.u32 18, %v3927_v24  ;;  %v3939_v27 = vmul.u32 18, %v3938_v1  ;;  %vm4288_vm10 = vcmp.lt.s32.totalorder %v8013_v59, 0 }
 0x339   : > { %v2898_v33 = vrot.slane %v2784_v35, 4  ;;  %v5815_v36 = vpop.f32.mrb[37].mxu0  ;;  %v5821_v50 = vpop.f32.mrb[37].mxu1  ;;  %v3917_v48 = vmul.u32 18, %v3916_v4  ;;  %v8047_v40 = vmul.u32.u64.low 3817748708, %v8022_v13  ;;  %v8048_v46 = vmul.u32.u64.high 3817748708, %v8022_v13, %v8047_v40  ;;  %vm8110_vm4 = vmand %vm4288_vm10, %vm4252_vm9 }
 0x33a   : > { %v2787_v21 = vpop.f32.mrb[38].mxu0  ;;  %v3013_v36 = vpop.f32.mrb[38].mxu1  ;;  %v8065_v24 = vmul.u32.u64.low 3817748708, %v8039_v16  ;;  %v8066_v1 = vmul.u32.u64.high 3817748708, %v8039_v16, %v8065_v24  ;;  %v8070_v6 = vadd.s32 18, %v8013_v59  ;;  %v8076_v22 = vsub.s32 %v7955_v43, %v3928_v38 }
 0x33b   : > { %v2899_v17 = vsel %vm2443_vm6, %v2896_v23, %v2898_v33  ;;  %v5816_v35 = vpop.f32.mrb[39].mxu0  ;;  %v5822_v50 = vpop.f32.mrb[39].mxu1  ;;  %v8054_v23 = vsub.s32 %v7934_v44, %v3906_v57  ;;  %v8073_v44 = vsub.s32 %v7951_v49, %v3917_v48  ;;  %vm4253_vm11 = vcmp.ne.s32.totalorder %v8016_v26, 0 }
 0x33c   : > { %v8044_v21 = vadd.f32 %v2899_v17, %v7964_v37  ;;  %v8057_v33 = vmul.u32.u64.low 3817748708, %v8029_v12  ;;  %v8058_v35 = vmul.u32.u64.high 3817748708, %v8029_v12, %v8057_v33  ;;  %vm4289_vm12 = vcmp.lt.s32.totalorder %v8016_v26, 0 }
 0x33d   : > { %v8061_v4 = vmul.u32.u64.low 3817748708, %v8036_v61  ;;  %v8062_v37 = vmul.u32.u64.high 3817748708, %v8036_v61, %v8061_v4  ;;  %v8081_v17 = vadd.s32 18, %v8016_v26  ;;  %v8084_v36 = vsub.s32 %v7961_v11, %v3939_v27  ;;  %vm8124_vm8 = vmand %vm4289_vm12, %vm4253_vm11 }
 0x33e   : > { %9541 = vst [vmem:[#allocation32_spill] sm:$0xff] %v8044_v21  ;;  %vm4254_vm13 = vcmp.ne.s32.totalorder %v8051_v34, 0  ;;  %vm4290_vm14 = vcmp.lt.s32.totalorder %v8051_v34, 0  ;;  %v3949_v49 = vshrl.u32 %v8026_v5, 4  ;;  %v8090_v43 = vadd.s32 112, %v7894_v9  ;;  %v4627_v21 = vld [vmem:[%s9452_s3 + $0x50] sm:$0xff] }
 0x33f   : > { %9542 = vst [vmem:[#allocation33_spill] sm:$0xff] %v8084_v36  ;;  %v8101_v27 = vadd.s32 18, %v8051_v34  ;;  %vm4255_vm1 = vcmp.ne.s32.totalorder %v8054_v23, 0  ;;  %vm4291_vm2 = vcmp.lt.s32.totalorder %v8054_v23, 0  ;;  %v3960_v5 = vshrl.u32 %v8033_v55, 4  ;;  %vm8136_vm3 = vmand %vm4290_vm14, %vm4254_vm13 }
 0x340   : > { %v3395_v57 = vpop.f32.mrb[40].mxu0  ;;  %v3017_v40 = vpop.f32.mrb[40].mxu1  ;;  %vm4256_vm5 = vcmp.ne.s32.totalorder %v8073_v44, 0  ;;  %vm4292_vm6 = vcmp.lt.s32.totalorder %v8073_v44, 0  ;;  %vm4257_vm7 = vcmp.ne.s32.totalorder %v8076_v22, 0  ;;  %vm4293_vm9 = vcmp.lt.s32.totalorder %v8076_v22, 0  ;;  %vm8155_vm11 = vmand %vm4291_vm2, %vm4255_vm1 }
 0x341   : > { %v5907_v50 = vpop.f32.mrb[41].mxu0  ;;  %v5825_v38 = vpop.f32.mrb[41].mxu1  ;;  %v8115_v57 = vadd.s32 18, %v8054_v23  ;;  %vm4258_vm10 = vcmp.ne.s32.totalorder %v8084_v36, 0  ;;  %vm4294_vm0 = vcmp.lt.s32.totalorder %v8084_v36, 0  ;;  %v3971_v40 = vshrl.u32 %v8048_v46, 4  ;;  %vm8173_vm12 = vmand %vm4292_vm6, %vm4256_vm5 }
 0x342   : > { %v3397_v48 = vpop.f32.mrb[42].mxu0  ;;  %v3019_v4 = vpop.f32.mrb[42].mxu1  ;;  %v3950_v38 = vmul.u32 18, %v3949_v49  ;;  %v4628_v46 = vld [vmem:[%s9452_s3 + $0x58] sm:$0xff]  ;;  %v3993_v30 = vshrl.u32 %v8062_v37, 4  ;;  %v8181_v37 = vadd.s32 120, %v7894_v9  ;;  %vm8191_vm13 = vmand %vm4293_vm9, %vm4257_vm7  ;;  %v9599_v24 = vsel %vm8124_vm8, %v8081_v17, %v8016_v26 }
 0x343   : > { %v5908_v33 = vpop.f32.mrb[43].mxu0  ;;  %v5826_v55 = vpop.f32.mrb[43].mxu1  ;;  %v6040_v10 = vpack.c.bf16 %v4628_v46, %v4627_v21  ;;  %v8178_v21 = vadd.s32 18, %v8073_v44  ;;  %v9556_v2 = vsel %vm8191_vm13, 4294967295, %v9555_v2  ;;  %v8196_v14 = vadd.s32 18, %v8076_v22  ;;  %vm8213_vm14 = vmand %vm4294_vm0, %vm4258_vm10 }
 0x344   : > { %v3982_v33 = vshrl.u32 %v8058_v35, 4  ;;  %v8142_v4 = vmul.u32.u64.low 3817748708, %v8090_v43  ;;  %v8143_v55 = vmul.u32.u64.high 3817748708, %v8090_v43, %v8142_v4  ;;  %v3961_v35 = vmul.u32 18, %v3960_v5 }
 0x345   : > { %v4004_v4 = vshrl.u32 %v8066_v1, 4  ;;  %v8199_v29 = vadd.s32 18, %v8084_v36  ;;  %6041 = vmatpush3.bf16.msra.mxu1 %v6040_v10  ;;  %v9559_v8 = vsel %vm8213_vm14, 4294967295, %v9558_v8  ;;  %v3994_v20 = vmul.u32 18, %v3993_v30 }
 0x346   : > { %9560 = vst [vmem:[#allocation35_spill] sm:$0xff] %v9559_v8  ;;  %v3983_v10 = vmul.u32 18, %v3982_v33  ;;  %6042 = vmatprep.subr.bf16.mxu1 %v9538_v25  ;;  %v8222_v47 = vsub.s32 %v8008_v3, %v3961_v35  ;;  %v4015_v35 = vshrl.u32 %v8143_v55, 4  ;;  %vm9562_vm2 = vcmask 1042432  }
 0x347   : > { %9557 = vst [vmem:[#allocation34_spill] sm:$0xff] %v8199_v29  ;;  %v4005_v0 = vmul.u32 18, %v4004_v4  ;;  %vm9602_vm8 = vcmask 1041408  }
 0x348   : > { %v3401_v1 = vpop.f32.mrb[44].mxu0  ;;  %v3023_v56 = vpop.f32.mrb[44].mxu1  ;;  %vm4260_vm5 = vcmp.ne.s32.totalorder %v8222_v47, 0  ;;  %vm9567_vm9 = vcmp.lt.s32.totalorder %v8222_v47, 0 }
 0x349   : > { %v3972_v1 = vmul.u32 18, %v3971_v40  ;;  %v5911_v45 = vpop.f32.mrb[45].mxu0  ;;  %v3211_v40 = vrot.slane %v3023_v56, 5  ;;  %v5829_v46 = vpop.f32.mrb[45].mxu1  ;;  %v8233_v56 = vadd.s32 128, %v7894_v9  ;;  %vm8291_vm7 = vmand %vm9567_vm9, %vm4260_vm5 }
 0x34a   : > { %v8218_v45 = vsub.s32 %v8000_v15, %v3950_v38  ;;  %v3403_v19 = vpop.f32.mrb[46].mxu0  ;;  %v3026_v53 = vpop.f32.mrb[46].mxu1  ;;  %v8229_v15 = vmul.u32.u64.low 3817748708, %v8181_v37  ;;  %v8230_v38 = vmul.u32.u64.high 3817748708, %v8181_v37, %v8229_v15  ;;  %v8255_v46 = vsub.s32 %v8036_v61, %v3994_v20  ;;  %vm9574_vm9 = vmmov %vm9562_vm2 }
 0x34b   : > { %v5912_v62 = vpop.f32.mrb[47].mxu0  ;;  %v3212_v19 = vrot.slane %v3026_v53, 5  ;;  %v5830_v33 = vpop.f32.mrb[47].mxu1  ;;  %v8244_v3 = vsub.s32 %v8022_v13, %v3972_v1  ;;  %v8249_v53 = vsub.s32 %v8029_v12, %v3983_v10  ;;  %v8258_v15 = vsub.s32 %v8039_v16, %v4005_v0 }
 0x34c   : > { %vm4259_vm0 = vcmp.ne.s32.totalorder %v8218_v45, 0  ;;  %vm4295_vm1 = vcmp.lt.s32.totalorder %v8218_v45, 0  ;;  %9563 = vst [vmem:[#allocation37_spill] sm:$0xff] %v8255_v46  ;;  %v8263_v1 = vmul.u32.u64.low 3817748708, %v8233_v56  ;;  %v8264_v12 = vmul.u32.u64.high 3817748708, %v8233_v56, %v8263_v1 }
 0x34d   : > { %9561 = vst [vmem:[#allocation36_spill] sm:$0xff] %v8249_v53  ;;  %v3213_v4 = vsel %vm9562_vm2, %v3211_v40, %v3212_v19  ;;  %9564 = vst [vmem:[#allocation38_spill] sm:$0xff] %v8258_v15  ;;  %v8267_v55 = vadd.s32 18, %v8218_v45  ;;  %v8270_v40 = vadd.s32 18, %v8222_v47  ;;  %v8283_v61 = vadd.s32 18, %v8244_v3 }
 0x34e   : > { %v3320_v13 = vadd.f32 %v3213_v4, %v7641_v28  ;;  %vm8278_vm10 = vmand %vm4295_vm1, %vm4259_vm0  ;;  %v4016_v16 = vmul.u32 18, %v4015_v35  ;;  %vm9570_vm6 = vcmp.ne.s32.totalorder %v8244_v3, 0  ;;  %vm9571_vm14 = vcmp.lt.s32.totalorder %v8244_v3, 0 }
 0x34f   : > { %vm8302_vm13 = vmand %vm9571_vm14, %vm9570_vm6  ;;  %v4026_v51 = vshrl.u32 %v8230_v38, 4  ;;  %vm9575_vm2 = vcmp.ne.s32.totalorder %v8249_v53, 0  ;;  %vm9576_vm1 = vcmp.lt.s32.totalorder %v8249_v53, 0  ;;  %vm9580_vm14 = vcmask 1041408  }
 0x350   : > { %v3407_v10 = vpop.f32.mrb[48].mxu0  ;;  %v3031_v0 = vpop.f32.mrb[48].mxu1  ;;  %vm8313_vm0 = vmand %vm9576_vm1, %vm9575_vm2  ;;  %vm9581_vm6 = vcmp.ne.s32.totalorder %v8255_v46, 0  ;;  %v8337_v29 = vsub.s32 %v8090_v43, %v4016_v16  ;;  %vm9587_vm2 = vcmask 1042432   ;;  %vm9588_vm1 = vcmp.ne.s32.totalorder %v8258_v15, 0 }
 0x351   : > { %v5915_v20 = vpop.f32.mrb[49].mxu0  ;;  %v3214_v33 = vrot.slane %v3031_v0, 5  ;;  %v5833_v4 = vpop.f32.mrb[49].mxu1  ;;  %v3594_v62 = vrot.slane %v3407_v10, 6  ;;  %v9593_v16 = vsel %vm8096_vm15, %v8005_v54, %v7990_v63  ;;  %v4027_v11 = vmul.u32 18, %v4026_v51 }
 0x352   : > { %v3410_v1 = vpop.f32.mrb[50].mxu0  ;;  %v3034_v30 = vpop.f32.mrb[50].mxu1  ;;  %v4037_v63 = vshrl.u32 %v8264_v12, 4  ;;  %v8397_v51 = vadd.s32 144, %v7894_v9  ;;  %vm8404_vm15 = vcmp.lt.s32.totalorder %v9599_v24, 16 }
 0x353   : > { %v3595_v35 = vrot.slane %v3410_v1, 6  ;;  %v5916_v0 = vpop.f32.mrb[51].mxu0  ;;  %v3215_v31 = vsel %vm9574_vm9, %v3212_v19, %v3214_v33  ;;  %v3216_v32 = vrot.slane %v3034_v30, 5  ;;  %v5834_v36 = vpop.f32.mrb[51].mxu1  ;;  %v8318_v1 = vadd.s32 18, %v8249_v53 }
 0x354   : > { %v8321_v0 = vadd.s32 18, %v8255_v46  ;;  %v3321_v38 = vadd.f32 %v3215_v31, %v7652_v7  ;;  %vm9582_vm9 = vcmp.lt.s32.totalorder %v8255_v46, 0  ;;  %v9583_v36 = vmov 0 }
 0x355   : > { %v3596_v19 = vsel %vm9580_vm14, %v3594_v62, %v3595_v35  ;;  %vm8329_vm5 = vmand %vm9582_vm9, %vm9581_vm6  ;;  %v8334_v30 = vadd.s32 18, %v8258_v15  ;;  %v3217_v8 = vsel %vm9587_vm2, %v3214_v33, %v3216_v32  ;;  %vm9589_vm14 = vcmp.lt.s32.totalorder %v8258_v15, 0 }
 0x356   : > { %9579 = vst [vmem:[#allocation39_spill] sm:$0xff] %v8321_v0  ;;  %v9584_v36 = vsel %vm8329_vm5, 4294967295, %v9583_v36  ;;  %v3703_v39 = vadd.f32 %v3596_v19, %v3320_v13  ;;  %vm8348_vm6 = vmand %vm9589_vm14, %vm9588_vm1  ;;  %v9590_v31 = vmov 0  ;;  %v8353_v62 = vadd.s32 136, %v7894_v9  ;;  %v8359_v13 = vld [vmem:[%s9451_s2] ss:$0 sm:$0xff] }
 0x357   : > { %9585 = vst [vmem:[#allocation40_spill] sm:$0xff] %v9584_v36  ;;  %9586 = vst [vmem:[#allocation41_spill] sm:$0xff] %v8334_v30  ;;  %v9591_v31 = vsel %vm8348_vm6, 4294967295, %v9590_v31  ;;  %v3322_v43 = vadd.f32 %v3217_v8, %v7659_v58  ;;  %vm8366_vm9 = vcmp.lt.s32.totalorder %v9593_v16, 16  ;;  %v9596_v19 = vsel %vm8110_vm4, %v8070_v6, %v8013_v59 }
 0x358   : > { %9592 = vst [vmem:[#allocation42_spill] sm:$0xff] %v9591_v31  ;;  %vm8375_vm2 = vcmp.lt.s32.totalorder %v9596_v19, 16  ;;  %v3415_v54 = vpop.f32.mrb[52].mxu0  ;;  %v3039_v12 = vpop.f32.mrb[52].mxu1  ;;  %v8416_v26 = vmul.u32.u64.low 3817748708, %v8353_v62  ;;  %v8417_v17 = vmul.u32.u64.high 3817748708, %v8353_v62, %v8416_v26  ;;  %v8421_v6 = vsub.s32 %v8181_v37, %v4027_v11 }
 0x359   : > { %v3597_v16 = vrot.slane %v3415_v54, 6  ;;  %v5919_v19 = vpop.f32.mrb[53].mxu0  ;;  %v3746_v54 = vadd.f32 %v8359_v13, %v3703_v39  ;;  %v5837_v50 = vpop.f32.mrb[53].mxu1  ;;  %v4038_v15 = vmul.u32 18, %v4037_v63  ;;  %v4629_v39 = vld [vmem:[%s9452_s3 + $0x60] sm:$0xff]  ;;  %vm9603_vm14 = vcmask 1042432  }
 0x35a   : > { %v3218_v19 = vrot.slane %v3039_v12, 5  ;;  %v3418_v59 = vpop.f32.mrb[54].mxu0  ;;  %v3042_v7 = vpop.f32.mrb[54].mxu1  ;;  %v4630_v12 = vld [vmem:[%s9452_s3 + $0x68] sm:$0xff]  ;;  %v8436_v11 = vadd.s32 152, %v7894_v9  ;;  %vm9604_vm1 = vmmov %vm9603_vm14  ;;  %vm9613_vm4 = vcmp.lt.s32.totalorder %v8337_v29, 0 }
 0x35b   : > { %v3598_v24 = vsel %vm9602_vm8, %v3595_v35, %v3597_v16  ;;  %v3599_v46 = vrot.slane %v3418_v59, 6  ;;  %v5920_v0 = vpop.f32.mrb[55].mxu0  ;;  %v3220_v30 = vrot.slane %v3042_v7, 5  ;;  %v5838_v35 = vpop.f32.mrb[55].mxu1  ;;  %v8431_v59 = vadd.s32 18, %v8337_v29 }
 0x35c   : > { %v3219_v50 = vsel %vm9603_vm14, %v3216_v32, %v3218_v19  ;;  %v3704_v26 = vadd.f32 %v3598_v24, %v3321_v38  ;;  %v6043_v63 = vpack.c.bf16 %v4630_v12, %v4629_v39  ;;  %v3782_v31 = vmax.f32 %v3746_v54, 0.0 }
 0x35d   : > { %v3323_v37 = vadd.f32 %v3219_v50, %v7670_v60  ;;  %v3600_v0 = vsel %vm9602_vm8, %v3597_v16, %v3599_v46  ;;  %v3221_v53 = vsel %vm9604_vm1, %v3218_v19, %v3220_v30  ;;  %v9605_v7 = vsel %vm8136_vm3, %v8101_v27, %v8051_v34 }
 0x35e   : > { %v3747_v36 = vadd.f32 %v8359_v13, %v3704_v26  ;;  %v3705_v32 = vadd.f32 %v3600_v0, %v3322_v43  ;;  %v3324_v38 = vadd.f32 %v3221_v53, %v7677_v18  ;;  %vm8446_vm14 = vcmp.lt.s32.totalorder %v9605_v7, 16  ;;  %6044 = vmatpush3.bf16.msra.mxu1 %v6043_v63 }
 0x35f   : > { %v8453_v16 = vsub.s32 %v8233_v56, %v4038_v15  ;;  %v8457_v48 = vmul.u32.u64.low 3817748708, %v8397_v51  ;;  %v8458_v54 = vmul.u32.u64.high 3817748708, %v8397_v51, %v8457_v48  ;;  %6045 = vmatprep.subr.bf16.mxu1 %v9538_v25  ;;  %v9608_v56 = vsel %vm8155_vm11, %v8115_v57, %v8054_v23  ;;  %vm9611_vm11 = vmmov %vm9602_vm8 }
 0x360   : > { %v3783_v43 = vmax.f32 %v3747_v36, 0.0  ;;  %v3748_v18 = vadd.f32 %v8359_v13, %v3705_v32  ;;  %v3423_v53 = vpop.f32.mrb[56].mxu0  ;;  %v3047_v34 = vpop.f32.mrb[56].mxu1  ;;  %vm8466_vm3 = vcmp.lt.s32.totalorder %v9608_v56, 16  ;;  %v8471_v36 = vadd.s32 18, %v8421_v6 }
 0x361   : > { %v3601_v27 = vrot.slane %v3423_v53, 6  ;;  %v5923_v19 = vpop.f32.mrb[57].mxu0  ;;  %v8474_v24 = vmul.u32.u64.low 3817748708, %v8436_v11  ;;  %v8475_v39 = vmul.u32.u64.high 3817748708, %v8436_v11, %v8474_v24  ;;  %v4539_v25 = vsel %vm8366_vm9, %v3782_v31, 0.0  ;;  %v5841_v23 = vpop.f32.mrb[57].mxu1 }
 0x362   : > { %v4540_v49 = vsel %vm8375_vm2, %v3783_v43, 0.0  ;;  %v3784_v12 = vmax.f32 %v3748_v18, 0.0  ;;  %v3222_v50 = vrot.slane %v3047_v34, 5  ;;  %v3426_v57 = vpop.f32.mrb[58].mxu0  ;;  %v3050_v0 = vpop.f32.mrb[58].mxu1  ;;  %vm9612_vm1 = vcmp.ne.s32.totalorder %v8337_v29, 0  ;;  %vm9617_vm2 = vmmov %vm9611_vm11 }
 0x363   : > { %v4575_v26 = vadd.f32 %v4540_v49, %v4539_v25  ;;  %v3602_v35 = vsel %vm9611_vm11, %v3599_v46, %v3601_v27  ;;  %v3603_v63 = vrot.slane %v3426_v57, 6  ;;  %v5924_v32 = vpop.f32.mrb[59].mxu0  ;;  %vm8486_vm8 = vmand %vm9613_vm4, %vm9612_vm1  ;;  %v4048_v31 = vshrl.u32 %v8417_v17, 4  ;;  %v5842_v18 = vpop.f32.mrb[59].mxu1 }
 0x364   : > { %v4541_v58 = vsel %vm8404_vm15, %v3784_v12, 0.0  ;;  %vm9616_vm9 = vcmask 1042432   ;;  %v3706_v43 = vadd.f32 %v3602_v35, %v3323_v37  ;;  %v3224_v46 = vrot.slane %v3050_v0, 5 }
 0x365   : > { %v3223_v7 = vsel %vm9616_vm9, %v3220_v30, %v3222_v50  ;;  %v4576_v53 = vadd.f32 %v4575_v26, %v4541_v58  ;;  %v3604_v34 = vsel %vm9617_vm2, %v3601_v27, %v3603_v63  ;;  %vm9618_vm4 = vcmp.ne.s32.totalorder %v8421_v6, 0  ;;  %vm9622_vm15 = vmmov %vm9616_vm9 }
 0x366   : > { %v3325_v48 = vadd.f32 %v3223_v7, %v7688_v42  ;;  %vm9619_vm11 = vcmp.lt.s32.totalorder %v8421_v6, 0  ;;  %v8505_v8 = vadd.s32 160, %v7894_v9  ;;  %v3749_v30 = vadd.f32 %v8359_v13, %v3706_v43 }
 0x367   : > { %vm8500_vm1 = vmand %vm9619_vm11, %vm9618_vm4  ;;  %v3225_v17 = vsel %vm9622_vm15, %v3222_v50, %v3224_v46  ;;  %v3707_v37 = vadd.f32 %v3604_v34, %v3324_v38  ;;  %v4409_v42 = vsel %vm8486_vm8, %v8431_v59, %v8337_v29  ;;  %v9623_v56 = vsel %vm8173_vm12, %v8178_v21, %v8073_v44 }
 0x368   : > { %v3326_v27 = vadd.f32 %v3225_v17, %v7695_v52  ;;  %vm8519_vm9 = vcmp.lt.s32.totalorder %v9623_v56, 16  ;;  %vm4267_vm2 = vcmp.ne.s32.totalorder %v8453_v16, 0  ;;  %vm4303_vm4 = vcmp.lt.s32.totalorder %v8453_v16, 0  ;;  %v3431_v12 = vpop.f32.mrb[60].mxu0  ;;  %v3055_v5 = vpop.f32.mrb[60].mxu1 }
 0x369   : > { %v4049_v38 = vmul.u32 18, %v4048_v31  ;;  %v3785_v25 = vmax.f32 %v3749_v30, 0.0  ;;  %v3750_v49 = vadd.f32 %v8359_v13, %v3707_v37  ;;  %v4410_v52 = vsel %vm8500_vm1, %v8471_v36, %v8421_v6  ;;  %v5927_v50 = vpop.f32.mrb[61].mxu0 }
 0x36a   : > { %v8531_v44 = vadd.s32 18, %v8453_v16  ;;  %v3605_v21 = vrot.slane %v3431_v12, 6  ;;  %vm9626_vm12 = vnez %v9556_v2  ;;  %v8547_v0 = vadd.s32 168, %v7894_v9  ;;  %v5845_v2 = vpop.f32.mrb[61].mxu1  ;;  %v3434_v7 = vpop.f32.mrb[62].mxu0 }
 0x36b   : > { %v9627_v23 = vsel %vm9626_vm12, %v8196_v14, %v8076_v22  ;;  %v8543_v26 = vmul.u32.u64.low 3817748708, %v8505_v8  ;;  %v8544_v35 = vmul.u32.u64.high 3817748708, %v8505_v8, %v8543_v26  ;;  %v4542_v32 = vsel %vm8446_vm14, %v3785_v25, 0.0  ;;  %v3058_v18 = vpop.f32.mrb[62].mxu1  ;;  %v5928_v30 = vpop.f32.mrb[63].mxu0  ;;  %vm8563_vm14 = vmand %vm4303_vm4, %vm4267_vm2 }
 0x36c   : > { %vm8538_vm11 = vcmp.lt.s32.totalorder %v9627_v23, 16  ;;  %v3786_v31 = vmax.f32 %v3750_v49, 0.0  ;;  %v3226_v58 = vrot.slane %v3055_v5, 5  ;;  %v4059_v14 = vshrl.u32 %v8458_v54, 4  ;;  %v5846_v49 = vpop.f32.mrb[63].mxu1  ;;  %v9635_v5 = vld [vmem:[#allocation5_spill] sm:$0xff] }
 0x36d   : > { %v4577_v22 = vadd.f32 %v4576_v53, %v4542_v32  ;;  %vm9630_vm15 = vcmask 1041408   ;;  %v3607_v34 = vrot.slane %v3434_v7, 6  ;;  %v8554_v17 = vsub.s32 %v8353_v62, %v4049_v38  ;;  %v9636_v23 = vld [vmem:[#allocation35_spill] sm:$0xff]  ;;  %v9638_v26 = vld [vmem:[#allocation34_spill] sm:$0xff]  ;;  %v9639_v32 = vld [vmem:[#allocation33_spill] sm:$0xff] }
 0x36e   : > { %v3606_v43 = vsel %vm9630_vm15, %v3603_v63, %v3605_v21  ;;  %v4543_v37 = vsel %vm8466_vm3, %v3786_v31, 0.0  ;;  %vm9631_vm12 = vcmask 1042432   ;;  %v3228_v25 = vrot.slane %v3058_v18, 5 }
 0x36f   : > { %v3227_v60 = vsel %vm9631_vm12, %v3224_v46, %v3226_v58  ;;  %v3708_v56 = vadd.f32 %v3606_v43, %v3325_v48  ;;  %v4578_v63 = vadd.f32 %v4577_v22, %v4543_v37  ;;  %v3608_v53 = vsel %vm9630_vm15, %v3605_v21, %v3607_v34  ;;  %vm9634_vm3 = vmmov %vm9631_vm12 }
 0x370   : > { %v3327_v62 = vadd.f32 %v3227_v60, %v7706_v41  ;;  %v4070_v15 = vshrl.u32 %v8475_v39, 4  ;;  %v3229_v48 = vsel %vm9634_vm3, %v3226_v58, %v3228_v25  ;;  %v3709_v38 = vadd.f32 %v3608_v53, %v3326_v27  ;;  %v3439_v7 = vpop.f32.mrb[64].mxu0  ;;  %v3063_v43 = vpop.f32.mrb[64].mxu1 }
 0x371   : > { %v3751_v46 = vadd.f32 %v8359_v13, %v3708_v56  ;;  %v4060_v12 = vmul.u32 18, %v4059_v14  ;;  %v3328_v50 = vadd.f32 %v3229_v48, %v9635_v5  ;;  %vm9637_vm2 = vnez %v9636_v23  ;;  %v5931_v30 = vpop.f32.mrb[65].mxu0  ;;  %v5849_v5 = vpop.f32.mrb[65].mxu1 }
 0x372   : > { %v9640_v31 = vsel %vm9637_vm2, %v9638_v26, %v9639_v32  ;;  %v4411_v41 = vsel %vm8563_vm14, %v8531_v44, %v8453_v16  ;;  %v8587_v39 = vadd.s32 176, %v7894_v9  ;;  %v8590_v27 = vadd.s32 184, %v7894_v9  ;;  %v3442_v23 = vpop.f32.mrb[66].mxu0  ;;  %v3066_v26 = vpop.f32.mrb[66].mxu1 }
 0x373   : > { %vm8578_vm4 = vcmp.lt.s32.totalorder %v9640_v31, 16  ;;  %v3787_v21 = vmax.f32 %v3751_v46, 0.0  ;;  %v3752_v58 = vadd.f32 %v8359_v13, %v3709_v38  ;;  %v8594_v14 = vadd.s32 18, %v8554_v17 }
 0x374   : > { %v8597_v22 = vadd.s32 192, %v7894_v9  ;;  %v3609_v18 = vrot.slane %v3439_v7, 6  ;;  %v9643_v37 = vsel %vm8278_vm10, %v8267_v55, %v8218_v45  ;;  %v4071_v56 = vmul.u32 18, %v4070_v15  ;;  %vm9646_vm10 = vmmov %vm9630_vm15  ;;  %v5932_v15 = vpop.f32.mrb[67].mxu0 }
 0x375   : > { %vm8604_vm12 = vcmp.lt.s32.totalorder %v9643_v37, 16  ;;  %v8609_v49 = vmul.u32.u64.low 3817748708, %v8547_v0  ;;  %v8610_v53 = vmul.u32.u64.high 3817748708, %v8547_v0, %v8609_v49  ;;  %v4544_v46 = vsel %vm8519_vm9, %v3787_v21, 0.0  ;;  %vm9647_vm15 = vmmov %vm9634_vm3  ;;  %v9648_v37 = vld [vmem:[#allocation7_spill] sm:$0xff] }
 0x376   : > { %v3788_v48 = vmax.f32 %v3752_v58, 0.0  ;;  %v3230_v38 = vrot.slane %v3063_v43, 5  ;;  %v8615_v28 = vsub.s32 %v8397_v51, %v4060_v12  ;;  %v4579_v45 = vadd.f32 %v4578_v63, %v4544_v46  ;;  %v5850_v43 = vpop.f32.mrb[67].mxu1  ;;  %vm9649_vm9 = vmmov %vm9646_vm10 }
 0x377   : > { %v3610_v55 = vsel %vm9646_vm10, %v3607_v34, %v3609_v18  ;;  %v3611_v32 = vrot.slane %v3442_v23, 6  ;;  %v4081_v31 = vshrl.u32 %v8544_v35, 4  ;;  %v3232_v58 = vrot.slane %v3066_v26, 5 }
 0x378   : > { %v4545_v7 = vsel %vm8538_vm11, %v3788_v48, 0.0  ;;  %v3231_v24 = vsel %vm9647_vm15, %v3228_v25, %v3230_v38  ;;  %v3710_v21 = vadd.f32 %v3610_v55, %v3327_v62  ;;  %v8625_v34 = vsub.s32 %v8436_v11, %v4071_v56  ;;  %v4631_v25 = vld [vmem:[%s9452_s3 + $0x70] sm:$0xff]  ;;  %v4632_v62 = vld [vmem:[%s9452_s3 + $0x78] sm:$0xff]  ;;  %v3447_v20 = vpop.f32.mrb[68].mxu0 }
 0x379   : > { %v4580_v30 = vadd.f32 %v4579_v45, %v4545_v7  ;;  %v3329_v51 = vadd.f32 %v3231_v24, %v9648_v37  ;;  %v3612_v63 = vsel %vm9649_vm9, %v3609_v18, %v3611_v32  ;;  %v3233_v35 = vsel %vm9634_vm3, %v3230_v38, %v3232_v58  ;;  %v9650_v18 = vld [vmem:[#allocation8_spill] sm:$0xff]  ;;  %v3071_v45 = vpop.f32.mrb[68].mxu1  ;;  %v5935_v26 = vpop.f32.mrb[69].mxu0 }
 0x37a   : > { %v3753_v12 = vadd.f32 %v8359_v13, %v3710_v21  ;;  %v3711_v49 = vadd.f32 %v3612_v63, %v3328_v50  ;;  %v8630_v57 = vadd.s32 18, %v8615_v28  ;;  %v3330_v46 = vadd.f32 %v3233_v35, %v9650_v18  ;;  %v5853_v63 = vpop.f32.mrb[69].mxu1  ;;  %v3450_v4 = vpop.f32.mrb[70].mxu0 }
 0x37b   : > { %v9651_v11 = vsel %vm8291_vm7, %v8270_v40, %v8222_v47  ;;  %vm4268_vm2 = vcmp.ne.s32.totalorder %v8554_v17, 0  ;;  %vm4304_vm10 = vcmp.lt.s32.totalorder %v8554_v17, 0  ;;  %v4082_v56 = vmul.u32 18, %v4081_v31  ;;  %v3074_v35 = vpop.f32.mrb[70].mxu1  ;;  %v9683_v63 = vld [vmem:[#allocation10_spill] sm:$0xff] }
 0x37c   : > { %vm8644_vm11 = vcmp.lt.s32.totalorder %v9651_v11, 16  ;;  %v8651_v48 = vmul.u32.u64.low 3817748708, %v8587_v39  ;;  %v8652_v38 = vmul.u32.u64.high 3817748708, %v8587_v39, %v8651_v48  ;;  %v3789_v5 = vmax.f32 %v3753_v12, 0.0 }
 0x37d   : > { %v3754_v23 = vadd.f32 %v8359_v13, %v3711_v49  ;;  %vm4269_vm15 = vcmp.ne.s32.totalorder %v8615_v28, 0  ;;  %v8658_v47 = vadd.s32 200, %v7894_v9  ;;  %v6046_v40 = vpack.c.bf16 %v4632_v62, %v4631_v25  ;;  %v5936_v25 = vpop.f32.mrb[71].mxu0 }
 0x37e   : > { %v3613_v55 = vrot.slane %v3447_v20, 6  ;;  %v9654_v15 = vsel %vm8302_vm13, %v8283_v61, %v8244_v3  ;;  %v8671_v7 = vmul.u32.u64.low 3817748708, %v8590_v27  ;;  %v8672_v24 = vmul.u32.u64.high 3817748708, %v8590_v27, %v8671_v7 }
 0x37f   : > { %vm8665_vm9 = vcmp.lt.s32.totalorder %v9654_v15, 16  ;;  %v4546_v21 = vsel %vm8578_vm4, %v3789_v5, 0.0  ;;  %v3790_v43 = vmax.f32 %v3754_v23, 0.0  ;;  %v3234_v37 = vrot.slane %v3071_v45, 5  ;;  %6047 = vmatpush3.bf16.msra.mxu1 %v6046_v40  ;;  %vm9658_vm4 = vmmov %vm9634_vm3  ;;  %v5854_v5 = vpop.f32.mrb[71].mxu1  ;;  %v9662_v40 = vld [vmem:[#allocation9_spill] sm:$0xff] }
 0x380   : > { %v4092_v12 = vshrl.u32 %v8610_v53, 4  ;;  %v4581_v3 = vadd.f32 %v4580_v30, %v4546_v21  ;;  %vm9657_vm13 = vcmask 1041408   ;;  %v3615_v49 = vrot.slane %v3450_v4, 6  ;;  %v9659_v53 = vld [vmem:[#allocation6_spill] sm:$0xff]  ;;  %vm9661_vm7 = vmmov %vm9658_vm4  ;;  %v3079_v10 = vpop.f32.mrb[72].mxu1  ;;  %v9668_v4 = vld [vmem:[#allocation39_spill] sm:$0xff] }
 0x381   : > { %v3614_v61 = vsel %vm9657_vm13, %v3611_v32, %v3613_v55  ;;  %v8679_v62 = vsub.s32 %v8505_v8, %v4082_v56  ;;  %v4547_v2 = vsel %vm8604_vm12, %v3790_v43, 0.0  ;;  %v3235_v18 = vsel %vm9658_vm4, %v3232_v58, %v3234_v37  ;;  %vm9660_vm3 = vmmov %vm9657_vm13  ;;  %v3455_v43 = vpop.f32.mrb[72].mxu0 }
 0x382   : > { %v3712_v11 = vadd.f32 %v3614_v61, %v3329_v51  ;;  %v3236_v48 = vrot.slane %v3074_v35, 5  ;;  %v4582_v23 = vadd.f32 %v4581_v3, %v4547_v2  ;;  %v3331_v20 = vadd.f32 %v3235_v18, %v9659_v53  ;;  %v9663_v51 = vld [vmem:[#allocation36_spill] sm:$0xff]  ;;  %v9669_v3 = vld [vmem:[#allocation37_spill] sm:$0xff]  ;;  %v5857_v53 = vpop.f32.mrb[73].mxu1  ;;  %vm9675_vm4 = vmmov %vm9660_vm3 }
 0x383   : > { %v3616_v30 = vsel %vm9660_vm3, %v3613_v55, %v3615_v49  ;;  %vm4306_vm13 = vcmp.lt.s32.totalorder %v8625_v34, 0  ;;  %v8690_v60 = vadd.s32 18, %v8625_v34  ;;  %v9664_v45 = vsel %vm8313_vm0, %v8318_v1, %v9663_v51  ;;  %v5939_v1 = vpop.f32.mrb[73].mxu0  ;;  %v3082_v51 = vpop.f32.mrb[74].mxu1  ;;  %v9691_v53 = vld [vmem:[#allocation41_spill] sm:$0xff] }
 0x384   : > { %v3755_v32 = vadd.f32 %v8359_v13, %v3712_v11  ;;  %v3237_v8 = vsel %vm9661_vm7, %v3234_v37, %v3236_v48  ;;  %v3713_v56 = vadd.f32 %v3616_v30, %v3330_v46  ;;  %vm8698_vm12 = vcmp.lt.s32.totalorder %v9664_v45, 16  ;;  %v3458_v30 = vpop.f32.mrb[74].mxu0 }
 0x385   : > { %v3332_v58 = vadd.f32 %v3237_v8, %v9662_v40  ;;  %v4093_v55 = vmul.u32 18, %v4092_v12  ;;  %v8703_v15 = vmul.u32.u64.low 3817748708, %v8597_v22  ;;  %v8704_v7 = vmul.u32.u64.high 3817748708, %v8597_v22, %v8703_v15  ;;  %v5940_v45 = vpop.f32.mrb[75].mxu0 }
 0x386   : > { %v3791_v46 = vmax.f32 %v3755_v32, 0.0  ;;  %v3756_v21 = vadd.f32 %v8359_v13, %v3713_v56  ;;  %vm4271_vm7 = vcmp.ne.s32.totalorder %v8679_v62, 0  ;;  %v3617_v37 = vrot.slane %v3455_v43, 6  ;;  %v5858_v43 = vpop.f32.mrb[75].mxu1 }
 0x387   : > { %v9670_v12 = vsel %vm8329_vm5, %v9668_v4, %v9669_v3  ;;  %v8719_v35 = vadd.s32 18, %v8679_v62  ;;  %v8722_v25 = vmul.u32.u64.low 3817748708, %v8658_v47  ;;  %v8723_v2 = vmul.u32.u64.high 3817748708, %v8658_v47, %v8722_v25  ;;  %vm8731_vm5 = vmand %vm4304_vm10, %vm4268_vm2 }
 0x388   : > { %vm8714_vm0 = vcmp.lt.s32.totalorder %v9670_v12, 16  ;;  %v4548_v18 = vsel %vm8644_vm11, %v3791_v46, 0.0  ;;  %v3792_v11 = vmax.f32 %v3756_v21, 0.0  ;;  %v3238_v5 = vrot.slane %v3079_v10, 5  ;;  %v9689_v25 = vld [vmem:[#allocation11_spill] sm:$0xff] }
 0x389   : > { %v4103_v8 = vshrl.u32 %v8652_v38, 4  ;;  %v4583_v56 = vadd.f32 %v4582_v23, %v4548_v18  ;;  %v3618_v40 = vsel %vm9675_vm4, %v3615_v49, %v3617_v37  ;;  %v3619_v50 = vrot.slane %v3458_v30, 6  ;;  %v9692_v30 = vld [vmem:[#allocation38_spill] sm:$0xff] }
 0x38a   : > { %vm9676_vm11 = vcmp.lt.s32.totalorder %v8615_v28, 0  ;;  %v4114_v46 = vshrl.u32 %v8672_v24, 4  ;;  %v4549_v21 = vsel %vm8665_vm9, %v3792_v11, 0.0  ;;  %vm9679_vm2 = vcmask 1042432  }
 0x38b   : > { %vm8741_vm3 = vmand %vm9676_vm11, %vm4269_vm15  ;;  %v3239_v38 = vsel %vm9679_vm2, %v3236_v48, %v3238_v5  ;;  %v3714_v23 = vadd.f32 %v3618_v40, %v3331_v20  ;;  %v3240_v49 = vrot.slane %v3082_v51, 5  ;;  %vm9680_vm10 = vcmp.ne.s32.totalorder %v8625_v34, 0 }
 0x38c   : > { %vm8753_vm4 = vmand %vm4306_vm13, %vm9680_vm10  ;;  %v4584_v1 = vadd.f32 %v4583_v56, %v4549_v21  ;;  %v3333_v4 = vadd.f32 %v3239_v38, %v9683_v63  ;;  %vm9684_vm15 = vcmask 1041408   ;;  %vm9685_vm9 = vcmp.lt.s32.totalorder %v8679_v62, 0  ;;  %v3463_v38 = vpop.f32.mrb[76].mxu0  ;;  %v3087_v63 = vpop.f32.mrb[76].mxu1 }
 0x38d   : > { %v3620_v24 = vsel %vm9684_vm15, %v3617_v37, %v3619_v50  ;;  %vm8763_vm11 = vmand %vm9685_vm9, %vm4271_vm7  ;;  %v8768_v48 = vadd.s32 208, %v7894_v9  ;;  %v3757_v20 = vadd.f32 %v8359_v13, %v3714_v23  ;;  %v4412_v37 = vsel %vm8731_vm5, %v8594_v14, %v8554_v17 }
 0x38e   : > { %vm9688_vm13 = vmmov %vm9679_vm2  ;;  %v3715_v12 = vadd.f32 %v3620_v24, %v3332_v58  ;;  %v9693_v56 = vsel %vm8348_vm6, %v9691_v53, %v9692_v30  ;;  %v4413_v58 = vsel %vm8741_vm3, %v8630_v57, %v8615_v28  ;;  %v8795_v51 = vsub.s32 %v8547_v0, %v4093_v55  ;;  %v5861_v53 = vpop.f32.mrb[77].mxu1  ;;  %v9712_v0 = vld [vmem:[#allocation15_spill] sm:$0xff] }
 0x38f   : > { %v3241_v3 = vsel %vm9688_vm13, %v3238_v5, %v3240_v49  ;;  %vm8782_vm7 = vcmp.lt.s32.totalorder %v9693_v56, 16  ;;  %v4414_v5 = vsel %vm8753_vm4, %v8690_v60, %v8625_v34  ;;  %v3793_v45 = vmax.f32 %v3757_v20, 0.0  ;;  %vm9698_vm8 = vmmov %vm9684_vm15  ;;  %v3090_v59 = vpop.f32.mrb[78].mxu1  ;;  %v9699_v53 = vld [vmem:[#allocation12_spill] sm:$0xff] }
 0x390   : > { %v3334_v18 = vadd.f32 %v3241_v3, %v9689_v25  ;;  %v3758_v21 = vadd.f32 %v8359_v13, %v3715_v12  ;;  %v4104_v43 = vmul.u32 18, %v4103_v8  ;;  %v3621_v24 = vrot.slane %v3463_v38, 6  ;;  %v5943_v3 = vpop.f32.mrb[77].mxu0  ;;  %vm9701_vm10 = vmmov %vm9679_vm2 }
 0x391   : > { %vm8807_vm6 = vcmp.lt.s32.totalorder %v4409_v42, 16  ;;  %v4115_v55 = vmul.u32 18, %v4114_v46  ;;  %v8812_v20 = vmul.u32.u64.low 3817748708, %v8768_v48  ;;  %v8813_v12 = vmul.u32.u64.high 3817748708, %v8768_v48, %v8812_v20  ;;  %v3466_v30 = vpop.f32.mrb[78].mxu0  ;;  %vm9707_vm14 = vmmov %vm9698_vm8 }
 0x392   : > { %v4550_v8 = vsel %vm8698_vm12, %v3793_v45, 0.0  ;;  %v3794_v25 = vmax.f32 %v3758_v21, 0.0  ;;  %v3242_v11 = vrot.slane %v3087_v63, 5  ;;  %v4125_v33 = vshrl.u32 %v8704_v7, 4  ;;  %v5944_v38 = vpop.f32.mrb[79].mxu0  ;;  %v5862_v63 = vpop.f32.mrb[79].mxu1  ;;  %vm9700_vm12 = vmmov %vm9698_vm8 }
 0x393   : > { %v4585_v56 = vadd.f32 %v4584_v1, %v4550_v8  ;;  %v3622_v29 = vsel %vm9698_vm8, %v3619_v50, %v3621_v24  ;;  %v3623_v42 = vrot.slane %v3466_v30, 6  ;;  %v4136_v46 = vshrl.u32 %v8723_v2, 4  ;;  %v3095_v36 = vpop.f32.mrb[80].mxu1  ;;  %vm9717_vm3 = vmmov %vm9698_vm8 }
 0x394   : > { %v4551_v3 = vsel %vm8714_vm0, %v3794_v25, 0.0  ;;  %v3243_v26 = vsel %vm9679_vm2, %v3240_v49, %v3242_v11  ;;  %v3716_v45 = vadd.f32 %v3622_v29, %v3333_v4  ;;  %v3244_v21 = vrot.slane %v3090_v59, 5  ;;  %v9702_v25 = vld [vmem:[#allocation13_spill] sm:$0xff]  ;;  %v5865_v38 = vpop.f32.mrb[81].mxu1 }
 0x395   : > { %v4586_v20 = vadd.f32 %v4585_v56, %v4551_v3  ;;  %v3335_v23 = vadd.f32 %v3243_v26, %v9699_v53  ;;  %v3624_v7 = vsel %vm9700_vm12, %v3621_v24, %v3623_v42  ;;  %v8826_v50 = vadd.s32 216, %v7894_v9  ;;  %v9721_v56 = vld [vmem:[#allocation17_spill] sm:$0xff] }
 0x396   : > { %v3759_v1 = vadd.f32 %v8359_v13, %v3716_v45  ;;  %v3245_v2 = vsel %vm9701_vm10, %v3242_v11, %v3244_v21  ;;  %v3717_v8 = vadd.f32 %v3624_v7, %v3334_v18  ;;  %v4126_v61 = vmul.u32 18, %v4125_v33  ;;  %v3471_v11 = vpop.f32.mrb[80].mxu0 }
 0x397   : > { %v3336_v30 = vadd.f32 %v3245_v2, %v9702_v25  ;;  %vm8836_vm0 = vcmp.lt.s32.totalorder %v4410_v52, 16  ;;  %vm4272_vm15 = vcmp.ne.s32.totalorder %v8795_v51, 0  ;;  %vm4308_vm9 = vcmp.lt.s32.totalorder %v8795_v51, 0  ;;  %v5947_v33 = vpop.f32.mrb[81].mxu0 }
 0x398   : > { %v8843_v4 = vadd.s32 18, %v8795_v51  ;;  %v3795_v18 = vmax.f32 %v3759_v1, 0.0  ;;  %v3760_v24 = vadd.f32 %v8359_v13, %v3717_v8  ;;  %v8847_v19 = vsub.s32 %v8587_v39, %v4104_v43  ;;  %v3474_v3 = vpop.f32.mrb[82].mxu0  ;;  %vm8875_vm13 = vmand %vm4308_vm9, %vm4272_vm15  ;;  %v9711_v1 = vld [vmem:[#allocation14_spill] sm:$0xff] }
 0x399   : > { %v8850_v6 = vsub.s32 %v8590_v27, %v4115_v55  ;;  %v3625_v52 = vrot.slane %v3471_v11, 6  ;;  %vm8857_vm1 = vcmp.lt.s32.totalorder %v4411_v41, 16  ;;  %v4137_v29 = vmul.u32 18, %v4136_v46  ;;  %v3098_v41 = vpop.f32.mrb[82].mxu1  ;;  %v5948_v46 = vpop.f32.mrb[83].mxu0 }
 0x39a   : > { %v8862_v59 = vmul.u32.u64.low 3817748708, %v8826_v50  ;;  %v8863_v39 = vmul.u32.u64.high 3817748708, %v8826_v50, %v8862_v59  ;;  %v4552_v27 = vsel %vm8782_vm7, %v3795_v18, 0.0  ;;  %v3796_v43 = vmax.f32 %v3760_v24, 0.0  ;;  %vm9710_vm7 = vmmov %vm9679_vm2  ;;  %v5866_v53 = vpop.f32.mrb[83].mxu1  ;;  %v3479_v14 = vpop.f32.mrb[84].mxu0 }
 0x39b   : > { %v3246_v55 = vrot.slane %v3095_v36, 5  ;;  %v8868_v54 = vsub.s32 %v8597_v22, %v4126_v61  ;;  %v4587_v16 = vadd.f32 %v4586_v20, %v4552_v27  ;;  %v3626_v44 = vsel %vm9707_vm14, %v3623_v42, %v3625_v52  ;;  %v3103_v33 = vpop.f32.mrb[84].mxu1  ;;  %v5951_v27 = vpop.f32.mrb[85].mxu0 }
 0x39c   : > { %v3627_v26 = vrot.slane %v3474_v3, 6  ;;  %v4147_v45 = vshrl.u32 %v8813_v12, 4  ;;  %v4553_v22 = vsel %vm8807_vm6, %v3796_v43, 0.0  ;;  %v3718_v20 = vadd.f32 %v3626_v44, %v3335_v23  ;;  %v3482_v28 = vpop.f32.mrb[86].mxu0  ;;  %v9752_v27 = vld [vmem:[#allocation21_spill] sm:$0xff] }
 0x39d   : > { %v3247_v63 = vsel %vm9710_vm7, %v3244_v21, %v3246_v55  ;;  %v3248_v42 = vrot.slane %v3098_v41, 5  ;;  %v4588_v7 = vadd.f32 %v4587_v16, %v4553_v22  ;;  %v8886_v61 = vadd.s32 224, %v7894_v9  ;;  %v5869_v16 = vpop.f32.mrb[85].mxu1  ;;  %v5952_v22 = vpop.f32.mrb[87].mxu0 }
 0x39e   : > { %v3337_v2 = vadd.f32 %v3247_v63, %v9711_v1  ;;  %v3628_v8 = vsel %vm9698_vm8, %v3625_v52, %v3627_v26  ;;  %v3761_v25 = vadd.f32 %v8359_v13, %v3718_v20  ;;  %v4416_v23 = vsel %vm8875_vm13, %v8843_v4, %v8795_v51  ;;  %v3106_v41 = vpop.f32.mrb[86].mxu1  ;;  %vm9718_vm8 = vmmov %vm9679_vm2 }
 0x39f   : > { %v3249_v12 = vsel %vm9679_vm2, %v3246_v55, %v3248_v42  ;;  %v3719_v18 = vadd.f32 %v3628_v8, %v3336_v30  ;;  %vm8900_vm6 = vcmp.lt.s32.totalorder %v4412_v37, 16  ;;  %vm4273_vm12 = vcmp.ne.s32.totalorder %v8847_v19, 0  ;;  %v5870_v1 = vpop.f32.mrb[87].mxu1 }
 0x3a0   : > { %v3338_v21 = vadd.f32 %v3249_v12, %v9712_v0  ;;  %vm4309_vm10 = vcmp.lt.s32.totalorder %v8847_v19, 0  ;;  %v8907_v30 = vadd.s32 18, %v8847_v19  ;;  %v8910_v11 = vadd.s32 18, %v8850_v6 }
 0x3a1   : > { %v8913_v36 = vsub.s32 %v8658_v47, %v4137_v29  ;;  %v3797_v32 = vmax.f32 %v3761_v25, 0.0  ;;  %v3762_v17 = vadd.f32 %v8359_v13, %v3719_v18  ;;  %vm4274_vm5 = vcmp.ne.s32.totalorder %v8850_v6, 0  ;;  %v9719_v25 = vld [vmem:[#allocation16_spill] sm:$0xff] }
 0x3a2   : > { %vm4310_vm15 = vcmp.lt.s32.totalorder %v8850_v6, 0  ;;  %v8919_v37 = vadd.s32 18, %v8868_v54  ;;  %v8922_v52 = vadd.s32 232, %v7894_v9  ;;  %v3629_v59 = vrot.slane %v3479_v14, 6  ;;  %v3487_v14 = vpop.f32.mrb[88].mxu0 }
 0x3a3   : > { %vm8929_vm9 = vcmp.lt.s32.totalorder %v4413_v58, 16  ;;  %vm4275_vm14 = vcmp.ne.s32.totalorder %v8868_v54, 0  ;;  %vm4311_vm7 = vcmp.lt.s32.totalorder %v8868_v54, 0  ;;  %v4148_v29 = vmul.u32 18, %v4147_v45  ;;  %v5955_v60 = vpop.f32.mrb[89].mxu0 }
 0x3a4   : > { %v8936_v43 = vmul.u32.u64.low 3817748708, %v8886_v61  ;;  %v8937_v55 = vmul.u32.u64.high 3817748708, %v8886_v61, %v8936_v43  ;;  %v4554_v38 = vsel %vm8836_vm0, %v3797_v32, 0.0  ;;  %v3798_v15 = vmax.f32 %v3762_v17, 0.0  ;;  %vm9720_vm0 = vmmov %vm9717_vm3  ;;  %v3490_v31 = vpop.f32.mrb[90].mxu0 }
 0x3a5   : > { %v3250_v3 = vrot.slane %v3103_v33, 5  ;;  %v4158_v57 = vshrl.u32 %v8863_v39, 4  ;;  %v4589_v58 = vadd.f32 %v4588_v7, %v4554_v38  ;;  %v3630_v44 = vsel %vm9717_vm3, %v3627_v26, %v3629_v59 }
 0x3a6   : > { %v3631_v46 = vrot.slane %v3482_v28, 6  ;;  %v8944_v45 = vadd.s32 240, %v7894_v9  ;;  %v4555_v63 = vsel %vm8857_vm1, %v3798_v15, 0.0  ;;  %v3720_v20 = vadd.f32 %v3630_v44, %v3337_v2 }
 0x3a7   : > { %v3251_v49 = vsel %vm9718_vm8, %v3248_v42, %v3250_v3  ;;  %v3252_v53 = vrot.slane %v3106_v41, 5  ;;  %v4590_v8 = vadd.f32 %v4589_v58, %v4555_v63  ;;  %v8952_v26 = vsub.s32 %v8768_v48, %v4148_v29  ;;  %v5956_v58 = vpop.f32.mrb[91].mxu0 }
 0x3a8   : > { %v3339_v39 = vadd.f32 %v3251_v49, %v9719_v25  ;;  %v3632_v7 = vsel %vm9720_vm0, %v3629_v59, %v3631_v46  ;;  %v3763_v12 = vadd.f32 %v8359_v13, %v3720_v20  ;;  %vm4276_vm1 = vcmp.ne.s32.totalorder %v8913_v36, 0  ;;  %v3111_v59 = vpop.f32.mrb[88].mxu1  ;;  %v9734_v25 = vld [vmem:[#allocation18_spill] sm:$0xff] }
 0x3a9   : > { %v3253_v18 = vsel %vm9679_vm2, %v3250_v3, %v3252_v53  ;;  %v3721_v0 = vadd.f32 %v3632_v7, %v3338_v21  ;;  %vm8963_vm3 = vcmp.lt.s32.totalorder %v4414_v5, 16  ;;  %vm4312_vm8 = vcmp.lt.s32.totalorder %v8913_v36, 0  ;;  %v5873_v16 = vpop.f32.mrb[89].mxu1 }
 0x3aa   : > { %v3340_v42 = vadd.f32 %v3253_v18, %v9721_v56  ;;  %v8969_v48 = vadd.s32 18, %v8913_v36  ;;  %v4159_v32 = vmul.u32 18, %v4158_v57  ;;  %v3799_v21 = vmax.f32 %v3763_v12, 0.0  ;;  %v3114_v57 = vpop.f32.mrb[90].mxu1 }
 0x3ab   : > { %v3764_v17 = vadd.f32 %v8359_v13, %v3721_v0  ;;  %v8973_v33 = vmul.u32.u64.low 3817748708, %v8922_v52  ;;  %v8974_v10 = vmul.u32.u64.high 3817748708, %v8922_v52, %v8973_v33  ;;  %v3633_v34 = vrot.slane %v3487_v14, 6  ;;  %v5874_v20 = vpop.f32.mrb[91].mxu1 }
 0x3ac   : > { %v9724_v5 = vsel %vm8763_vm11, %v8719_v35, %v8679_v62  ;;  %v8987_v29 = vmul.u32.u64.low 3817748708, %v8944_v45  ;;  %v8988_v43 = vmul.u32.u64.high 3817748708, %v8944_v45, %v8987_v29  ;;  %v4556_v38 = vsel %vm8900_vm6, %v3799_v21, 0.0  ;;  %vm8996_vm11 = vmand %vm4309_vm10, %vm4273_vm12  ;;  %v3495_v33 = vpop.f32.mrb[92].mxu0 }
 0x3ad   : > { %vm8981_vm4 = vcmp.lt.s32.totalorder %v9724_v5, 16  ;;  %v3800_v15 = vmax.f32 %v3764_v17, 0.0  ;;  %v3254_v3 = vrot.slane %v3111_v59, 5  ;;  %vm4313_vm2 = vcmp.lt.s32.totalorder %v8952_v26, 0  ;;  %vm9006_vm6 = vmand %vm4310_vm15, %vm4274_vm5  ;;  %v9742_v17 = vld [vmem:[#allocation19_spill] sm:$0xff] }
 0x3ae   : > { %v4591_v35 = vadd.f32 %v4590_v8, %v4556_v38  ;;  %v3634_v28 = vsel %vm9720_vm0, %v3631_v46, %v3633_v34  ;;  %v3635_v24 = vrot.slane %v3490_v31, 6  ;;  %v9011_v41 = vadd.s32 18, %v8952_v26  ;;  %vm9020_vm10 = vmand %vm4311_vm7, %vm4275_vm14 }
 0x3af   : > { %v4557_v22 = vsel %vm8929_vm9, %v3800_v15, 0.0  ;;  %vm9731_vm12 = vcmask 1042432   ;;  %v3722_v46 = vadd.f32 %v3634_v28, %v3339_v39  ;;  %v3256_v49 = vrot.slane %v3114_v57, 5  ;;  %vm9735_vm5 = vmmov %vm9720_vm0 }
 0x3b0   : > { %v3255_v63 = vsel %vm9731_vm12, %v3252_v53, %v3254_v3  ;;  %v4592_v8 = vadd.f32 %v4591_v35, %v4557_v22  ;;  %v3636_v12 = vsel %vm9735_vm5, %v3633_v34, %v3635_v24  ;;  %vm9030_vm15 = vmand %vm4312_vm8, %vm4276_vm1  ;;  %v4169_v53 = vshrl.u32 %v8937_v55, 4 }
 0x3b1   : > { %v3341_v7 = vadd.f32 %v3255_v63, %v9734_v25  ;;  %v3765_v39 = vadd.f32 %v8359_v13, %v3722_v46  ;;  %vm9738_vm9 = vmmov %vm9731_vm12  ;;  %v3723_v0 = vadd.f32 %v3636_v12, %v3340_v42  ;;  %v4417_v56 = vsel %vm8996_vm11, %v8907_v30, %v8847_v19  ;;  %v9749_v63 = vld [vmem:[#allocation20_spill] sm:$0xff] }
 0x3b2   : > { %v3257_v18 = vsel %vm9738_vm9, %v3254_v3, %v3256_v49  ;;  %vm9739_vm14 = vcmp.ne.s32.totalorder %v8952_v26, 0  ;;  %vm9055_vm1 = vcmp.lt.s32.totalorder %v4416_v23, 16  ;;  %v4418_v19 = vsel %vm9006_vm6, %v8910_v11, %v8850_v6  ;;  %v3119_v23 = vpop.f32.mrb[92].mxu1  ;;  %v5959_v6 = vpop.f32.mrb[93].mxu0  ;;  %vm9747_vm8 = vmmov %vm9720_vm0 }
 0x3b3   : > { %vm9045_vm7 = vmand %vm4313_vm2, %vm9739_vm14  ;;  %v3342_v55 = vadd.f32 %v3257_v18, %v9742_v17  ;;  %v4419_v30 = vsel %vm9020_vm10, %v8919_v37, %v8868_v54  ;;  %v3801_v14 = vmax.f32 %v3765_v39, 0.0  ;;  %v3766_v40 = vadd.f32 %v8359_v13, %v3723_v0  ;;  %v5877_v5 = vpop.f32.mrb[93].mxu1  ;;  %v3498_v29 = vpop.f32.mrb[94].mxu0 }
 0x3b4   : > { %v4420_v51 = vsel %vm9030_vm15, %v8969_v48, %v8913_v36  ;;  %v9073_v4 = vsub.s32 %v8826_v50, %v4159_v32  ;;  %v3637_v59 = vrot.slane %v3495_v33, 6  ;;  %vm9075_vm13 = vcmp.lt.s32.totalorder %v4417_v56, 16  ;;  %v3122_v16 = vpop.f32.mrb[94].mxu1  ;;  %v5960_v62 = vpop.f32.mrb[95].mxu0  ;;  %vm9748_vm0 = vmmov %vm9738_vm9 }
 0x3b5   : > { %v4421_v54 = vsel %vm9045_vm7, %v9011_v41, %v8952_v26  ;;  %v4170_v37 = vmul.u32 18, %v4169_v53  ;;  %v9084_v34 = vadd.s32 248, %v7894_v9  ;;  %v4558_v50 = vsel %vm8963_vm3, %v3801_v14, 0.0  ;;  %v5878_v44 = vpop.f32.mrb[95].mxu1  ;;  %vm9750_vm3 = vmmov %vm9735_vm5  ;;  %v3503_v53 = vpop.f32.mrb[96].mxu0 }
 0x3b6   : > { %v3802_v32 = vmax.f32 %v3766_v40, 0.0  ;;  %v3258_v60 = vrot.slane %v3119_v23, 5  ;;  %v4180_v38 = vshrl.u32 %v8974_v10, 4  ;;  %v4593_v15 = vadd.f32 %v4592_v8, %v4558_v50  ;;  %vm9751_vm11 = vmmov %vm9748_vm0  ;;  %v3127_v0 = vpop.f32.mrb[96].mxu1  ;;  %v5963_v17 = vpop.f32.mrb[97].mxu0 }
 0x3b7   : > { %v3638_v3 = vsel %vm9747_vm8, %v3635_v24, %v3637_v59  ;;  %v3639_v31 = vrot.slane %v3498_v29, 6  ;;  %v4191_v35 = vshrl.u32 %v8988_v43, 4  ;;  %v3260_v58 = vrot.slane %v3122_v16, 5  ;;  %v5881_v23 = vpop.f32.mrb[97].mxu1  ;;  %vm9757_vm9 = vmmov %vm9750_vm3 }
 0x3b8   : > { %v4559_v28 = vsel %vm8981_vm4, %v3802_v32, 0.0  ;;  %v3259_v2 = vsel %vm9748_vm0, %v3256_v49, %v3258_v60  ;;  %v3724_v57 = vadd.f32 %v3638_v3, %v3341_v7  ;;  %v9097_v24 = vsub.s32 %v8886_v61, %v4170_v37  ;;  %v3130_v37 = vpop.f32.mrb[98].mxu1  ;;  %vm9758_vm14 = vmmov %vm9748_vm0  ;;  %v9773_v23 = vld [vmem:[#allocation24_spill] sm:$0xff] }
 0x3b9   : > { %v4594_v22 = vadd.f32 %v4593_v15, %v4559_v28  ;;  %v3343_v46 = vadd.f32 %v3259_v2, %v9749_v63  ;;  %v3640_v10 = vsel %vm9750_vm3, %v3637_v59, %v3639_v31  ;;  %v3261_v43 = vsel %vm9751_vm11, %v3258_v60, %v3260_v58  ;;  %v3506_v59 = vpop.f32.mrb[98].mxu0  ;;  %v5882_v15 = vpop.f32.mrb[99].mxu1  ;;  %vm9762_vm8 = vmmov %vm9750_vm3  ;;  %v9150_v28 = vld [vmem:[%s9451_s2] ss:$0 sm:$0xff]  ;;  %v9766_v63 = vld [vmem:[#allocation23_spill] sm:$0xff] }
 0x3ba   : > { %v3767_v20 = vadd.f32 %v8359_v13, %v3724_v57  ;;  %v3725_v1 = vadd.f32 %v3640_v10, %v3342_v55  ;;  %vm4278_vm4 = vcmp.ne.s32.totalorder %v9073_v4, 0  ;;  %v3344_v49 = vadd.f32 %v3261_v43, %v9752_v27  ;;  %v5964_v32 = vpop.f32.mrb[99].mxu0  ;;  %v3135_v36 = vpop.f32.mrb[100].mxu1  ;;  %vm9771_vm11 = vmmov %vm9762_vm8  ;;  %v9776_v55 = vld [vmem:[#allocation25_spill] sm:$0xff] }
 0x3bb   : > { %vm9103_vm2 = vcmp.lt.s32.totalorder %v4418_v19, 16  ;;  %vm4314_vm6 = vcmp.lt.s32.totalorder %v9073_v4, 0  ;;  %v9109_v25 = vadd.s32 18, %v9073_v4  ;;  %v9112_v61 = vadd.s32 256, %v7894_v9  ;;  %v3511_v27 = vpop.f32.mrb[100].mxu0 }
 0x3bc   : > { %v3803_v7 = vmax.f32 %v3767_v20, 0.0  ;;  %v3768_v12 = vadd.f32 %v8359_v13, %v3725_v1  ;;  %v4181_v39 = vmul.u32 18, %v4180_v38  ;;  %v4192_v18 = vmul.u32 18, %v4191_v35 }
 0x3bd   : > { %v3641_v56 = vrot.slane %v3503_v53, 6  ;;  %vm9115_vm12 = vcmp.lt.s32.totalorder %v4419_v30, 16  ;;  %vm4279_vm10 = vcmp.ne.s32.totalorder %v9097_v24, 0  ;;  %v3262_v33 = vrot.slane %v3127_v0, 5 }
 0x3be   : > { %v9121_v19 = vmul.u32.u64.low 3817748708, %v9084_v34  ;;  %v9122_v14 = vmul.u32.u64.high 3817748708, %v9084_v34, %v9121_v19  ;;  %v4560_v40 = vsel %vm9055_vm1, %v3803_v7, 0.0  ;;  %v3804_v13 = vmax.f32 %v3768_v12, 0.0  ;;  %vm9138_vm1 = vmand %vm4314_vm6, %vm4278_vm4 }
 0x3bf   : > { %vm4315_vm5 = vcmp.lt.s32.totalorder %v9097_v24, 0  ;;  %v4595_v6 = vadd.f32 %v4594_v22, %v4560_v40  ;;  %v3642_v30 = vsel %vm9757_vm9, %v3639_v31, %v3641_v56  ;;  %v3643_v50 = vrot.slane %v3506_v59, 6  ;;  %v9761_v31 = vld [vmem:[#allocation22_spill] sm:$0xff] }
 0x3c0   : > { %v9129_v60 = vadd.s32 18, %v9097_v24  ;;  %v4561_v5 = vsel %vm9075_vm13, %v3804_v13, 0.0  ;;  %v3263_v42 = vsel %vm9758_vm14, %v3260_v58, %v3262_v33  ;;  %v3726_v29 = vadd.f32 %v3642_v30, %v3343_v46  ;;  %vm9763_vm13 = vmmov %vm9748_vm0 }
 0x3c1   : > { %v3264_v38 = vrot.slane %v3130_v37, 5  ;;  %v4596_v16 = vadd.f32 %v4595_v6, %v4561_v5  ;;  %v3345_v62 = vadd.f32 %v3263_v42, %v9761_v31  ;;  %v3644_v35 = vsel %vm9762_vm8, %v3641_v56, %v3643_v50  ;;  %vm9158_vm0 = vmand %vm4315_vm5, %vm4279_vm10 }
 0x3c2   : > { %v9145_v11 = vadd.s32 264, %v7894_v9  ;;  %v3769_v2 = vadd.f32 %v9150_v28, %v3726_v29  ;;  %v3727_v58 = vadd.f32 %v3644_v35, %v3344_v49  ;;  %v9163_v22 = vsub.s32 %v8922_v52, %v4181_v39  ;;  %v5885_v39 = vpop.f32.mrb[101].mxu1  ;;  %vm9772_vm4 = vmmov %vm9763_vm13 }
 0x3c3   : > { %v3265_v57 = vsel %vm9763_vm13, %v3262_v33, %v3264_v38  ;;  %vm9171_vm3 = vcmp.lt.s32.totalorder %v4420_v51, 16  ;;  %v4422_v20 = vsel %vm9138_vm1, %v9109_v25, %v9073_v4  ;;  %v9180_v43 = vsub.s32 %v8944_v45, %v4192_v18  ;;  %v5967_v51 = vpop.f32.mrb[101].mxu0  ;;  %v3138_v18 = vpop.f32.mrb[102].mxu1  ;;  %vm9775_vm6 = vmmov %vm9772_vm4 }
 0x3c4   : > { %v3346_v46 = vadd.f32 %v3265_v57, %v9766_v63  ;;  %v3805_v52 = vmax.f32 %v3769_v2, 0.0  ;;  %v3770_v1 = vadd.f32 %v9150_v28, %v3727_v58  ;;  %v3645_v48 = vrot.slane %v3511_v27, 6  ;;  %v3514_v26 = vpop.f32.mrb[102].mxu0  ;;  %v5886_v13 = vpop.f32.mrb[103].mxu1  ;;  %vm9784_vm13 = vmmov %vm9772_vm4 }
 0x3c5   : > { %v9184_v47 = vmul.u32.u64.low 3817748708, %v9112_v61  ;;  %v9185_v49 = vmul.u32.u64.high 3817748708, %v9112_v61, %v9184_v47  ;;  %vm9192_vm15 = vcmp.lt.s32.totalorder %v4421_v54, 16  ;;  %v4423_v45 = vsel %vm9158_vm0, %v9129_v60, %v9097_v24  ;;  %v5968_v56 = vpop.f32.mrb[103].mxu0 }
 0x3c6   : > { %v9201_v25 = vmul.u32.u64.low 3817748708, %v9145_v11  ;;  %v9202_v7 = vmul.u32.u64.high 3817748708, %v9145_v11, %v9201_v25  ;;  %v4562_v12 = vsel %vm9103_vm2, %v3805_v52, 0.0  ;;  %v3806_v21 = vmax.f32 %v3770_v1, 0.0  ;;  %vm9774_vm2 = vmmov %vm9762_vm8  ;;  %v3519_v15 = vpop.f32.mrb[104].mxu0 }
 0x3c7   : > { %v3266_v53 = vrot.slane %v3135_v36, 5  ;;  %vm4280_vm7 = vcmp.ne.s32.totalorder %v9163_v22, 0  ;;  %v4597_v41 = vadd.f32 %v4596_v16, %v4562_v12  ;;  %v3646_v54 = vsel %vm9771_vm11, %v3643_v50, %v3645_v48  ;;  %v3143_v16 = vpop.f32.mrb[104].mxu1  ;;  %vm9781_vm1 = vmmov %vm9774_vm2 }
 0x3c8   : > { %v3647_v0 = vrot.slane %v3514_v26, 6  ;;  %v4202_v24 = vshrl.u32 %v9122_v14, 4  ;;  %v4563_v17 = vsel %vm9115_vm12, %v3806_v21, 0.0  ;;  %v3728_v19 = vadd.f32 %v3646_v54, %v3345_v62  ;;  %v5971_v62 = vpop.f32.mrb[105].mxu0  ;;  %v9787_v26 = vld [vmem:[#allocation26_spill] sm:$0xff] }
 0x3c9   : > { %v3267_v8 = vsel %vm9772_vm4, %v3264_v38, %v3266_v53  ;;  %v3268_v40 = vrot.slane %v3138_v18, 5  ;;  %v4598_v33 = vadd.f32 %v4597_v41, %v4563_v17  ;;  %v9215_v30 = vadd.s32 272, %v7894_v9  ;;  %v3522_v52 = vpop.f32.mrb[106].mxu0 }
 0x3ca   : > { %v3347_v59 = vadd.f32 %v3267_v8, %v9773_v23  ;;  %v3648_v6 = vsel %vm9774_vm2, %v3645_v48, %v3647_v0  ;;  %v3771_v37 = vadd.f32 %v9150_v28, %v3728_v19  ;;  %vm4316_vm12 = vcmp.lt.s32.totalorder %v9163_v22, 0  ;;  %v5972_v51 = vpop.f32.mrb[107].mxu0  ;;  %vm9792_vm2 = vmmov %vm9775_vm6 }
 0x3cb   : > { %v3269_v14 = vsel %vm9775_vm6, %v3266_v53, %v3268_v40  ;;  %v3729_v50 = vadd.f32 %v3648_v6, %v3346_v46  ;;  %vm9221_vm10 = vcmp.lt.s32.totalorder %v4422_v20, 16  ;;  %v9226_v5 = vadd.s32 18, %v9163_v22  ;;  %v5889_v20 = vpop.f32.mrb[105].mxu1  ;;  %vm9253_vm8 = vmand %vm4316_vm12, %vm4280_vm7  ;;  %v3527_v13 = vpop.f32.mrb[108].mxu0 }
 0x3cc   : > { %v3348_v32 = vadd.f32 %v3269_v14, %v9776_v55  ;;  %vm4281_vm5 = vcmp.ne.s32.totalorder %v9180_v43, 0  ;;  %v4203_v42 = vmul.u32 18, %v4202_v24  ;;  %v3807_v29 = vmax.f32 %v3771_v37, 0.0  ;;  %v3146_v36 = vpop.f32.mrb[106].mxu1  ;;  %v9790_v24 = vld [vmem:[#allocation27_spill] sm:$0xff]  ;;  %v5975_v6 = vpop.f32.mrb[109].mxu0  ;;  %vm9794_vm6 = vmmov %vm9781_vm1 }
 0x3cd   : > { %v3772_v38 = vadd.f32 %v9150_v28, %v3729_v50  ;;  %vm4317_vm9 = vcmp.lt.s32.totalorder %v9180_v43, 0  ;;  %v9232_v3 = vadd.s32 18, %v9180_v43  ;;  %v3649_v31 = vrot.slane %v3519_v15, 6  ;;  %v5890_v21 = vpop.f32.mrb[107].mxu1  ;;  %v9793_v20 = vld [vmem:[#allocation28_spill] sm:$0xff] }
 0x3ce   : > { %vm9234_vm14 = vcmp.lt.s32.totalorder %v4423_v45, 16  ;;  %v9239_v2 = vmul.u32.u64.low 3817748708, %v9215_v30  ;;  %v9240_v57 = vmul.u32.u64.high 3817748708, %v9215_v30, %v9239_v2  ;;  %v9243_v58 = vadd.s32 280, %v7894_v9  ;;  %vm9267_vm0 = vmand %vm4317_vm9, %vm4281_vm5  ;;  %v3151_v23 = vpop.f32.mrb[108].mxu1 }
 0x3cf   : > { %v4564_v44 = vsel %vm9171_vm3, %v3807_v29, 0.0  ;;  %v3808_v63 = vmax.f32 %v3772_v38, 0.0  ;;  %v3270_v46 = vrot.slane %v3143_v16, 5  ;;  %v4213_v1 = vshrl.u32 %v9185_v49, 4  ;;  %vm9788_vm3 = vmmov %vm9781_vm1 }
 0x3d0   : > { %v4599_v27 = vadd.f32 %v4598_v33, %v4564_v44  ;;  %v3650_v47 = vsel %vm9781_vm1, %v3647_v0, %v3649_v31  ;;  %v3651_v48 = vrot.slane %v3522_v52, 6  ;;  %v9258_v10 = vsub.s32 %v9084_v34, %v4203_v42  ;;  %vm9799_vm5 = vmmov %vm9792_vm2 }
 0x3d1   : > { %v4565_v49 = vsel %vm9192_vm15, %v3808_v63, 0.0  ;;  %v3271_v45 = vsel %vm9784_vm13, %v3268_v40, %v3270_v46  ;;  %v3730_v25 = vadd.f32 %v3650_v47, %v3347_v59  ;;  %v3272_v12 = vrot.slane %v3146_v36, 5  ;;  %vm9789_vm15 = vmmov %vm9772_vm4 }
 0x3d2   : > { %v4600_v39 = vadd.f32 %v4599_v27, %v4565_v49  ;;  %v3349_v34 = vadd.f32 %v3271_v45, %v9787_v26  ;;  %v3652_v41 = vsel %vm9788_vm3, %v3649_v31, %v3651_v48  ;;  %v4224_v4 = vshrl.u32 %v9202_v7, 4  ;;  %vm9791_vm4 = vmmov %vm9781_vm1 }
 0x3d3   : > { %v3773_v54 = vadd.f32 %v9150_v28, %v3730_v25  ;;  %v3273_v18 = vsel %vm9789_vm15, %v3270_v46, %v3272_v12  ;;  %v3731_v0 = vadd.f32 %v3652_v41, %v3348_v32  ;;  %v4214_v56 = vmul.u32 18, %v4213_v1  ;;  %v5893_v32 = vpop.f32.mrb[109].mxu1  ;;  %vm9805_vm15 = vmmov %vm9792_vm2 }
 0x3d4   : > { %v3350_v17 = vadd.f32 %v3273_v18, %v9790_v24  ;;  %v4424_v8 = vsel %vm9253_vm8, %v9226_v5, %v9163_v22  ;;  %v4425_v19 = vsel %vm9267_vm0, %v9232_v3, %v9180_v43  ;;  %vm4282_vm7 = vcmp.ne.s32.totalorder %v9258_v10, 0  ;;  %v3530_v5 = vpop.f32.mrb[110].mxu0  ;;  %v3154_v15 = vpop.f32.mrb[110].mxu1 }
 0x3d5   : > { %v3809_v7 = vmax.f32 %v3773_v54, 0.0  ;;  %v3774_v40 = vadd.f32 %v9150_v28, %v3731_v0  ;;  %vm4318_vm11 = vcmp.lt.s32.totalorder %v9258_v10, 0  ;;  %v9289_v33 = vadd.s32 18, %v9258_v10  ;;  %v5976_v16 = vpop.f32.mrb[111].mxu0  ;;  %v5894_v63 = vpop.f32.mrb[111].mxu1 }
 0x3d6   : > { %v3653_v59 = vrot.slane %v3527_v13, 6  ;;  %v4225_v22 = vmul.u32 18, %v4224_v4  ;;  %v9292_v37 = vmul.u32.u64.low 3817748708, %v9243_v58  ;;  %v9293_v14 = vmul.u32.u64.high 3817748708, %v9243_v58, %v9292_v37  ;;  %vm9311_vm12 = vmand %vm4318_vm11, %vm4282_vm7  ;;  %v3535_v25 = vpop.f32.mrb[112].mxu0  ;;  %v3159_v21 = vpop.f32.mrb[112].mxu1 }
 0x3d7   : > { %v4566_v43 = vsel %vm9221_vm10, %v3809_v7, 0.0  ;;  %v3810_v50 = vmax.f32 %v3774_v40, 0.0  ;;  %v3274_v55 = vrot.slane %v3151_v23, 5  ;;  %v9298_v42 = vsub.s32 %v9112_v61, %v4214_v56  ;;  %v5897_v54 = vpop.f32.mrb[113].mxu1  ;;  %vm9807_vm7 = vmmov %vm9788_vm3 }
 0x3d8   : > { %v4601_v29 = vadd.f32 %v4600_v39, %v4566_v43  ;;  %v3654_v38 = vsel %vm9791_vm4, %v3651_v48, %v3653_v59  ;;  %v3655_v3 = vrot.slane %v3530_v5, 6  ;;  %v4235_v31 = vshrl.u32 %v9240_v57, 4  ;;  %v9800_v48 = vld [vmem:[#allocation29_spill] sm:$0xff]  ;;  %v5979_v39 = vpop.f32.mrb[113].mxu0  ;;  %vm9808_vm11 = vmmov %vm9792_vm2  ;;  %v9809_v5 = vld [vmem:[#allocation31_spill] sm:$0xff] }
 0x3d9   : > { %v4567_v62 = vsel %vm9234_vm14, %v3810_v50, 0.0  ;;  %v3275_v60 = vsel %vm9792_vm2, %v3272_v12, %v3274_v55  ;;  %v3732_v2 = vadd.f32 %v3654_v38, %v3349_v34  ;;  %v3276_v44 = vrot.slane %v3154_v15, 5  ;;  %v3538_v18 = vpop.f32.mrb[114].mxu0 }
 0x3da   : > { %v4602_v46 = vadd.f32 %v4601_v29, %v4567_v62  ;;  %v3351_v61 = vadd.f32 %v3275_v60, %v9793_v20  ;;  %v3656_v52 = vsel %vm9794_vm6, %v3653_v59, %v3655_v3  ;;  %v9316_v35 = vsub.s32 %v9145_v11, %v4225_v22  ;;  %v9806_v22 = vld [vmem:[#allocation30_spill] sm:$0xff] }
 0x3db   : > { %v3775_v57 = vadd.f32 %v9150_v28, %v3732_v2  ;;  %vm9319_vm10 = vcmp.lt.s32.totalorder %v4424_v8, 16  ;;  %v3277_v47 = vsel %vm9799_vm5, %v3274_v55, %v3276_v44  ;;  %v3733_v36 = vadd.f32 %v3656_v52, %v3350_v17  ;;  %v3162_v17 = vpop.f32.mrb[114].mxu1 }
 0x3dc   : > { %v3352_v51 = vadd.f32 %v3277_v47, %v9800_v48  ;;  %vm4283_vm9 = vcmp.ne.s32.totalorder %v9298_v42, 0  ;;  %vm4319_vm14 = vcmp.lt.s32.totalorder %v9298_v42, 0  ;;  %v4236_v9 = vmul.u32 18, %v4235_v31  ;;  %v5898_v59 = vpop.f32.mrb[115].mxu1 }
 0x3dd   : > { %v3811_v49 = vmax.f32 %v3775_v57, 0.0  ;;  %v3776_v11 = vadd.f32 %v9150_v28, %v3733_v36  ;;  %vm9328_vm1 = vcmp.lt.s32.totalorder %v4425_v19, 16  ;;  %v4426_v12 = vsel %vm9311_vm12, %v9289_v33, %v9258_v10  ;;  %vm9345_vm0 = vmand %vm4319_vm14, %vm4283_vm9  ;;  %v5980_v19 = vpop.f32.mrb[115].mxu0 }
 0x3de   : > { %v3657_v53 = vrot.slane %v3535_v25, 6  ;;  %v4391_v26 = vadd.s32 18, %v9298_v42  ;;  %vm4284_vm8 = vcmp.ne.s32.totalorder %v9316_v35, 0  ;;  %vm4320_vm13 = vcmp.lt.s32.totalorder %v9316_v35, 0  ;;  %vm9816_vm9 = vmmov %vm9788_vm3 }
 0x3df   : > { %v4568_v34 = vsel %vm9319_vm10, %v3811_v49, 0.0  ;;  %v3812_v41 = vmax.f32 %v3776_v11, 0.0  ;;  %v3278_v4 = vrot.slane %v3159_v21, 5  ;;  %v4246_v0 = vshrl.u32 %v9293_v14, 4  ;;  %vm9373_vm10 = vmand %vm4320_vm13, %vm4284_vm8  ;;  %v9818_v21 = vld [vmem:[#allocation32_spill] sm:$0xff] }
 0x3e0   : > { %v4603_v56 = vadd.f32 %v4602_v46, %v4568_v34  ;;  %v3658_v24 = vsel %vm9788_vm3, %v3655_v3, %v3657_v53  ;;  %v3659_v8 = vrot.slane %v3538_v18, 6  ;;  %v4237_v7 = vsub.s32 %v9215_v30, %v4236_v9  ;;  %v3543_v3 = vpop.f32.mrb[116].mxu0  ;;  %vm9817_vm14 = vmmov %vm9808_vm11 }
 0x3e1   : > { %v4569_v40 = vsel %vm9328_vm1, %v3812_v41, 0.0  ;;  %v3279_v13 = vsel %vm9805_vm15, %v3276_v44, %v3278_v4  ;;  %v3734_v33 = vadd.f32 %v3658_v24, %v3351_v61  ;;  %v3280_v23 = vrot.slane %v3162_v17, 5  ;;  %v5983_v2 = vpop.f32.mrb[117].mxu0  ;;  %vm9819_vm1 = vmmov %vm9788_vm3 }
 0x3e2   : > { %v4604_v6 = vadd.f32 %v4603_v56, %v4569_v40  ;;  %v3353_v37 = vadd.f32 %v3279_v13, %v9806_v22  ;;  %v3660_v14 = vsel %vm9807_vm7, %v3657_v53, %v3659_v8  ;;  %v4427_v43 = vsel %vm9345_vm0, %v4391_v26, %v9298_v42  ;;  %v3167_v42 = vpop.f32.mrb[116].mxu1  ;;  %v3546_v61 = vpop.f32.mrb[118].mxu0  ;;  %vm9820_vm7 = vmmov %vm9819_vm1 }
 0x3e3   : > { %v3777_v50 = vadd.f32 %v9150_v28, %v3734_v33  ;;  %v3281_v30 = vsel %vm9808_vm11, %v3278_v4, %v3280_v23  ;;  %v3735_v55 = vadd.f32 %v3660_v14, %v3352_v51  ;;  %v4247_v32 = vmul.u32 18, %v4246_v0  ;;  %v5901_v1 = vpop.f32.mrb[117].mxu1  ;;  %v5984_v48 = vpop.f32.mrb[119].mxu0 }
 0x3e4   : > { %vm4462_vm4 = vcmp.lt.s32.totalorder %v4426_v12, 16  ;;  %v3354_v29 = vadd.f32 %v3281_v30, %v9809_v5  ;;  %vm4285_vm2 = vcmp.ne.s32.totalorder %v4237_v7, 0  ;;  %vm4321_vm6 = vcmp.lt.s32.totalorder %v4237_v7, 0  ;;  %v3170_v51 = vpop.f32.mrb[118].mxu1  ;;  %v3551_v54 = vpop.f32.mrb[120].mxu0 }
 0x3e5   : > { %v3813_v38 = vmax.f32 %v3777_v50, 0.0  ;;  %v3778_v15 = vadd.f32 %v9150_v28, %v3735_v55  ;;  %v4392_v16 = vadd.s32 18, %v9316_v35  ;;  %vm9365_vm12 = vcmp.lt.s32.totalorder %v4427_v43, 16  ;;  %vm9379_vm5 = vmand %vm4321_vm6, %vm4285_vm2  ;;  %v5902_v25 = vpop.f32.mrb[119].mxu1  ;;  %v5987_v10 = vpop.f32.mrb[121].mxu0 }
 0x3e6   : > { %v3661_v62 = vrot.slane %v3543_v3, 6  ;;  %v4393_v44 = vadd.s32 18, %v4237_v7  ;;  %v3282_v20 = vrot.slane %v3167_v42, 5  ;;  %v4248_v57 = vsub.s32 %v9243_v58, %v4247_v32  ;;  %v3554_v24 = vpop.f32.mrb[122].mxu0  ;;  %v4633_v5 = vld [vmem:[%s9453_s4] sm:$0x1] }
 0x3e7   : > { %v4570_v63 = vsel %vm4462_vm4, %v3813_v38, 0.0  ;;  %v3814_v46 = vmax.f32 %v3778_v15, 0.0  ;;  %v3663_v36 = vrot.slane %v3546_v61, 6  ;;  %v4428_v45 = vsel %vm9373_vm10, %v4392_v16, %v9316_v35  ;;  %v5988_v19 = vpop.f32.mrb[123].mxu0 }
 0x3e8   : > { %v4605_v27 = vadd.f32 %v4604_v6, %v4570_v63  ;;  %v3662_v47 = vsel %vm9816_vm9, %v3659_v8, %v3661_v62  ;;  %v3283_v49 = vsel %vm9817_vm14, %v3280_v23, %v3282_v20  ;;  %v4429_v39 = vsel %vm9379_vm5, %v4393_v44, %v4237_v7 }
 0x3e9   : > { %v4571_v9 = vsel %vm9365_vm12, %v3814_v46, 0.0  ;;  %v3736_v11 = vadd.f32 %v3662_v47, %v3353_v37  ;;  %v3355_v58 = vadd.f32 %v3283_v49, %v9818_v21  ;;  %v3664_v53 = vsel %vm9819_vm1, %v3661_v62, %v3663_v36 }
 0x3ea   : > { %v4606_v12 = vadd.f32 %v4605_v27, %v4571_v9  ;;  %v3737_v34 = vadd.f32 %v3664_v53, %v3354_v29  ;;  %vm4286_vm8 = vcmp.ne.s32.totalorder %v4248_v57, 0  ;;  %vm4322_vm13 = vcmp.lt.s32.totalorder %v4248_v57, 0 }
 0x3eb   : > { %v3779_v26 = vadd.f32 %v9150_v28, %v3736_v11  ;;  %vm4464_vm0 = vcmp.lt.s32.totalorder %v4428_v45, 16  ;;  %v4394_v35 = vadd.s32 18, %v4248_v57  ;;  %vm4465_vm3 = vcmp.lt.s32.totalorder %v4429_v39, 16  ;;  %vm4358_vm15 = vmand %vm4322_vm13, %vm4286_vm8 }
 0x3ec   : > { %v3780_v4 = vadd.f32 %v9150_v28, %v3737_v34  ;;  %v3665_v18 = vrot.slane %v3551_v54, 6 }
 0x3ed   : > { %v3815_v41 = vmax.f32 %v3779_v26, 0.0  ;;  %v4430_v13 = vsel %vm4358_vm15, %v4394_v35, %v4248_v57 }
 0x3ee   : > { %v3816_v56 = vmax.f32 %v3780_v4, 0.0  ;;  %v3666_v8 = vsel %vm9820_vm7, %v3663_v36, %v3665_v18  ;;  %vm4466_vm11 = vcmp.lt.s32.totalorder %v4430_v13, 16 }
 0x3ef   : > { %v4572_v0 = vsel %vm4464_vm0, %v3815_v41, 0.0  ;;  %v3738_v40 = vadd.f32 %v3666_v8, %v3355_v58 }
 0x3f0   : > { %v4607_v17 = vadd.f32 %v4606_v12, %v4572_v0  ;;  %v4573_v7 = vsel %vm4465_vm3, %v3816_v56, 0.0 }
 0x3f1   : > { %v3781_v23 = vadd.f32 %v9150_v28, %v3738_v40 }
 0x3f2   : > { %v4608_v33 = vadd.f32 %v4607_v17, %v4573_v7 }
 0x3f3   : > { %v3817_v59 = vmax.f32 %v3781_v23, 0.0 }
 0x3f5   : > { %v4574_v6 = vsel %vm4466_vm11, %v3817_v59, 0.0 }
 0x3f6   : > { %v4609_v22 = vadd.f32 %v4608_v33, %v4574_v6 }
 0x3f8   : > { %v4610_v37 = vrot.slane %v4609_v22, 4 }
 0x3fa   : > { %v4611_v14 = vadd.f32 %v4610_v37, %v4609_v22 }
 0x3fc   : > { %v4612_v43 = vrot.slane %v4611_v14, 2 }
 0x3fe   : > { %v4613_v50 = vadd.f32 %v4612_v43, %v4611_v14 }
 0x400   : > { %v4614_v30 = vrot.slane %v4613_v50, 1 }
 0x402   : > { %v4615_v55 = vadd.f32 %v4614_v30, %v4613_v50 }
 0x404   : > { %v4616_v32 = vmul.f32 0.00390625, %v4615_v55 }
 0x406   : > { %6022 = vmatmul.mubr.f32.vlgmr.msra.gmra.mrb[120].mxu1 %v4616_v32 }
 0x4d9   : > { %v4700_v28 = vpop.f32.mrb[120].mxu1 }
 0x4da   : > { %v4701_v29 = vadd.f32 %v4700_v28, %v4633_v5  ;;  %v6023_v38 = vpop.f32.mrb[121].mxu1 }
 0x4dc   : > { %4704 = vst [vmem:[%s216_s30] sm:$0x1] %v4701_v29 }
 0x4dd   : > { %6225 = shalt.err (!%p6222_p3)
}
 0x4de   : > { %s6226_s13 = scalar_lea.hbm %s9407_s15, 16  ;;  %s6230_s17 = scalar_lea.hbm %s9454_s5, 32 }
 0x4df   : > { %p6227_p4 = scmp.ne.s32.totalorder %s9407_s15, %s6226_s13  ;;  %p6231_p9 = scmp.lt.u32.totalorder %s9407_s15, %s9454_s5 }
 0x4e0   : > { %p6232_p10 = scmp.lt.u32.totalorder %s6230_s17, %s6226_s13  ;;  %p6234_p12 = scmp.lt.u32.totalorder %s6226_s13, %s9407_s15 }
 0x4e1   : > { %p6228_p7 = pnand %p6227_p4, %p6348_p5 }
 0x4e2   : > { %p6233_p11 = por %p6232_p10, %p6231_p9 }
 0x4e3   : > { %p6229_p8 = pneg %p6228_p7 }
 0x4e4   : > { %p6235_p13 = por %p6234_p12, %p6233_p11 }
 0x4e6   : > { %p6236_p0 = pnand %p6235_p13, %p6229_p8 }
 0x4e8   : > { %6239 = shalt.err (!%p6236_p0)
}
 0x4e9   : > { %6123 = dma.vmem_to_hbm [thread:$0]  (%p6348_p5), %s9409_s6, 16, %s9407_s15, %s4706_s9  }
 0x4ea PF: > { %p6129_p1 = scmp.ge.s32.totalorder %s6274_s21, 2  ;;  %s4730_s26 = sand.u32 1, %s6262_s18  }
 0x4eb   : > { %s4731_s30 = scalar_lea.sflag [#allocation3], %s4730_s26 }
 0x4ec   : > { %p6126_p2 = pnand %p6129_p1, %p6352_p6 }
 0x4ee   : > { %6257 = dma.done.wait (!%p6126_p2), %s4731_s30, 16  }
 0x4ef   : > { %6259 = vsyncadd (!%p6126_p2), %s4731_s30, 4294967280  ;;  %p15_p3 = scmp.ge.s32.totalorder %s6335_s24, 4   ;;  %s9821_s18 = smov %s6266_s19 }
 0x4f0   : > { %s9822_s19 = smov %s6270_s20  ;;  %s9823_s20 = smov %s6346_s27 }
 0x4f1   : > { %s9824_s21 = smov %s6335_s24  ;;  %17 = sbr.rel (!%p15_p3) target bundleno = 3 (0x3), region = 83 }
 0x4f8   :  { %4735 = vsyncpa [#allocation3], 1 }
 0x4f9   :  { %4737 = vsyncpa [#allocation3 + $0x1], 1 }

</bundles_post_ra>
